<compile_context>
chip_gen: v7x
topology: tpu7x:2x2x1
jax: 0.10.0
libtpu: 0.0.40
codegen_flags: <defaults>
</compile_context>

<pallas_src>
import jax
import jax.numpy as jnp
from jax import lax
from jax.experimental import pallas as pl
from jax.experimental.pallas import tpu as pltpu


# ---------------------------------------------------------------------------
# Fused Pallas kernel: 2 bidirectional LSTM layers + final Linear
# ---------------------------------------------------------------------------
def _fused_bilstm_kernel(x_ref,                     # [T*B, D]  bf16, time-major rows (row = t*B + b)
                         wih0_ref, b0_ref,          # [D, 8H] bf16, [1, 8H] f32 (layer-0 in-proj, fwd|bwd)
                         whh0_ref,                  # [2H, 8H] bf16 block-diag [[Wf,0],[0,Wb]]
                         w1a_ref, w1b_ref, b1_ref,  # [H, 8H] bf16 x2, [1, 8H] f32 (layer-1 in-proj)
                         whh1_ref,                  # [2H, 8H] bf16 block-diag
                         fcw_ref, fcb_ref,          # [2H, O] bf16, [1, O] f32
                         out_ref,                   # [B, O] f32
                         g_scr,                     # [T*B, 8H] f32  hoisted gate pre-acts (reused by both layers)
                         yf_scr, yb_scr):           # [T*B, H] bf16  layer-0 per-step outputs
    TB = x_ref.shape[0]
    H2, H8 = whh0_ref.shape            # 2H, 8H
    H = H2 // 2
    H4 = 4 * H
    B = out_ref.shape[0]
    T = TB // B
    f32, bf16 = jnp.float32, jnp.bfloat16

    # Lane mask selecting the "g" (cell-candidate) gate inside the merged fwd|bwd [B, 8H] slab:
    # lanes [2H,3H) (fwd) and [6H,7H) (bwd).
    lane = lax.broadcasted_iota(jnp.int32, (B, H8), 1)
    is_g_gate = ((lane >= 2 * H) & (lane < 3 * H)) | ((lane >= H4 + 2 * H) & (lane < H4 + 3 * H))

    def run_layer(whh_bd, write_outputs):
        # whh_bd: [2H, 8H] block-diagonal recurrent weights -> ONE MXU push per step for BOTH dirs.
        h = jnp.zeros((B, H2), bf16)            # concat(h_fwd, h_bwd), carried in bf16 (MXU operand)
        c_f = jnp.zeros((B, H), f32)
        c_b = jnp.zeros((B, H), f32)
        for s in range(T):                      # static unroll: T is a small Python int
            tf = s                              # fwd stream consumes input position s
            tb = T - 1 - s                      # bwd stream consumes input position T-1-s
            pre = jnp.concatenate(
                [g_scr[pl.ds(tf * B, B), 0:H4],     # fwd pre-gates at t = tf  (plain vld)
                 g_scr[pl.ds(tb * B, B), H4:H8]],   # bwd pre-gates at t = tb  (plain vld)
                axis=1)
            gates = pre + jnp.dot(h, whh_bd, preferred_element_type=f32)    # [B, 8H] f32
            # One tanh push + one sigmoid push over the full slab, lane-selected.
            acts = jnp.where(is_g_gate, jnp.tanh(gates), jax.nn.sigmoid(gates))
            c_f = acts[:, H:2 * H] * c_f + acts[:, 0:H] * acts[:, 2 * H:3 * H]
            c_b = (acts[:, H4 + H:H4 + 2 * H] * c_b
                   + acts[:, H4:H4 + H] * acts[:, H4 + 2 * H:H4 + 3 * H])
            h_f = acts[:, 3 * H:4 * H] * jnp.tanh(c_f)
            h_b = acts[:, H4 + 3 * H:H8] * jnp.tanh(c_b)
            # bf16 copy serves as next-step MXU operand AND as the stored layer output.
            h = jnp.concatenate([h_f, h_b], axis=1).astype(bf16)
            if write_outputs:
                yf_scr[pl.ds(tf * B, B), :] = h[:, 0:H]
                yb_scr[pl.ds(tb * B, B), :] = h[:, H:H2]
        return h                                # [B, 2H] bf16: concat(final fwd hidden, final bwd hidden)

    # ---- Layer 0: hoisted input projection for both directions, staged through VMEM scratch ----
    g_scr[...] = jnp.dot(x_ref[...], wih0_ref[...], preferred_element_type=f32) + b0_ref[...]
    run_layer(whh0_ref[...], True)

    # (dropout between layers = identity, inference semantics)
    # ---- Layer 1: hoisted input projection; fwd/bwd concat folded into split weights ----
    g_scr[...] = (jnp.dot(yf_scr[...], w1a_ref[...], preferred_element_type=f32)
                  + jnp.dot(yb_scr[...], w1b_ref[...], preferred_element_type=f32)
                  + b1_ref[...])
    h_final = run_layer(whh1_ref[...], False)

    # ---- Final classifier: cat(h_fwd, h_bwd) @ W_fc^T + b (concat already lives in h_final) ----
    out_ref[...] = jnp.dot(h_final, fcw_ref[...], preferred_element_type=f32) + fcb_ref[...]


# ---------------------------------------------------------------------------
# Wrapper
# ---------------------------------------------------------------------------
_VM = pl.BlockSpec(memory_space=pltpu.MemorySpace.VMEM)


def _block_diag(a, b):
    """[[a, 0], [0, b]] for a: [H,4H], b: [H,4H] -> [2H, 8H]."""
    return jnp.concatenate(
        [jnp.concatenate([a, jnp.zeros_like(b)], axis=1),
         jnp.concatenate([jnp.zeros_like(a), b], axis=1)], axis=0)


def pack_params(params):
    """One-time repack of PyTorch-layout params into the kernel's operand layout."""
    assert params["n_layers"] == 2, "fused kernel is specialized to the module default n_layers=2"
    bf16 = jnp.bfloat16
    wi0f, wh0f, bi0f, bh0f = params["lstm"][(0, "fwd")]
    wi0b, wh0b, bi0b, bh0b = params["lstm"][(0, "bwd")]
    wi1f, wh1f, bi1f, bh1f = params["lstm"][(1, "fwd")]
    wi1b, wh1b, bi1b, bh1b = params["lstm"][(1, "bwd")]
    H = wh0f.shape[1]
    return {
        "wih0": jnp.concatenate([wi0f.T, wi0b.T], axis=1).astype(bf16),            # [D, 8H]
        "b0": jnp.concatenate([bi0f + bh0f, bi0b + bh0b])[None, :].astype(jnp.float32),
        "whh0": _block_diag(wh0f.T, wh0b.T).astype(bf16),                           # [2H, 8H]
        "w1a": jnp.concatenate([wi1f.T[:H], wi1b.T[:H]], axis=1).astype(bf16),      # [H, 8H]
        "w1b": jnp.concatenate([wi1f.T[H:], wi1b.T[H:]], axis=1).astype(bf16),      # [H, 8H]
        "b1": jnp.concatenate([bi1f + bh1f, bi1b + bh1b])[None, :].astype(jnp.float32),
        "whh1": _block_diag(wh1f.T, wh1b.T).astype(bf16),                           # [2H, 8H]
        "fcw": params["fc_w"].T.astype(bf16),                                       # [2H, O]
        "fcb": params["fc_b"][None, :].astype(jnp.float32),                         # [1, O]
    }


@jax.jit
def bilstm_classifier_forward(text, packed):
    """text: [B, T, in_dim] (batch_first=True, like the PyTorch module). Prefer B multiple of 8."""
    B, T, D = text.shape
    H = packed["whh0"].shape[0] // 2
    O = packed["fcb"].shape[1]
    # Time-major layout + bf16 cast fused in one XLA prologue op (minor at these shapes).
    x_flat = jnp.transpose(text, (1, 0, 2)).reshape(T * B, D).astype(jnp.bfloat16)
    return pl.pallas_call(
        _fused_bilstm_kernel,
        out_shape=jax.ShapeDtypeStruct((B, O), jnp.float32),
        in_specs=[_VM] * 10,
        out_specs=_VM,
        scratch_shapes=[pltpu.VMEM((T * B, 8 * H), jnp.float32),
                        pltpu.VMEM((T * B, H), jnp.bfloat16),
                        pltpu.VMEM((T * B, H), jnp.bfloat16)],
    )(x_flat,
      packed["wih0"], packed["b0"], packed["whh0"],
      packed["w1a"], packed["w1b"], packed["b1"], packed["whh1"],
      packed["fcw"], packed["fcb"])


# ---------------------------------------------------------------------------
# Pure-JAX reference with matching numerics (bf16 MXU operands, f32 accumulate/elementwise)
# ---------------------------------------------------------------------------
def _ref_lstm_dir(x_tbd, w_ih, w_hh, b_ih, b_hh):
    T, B, _ = x_tbd.shape
    H = w_hh.shape[1]
    bf16 = jnp.bfloat16
    wih_t = w_ih.T.astype(bf16)
    whh_t = w_hh.T.astype(bf16)
    b = (b_ih + b_hh)[None, :]

    def step(carry, x_t):
        h, c = carry
        gates = (jnp.dot(x_t.astype(bf16), wih_t, preferred_element_type=jnp.float32)
                 + jnp.dot(h.astype(bf16), whh_t, preferred_element_type=jnp.float32)
                 + b)
        i, f, g, o = jnp.split(gates, 4, axis=-1)
        c = jax.nn.sigmoid(f) * c + jax.nn.sigmoid(i) * jnp.tanh(g)
        h = jax.nn.sigmoid(o) * jnp.tanh(c)
        return (h, c), h

    (hT, _cT), ys = lax.scan(step, (jnp.zeros((B, H), jnp.float32),
                                    jnp.zeros((B, H), jnp.float32)), x_tbd)
    return ys, hT


def bilstm_classifier_reference(text, params):
    x = jnp.transpose(text, (1, 0, 2)).astype(jnp.float32)
    layer_in = x
    h_f = h_b = None
    for layer in range(params["n_layers"]):
        yf, h_f = _ref_lstm_dir(layer_in, *params["lstm"][(layer, "fwd")])
        yb_rev, h_b = _ref_lstm_dir(layer_in[::-1], *params["lstm"][(layer, "bwd")])
        layer_in = jnp.concatenate([yf, yb_rev[::-1]], axis=-1)
    hidden = jnp.concatenate([h_f, h_b], axis=-1)
    return (jnp.dot(hidden.astype(jnp.bfloat16), params["fc_w"].T.astype(jnp.bfloat16),
                    preferred_element_type=jnp.float32) + params["fc_b"])


# ---------------------------------------------------------------------------
# Deterministic parameter init (PyTorch LSTM default: U(-1/sqrt(H), 1/sqrt(H)))
# ---------------------------------------------------------------------------
def init_params(key, in_dim, out_dim, hid_dim, n_layers):
    params = {"n_layers": n_layers, "lstm": {}}
    scale = 1.0 / jnp.sqrt(hid_dim)
    for layer in range(n_layers):
        d_in = in_dim if layer == 0 else 2 * hid_dim
        for direction in ("fwd", "bwd"):
            key, k1, k2, k3, k4 = jax.random.split(key, 5)
            w_ih = jax.random.uniform(k1, (4 * hid_dim, d_in), jnp.float32, -scale, scale)
            w_hh = jax.random.uniform(k2, (4 * hid_dim, hid_dim), jnp.float32, -scale, scale)
            b_ih = jax.random.uniform(k3, (4 * hid_dim,), jnp.float32, -scale, scale)
            b_hh = jax.random.uniform(k4, (4 * hid_dim,), jnp.float32, -scale, scale)
            params["lstm"][(layer, direction)] = (w_ih, w_hh, b_ih, b_hh)
    key, k1, k2 = jax.random.split(key, 3)
    fc_scale = 1.0 / jnp.sqrt(2 * hid_dim)
    params["fc_w"] = jax.random.uniform(k1, (out_dim, 2 * hid_dim), jnp.float32, -fc_scale, fc_scale)
    params["fc_b"] = jax.random.uniform(k2, (out_dim,), jnp.float32, -fc_scale, fc_scale)
    return params


# ---------------------------------------------------------------------------
if __name__ == "__main__":
    # B=8 fills all 8 f32 sublanes (per perf review); other dims stay at module-consistent small sizes.
    B, T, IN_DIM, HID_DIM, OUT_DIM, N_LAYERS = 8, 8, 16, 32, 4, 2

    key = jax.random.PRNGKey(0)
    key, k_x = jax.random.split(key)
    text = jax.random.normal(k_x, (B, T, IN_DIM), jnp.float32)   # [batch, seq, in_dim]
    params = init_params(key, IN_DIM, OUT_DIM, HID_DIM, N_LAYERS)
    packed = pack_params(params)

    logits = jax.block_until_ready(bilstm_classifier_forward(text, packed))
    ref = jax.block_until_ready(bilstm_classifier_reference(text, params))

    assert logits.shape == (B, OUT_DIM)
    assert jnp.allclose(logits, ref, atol=2e-3, rtol=2e-3), "mismatch vs JAX reference"

    print("KERNEL_OK")
</pallas_src>

<mosaic_0001>
module attributes {stable_mosaic.version = 11 : i64} {
  func.func @_fused_bilstm_kernel(%arg0: memref<64x16xbf16, #tpu.memory_space<vmem>>, %arg1: memref<16x256xbf16, #tpu.memory_space<vmem>>, %arg2: memref<1x256xf32, #tpu.memory_space<vmem>>, %arg3: memref<64x256xbf16, #tpu.memory_space<vmem>>, %arg4: memref<32x256xbf16, #tpu.memory_space<vmem>>, %arg5: memref<32x256xbf16, #tpu.memory_space<vmem>>, %arg6: memref<1x256xf32, #tpu.memory_space<vmem>>, %arg7: memref<64x256xbf16, #tpu.memory_space<vmem>>, %arg8: memref<64x4xbf16, #tpu.memory_space<vmem>>, %arg9: memref<1x4xf32, #tpu.memory_space<vmem>>, %arg10: memref<8x4xf32, #tpu.memory_space<vmem>>, %arg11: memref<64x256xf32, #tpu.memory_space<vmem>>, %arg12: memref<64x32xbf16, #tpu.memory_space<vmem>>, %arg13: memref<64x32xbf16, #tpu.memory_space<vmem>>) attributes {dimension_semantics = [], scalar_prefetch = 0 : i64, scratch_operands = 3 : i64, tpu.core_type = #tpu.core_type<tc>} {
    %0 = tpu.iota {dimensions = array<i32: 1>} : vector<8x256xi32>
    %c64_i32 = arith.constant 64 : i32
    %1 = vector.broadcast %c64_i32 : i32 to vector<8x256xi32>
    %2 = arith.cmpi sge, %0, %1 : vector<8x256xi32>
    %c96_i32 = arith.constant 96 : i32
    %3 = vector.broadcast %c96_i32 : i32 to vector<8x256xi32>
    %4 = arith.cmpi slt, %0, %3 : vector<8x256xi32>
    %5 = arith.andi %2, %4 : vector<8x256xi1>
    %c192_i32 = arith.constant 192 : i32
    %6 = vector.broadcast %c192_i32 : i32 to vector<8x256xi32>
    %7 = arith.cmpi sge, %0, %6 : vector<8x256xi32>
    %c224_i32 = arith.constant 224 : i32
    %8 = vector.broadcast %c224_i32 : i32 to vector<8x256xi32>
    %9 = arith.cmpi slt, %0, %8 : vector<8x256xi32>
    %10 = arith.andi %7, %9 : vector<8x256xi1>
    %11 = arith.ori %5, %10 : vector<8x256xi1>
    %c0 = arith.constant 0 : index
    %c0_0 = arith.constant 0 : index
    %12 = vector.load %arg0[%c0, %c0_0] : memref<64x16xbf16, #tpu.memory_space<vmem>>, vector<64x16xbf16>
    %c0_1 = arith.constant 0 : index
    %c0_2 = arith.constant 0 : index
    %13 = vector.load %arg1[%c0_1, %c0_2] : memref<16x256xbf16, #tpu.memory_space<vmem>>, vector<16x256xbf16>
    %cst = arith.constant dense<0.000000e+00> : vector<64x256xf32>
    %14 = tpu.matmul %12, %13, %cst {dimension_numbers = #tpu.dot_dimension_numbers<[1], [0], [0], [1], [0, 0, 1, 1], [], []>} : vector<64x16xbf16>, vector<16x256xbf16>, vector<64x256xf32> -> vector<64x256xf32>
    %c0_3 = arith.constant 0 : index
    %c0_4 = arith.constant 0 : index
    %15 = vector.load %arg2[%c0_3, %c0_4] : memref<1x256xf32, #tpu.memory_space<vmem>>, vector<1x256xf32>
    %16 = vector.broadcast %15 : vector<1x256xf32> to vector<64x256xf32>
    %17 = arith.addf %14, %16 : vector<64x256xf32>
    %c0_5 = arith.constant 0 : index
    %c0_6 = arith.constant 0 : index
    %18 = vector.load %arg11[%c0_5, %c0_6] : memref<64x256xf32, #tpu.memory_space<vmem>>, vector<64x256xf32>
    tpu.vector_store %arg11[%c0_5, %c0_6], %17 {strides = array<i32>} : memref<64x256xf32, #tpu.memory_space<vmem>>, vector<64x256xf32>,
    %c0_7 = arith.constant 0 : index
    %c0_8 = arith.constant 0 : index
    %19 = vector.load %arg3[%c0_7, %c0_8] : memref<64x256xbf16, #tpu.memory_space<vmem>>, vector<64x256xbf16>
    %cst_9 = arith.constant 0.000000e+00 : bf16
    %20 = vector.broadcast %cst_9 : bf16 to vector<8x64xbf16>
    %cst_10 = arith.constant 0.000000e+00 : f32
    %21 = vector.broadcast %cst_10 : f32 to vector<8x32xf32>
    %cst_11 = arith.constant 0.000000e+00 : f32
    %22 = vector.broadcast %cst_11 : f32 to vector<8x32xf32>
    %c0_12 = arith.constant 0 : index
    %c0_13 = arith.constant 0 : index
    %23 = vector.load %arg11[%c0_12, %c0_13] : memref<64x256xf32, #tpu.memory_space<vmem>>, vector<8x128xf32>
    %c56 = arith.constant 56 : index
    %c128 = arith.constant 128 : index
    %24 = vector.load %arg11[%c56, %c128] : memref<64x256xf32, #tpu.memory_space<vmem>>, vector<8x128xf32>
    %25 = tpu.concatenate %23, %24 in 1 : vector<8x128xf32>, vector<8x128xf32> -> vector<8x256xf32>
    %cst_14 = arith.constant dense<0.000000e+00> : vector<8x256xf32>
    %26 = tpu.matmul %20, %19, %cst_14 {dimension_numbers = #tpu.dot_dimension_numbers<[1], [0], [0], [1], [0, 0, 1, 1], [], []>} : vector<8x64xbf16>, vector<64x256xbf16>, vector<8x256xf32> -> vector<8x256xf32>
    %27 = arith.addf %25, %26 : vector<8x256xf32>
    %28 = math.tanh %27 : vector<8x256xf32>
    %29 = arith.negf %27 : vector<8x256xf32>
    %30 = math.exp %29 : vector<8x256xf32>
    %cst_15 = arith.constant 1.000000e+00 : f32
    %31 = vector.broadcast %cst_15 : f32 to vector<8x256xf32>
    %32 = arith.addf %31, %30 : vector<8x256xf32>
    %33 = arith.divf %31, %32 : vector<8x256xf32>
    %34 = arith.select %11, %28, %33 : vector<8x256xi1>, vector<8x256xf32>
    %35 = vector.extract_strided_slice %34 {offsets = [0, 32], sizes = [8, 32], strides = [1, 1]} : vector<8x256xf32> to vector<8x32xf32>
    %36 = arith.mulf %35, %21 : vector<8x32xf32>
    %37 = vector.extract_strided_slice %34 {offsets = [0, 0], sizes = [8, 32], strides = [1, 1]} : vector<8x256xf32> to vector<8x32xf32>
    %38 = vector.extract_strided_slice %34 {offsets = [0, 64], sizes = [8, 32], strides = [1, 1]} : vector<8x256xf32> to vector<8x32xf32>
    %39 = arith.mulf %37, %38 : vector<8x32xf32>
    %40 = arith.addf %36, %39 : vector<8x32xf32>
    %41 = vector.extract_strided_slice %34 {offsets = [0, 160], sizes = [8, 32], strides = [1, 1]} : vector<8x256xf32> to vector<8x32xf32>
    %42 = arith.mulf %41, %22 : vector<8x32xf32>
    %43 = vector.extract_strided_slice %34 {offsets = [0, 128], sizes = [8, 32], strides = [1, 1]} : vector<8x256xf32> to vector<8x32xf32>
    %44 = vector.extract_strided_slice %34 {offsets = [0, 192], sizes = [8, 32], strides = [1, 1]} : vector<8x256xf32> to vector<8x32xf32>
    %45 = arith.mulf %43, %44 : vector<8x32xf32>
    %46 = arith.addf %42, %45 : vector<8x32xf32>
    %47 = vector.extract_strided_slice %34 {offsets = [0, 96], sizes = [8, 32], strides = [1, 1]} : vector<8x256xf32> to vector<8x32xf32>
    %48 = math.tanh %40 : vector<8x32xf32>
    %49 = arith.mulf %47, %48 : vector<8x32xf32>
    %50 = vector.extract_strided_slice %34 {offsets = [0, 224], sizes = [8, 32], strides = [1, 1]} : vector<8x256xf32> to vector<8x32xf32>
    %51 = math.tanh %46 : vector<8x32xf32>
    %52 = arith.mulf %50, %51 : vector<8x32xf32>
    %53 = tpu.concatenate %49, %52 in 1 : vector<8x32xf32>, vector<8x32xf32> -> vector<8x64xf32>
    %54 = arith.truncf %53 : vector<8x64xf32> to vector<8x64xbf16>
    %55 = vector.extract_strided_slice %54 {offsets = [0, 0], sizes = [8, 32], strides = [1, 1]} : vector<8x64xbf16> to vector<8x32xbf16>
    %c0_16 = arith.constant 0 : index
    %c0_17 = arith.constant 0 : index
    %56 = vector.load %arg12[%c0_16, %c0_17] : memref<64x32xbf16, #tpu.memory_space<vmem>>, vector<8x32xbf16>
    tpu.vector_store %arg12[%c0_16, %c0_17], %55 {strides = array<i32>} : memref<64x32xbf16, #tpu.memory_space<vmem>>, vector<8x32xbf16>,
    %57 = vector.extract_strided_slice %54 {offsets = [0, 32], sizes = [8, 32], strides = [1, 1]} : vector<8x64xbf16> to vector<8x32xbf16>
    %c56_18 = arith.constant 56 : index
    %c0_19 = arith.constant 0 : index
    %58 = vector.load %arg13[%c56_18, %c0_19] : memref<64x32xbf16, #tpu.memory_space<vmem>>, vector<8x32xbf16>
    tpu.vector_store %arg13[%c56_18, %c0_19], %57 {strides = array<i32>} : memref<64x32xbf16, #tpu.memory_space<vmem>>, vector<8x32xbf16>,
    %c8 = arith.constant 8 : index
    %c0_20 = arith.constant 0 : index
    %59 = vector.load %arg11[%c8, %c0_20] : memref<64x256xf32, #tpu.memory_space<vmem>>, vector<8x128xf32>
    %c48 = arith.constant 48 : index
    %c128_21 = arith.constant 128 : index
    %60 = vector.load %arg11[%c48, %c128_21] : memref<64x256xf32, #tpu.memory_space<vmem>>, vector<8x128xf32>
    %61 = tpu.concatenate %59, %60 in 1 : vector<8x128xf32>, vector<8x128xf32> -> vector<8x256xf32>
    %cst_22 = arith.constant dense<0.000000e+00> : vector<8x256xf32>
    %62 = tpu.matmul %54, %19, %cst_22 {dimension_numbers = #tpu.dot_dimension_numbers<[1], [0], [0], [1], [0, 0, 1, 1], [], []>} : vector<8x64xbf16>, vector<64x256xbf16>, vector<8x256xf32> -> vector<8x256xf32>
    %63 = arith.addf %61, %62 : vector<8x256xf32>
    %64 = math.tanh %63 : vector<8x256xf32>
    %65 = arith.negf %63 : vector<8x256xf32>
    %66 = math.exp %65 : vector<8x256xf32>
    %cst_23 = arith.constant 1.000000e+00 : f32
    %67 = vector.broadcast %cst_23 : f32 to vector<8x256xf32>
    %68 = arith.addf %67, %66 : vector<8x256xf32>
    %69 = arith.divf %67, %68 : vector<8x256xf32>
    %70 = arith.select %11, %64, %69 : vector<8x256xi1>, vector<8x256xf32>
    %71 = vector.extract_strided_slice %70 {offsets = [0, 32], sizes = [8, 32], strides = [1, 1]} : vector<8x256xf32> to vector<8x32xf32>
    %72 = arith.mulf %71, %40 : vector<8x32xf32>
    %73 = vector.extract_strided_slice %70 {offsets = [0, 0], sizes = [8, 32], strides = [1, 1]} : vector<8x256xf32> to vector<8x32xf32>
    %74 = vector.extract_strided_slice %70 {offsets = [0, 64], sizes = [8, 32], strides = [1, 1]} : vector<8x256xf32> to vector<8x32xf32>
    %75 = arith.mulf %73, %74 : vector<8x32xf32>
    %76 = arith.addf %72, %75 : vector<8x32xf32>
    %77 = vector.extract_strided_slice %70 {offsets = [0, 160], sizes = [8, 32], strides = [1, 1]} : vector<8x256xf32> to vector<8x32xf32>
    %78 = arith.mulf %77, %46 : vector<8x32xf32>
    %79 = vector.extract_strided_slice %70 {offsets = [0, 128], sizes = [8, 32], strides = [1, 1]} : vector<8x256xf32> to vector<8x32xf32>
    %80 = vector.extract_strided_slice %70 {offsets = [0, 192], sizes = [8, 32], strides = [1, 1]} : vector<8x256xf32> to vector<8x32xf32>
    %81 = arith.mulf %79, %80 : vector<8x32xf32>
    %82 = arith.addf %78, %81 : vector<8x32xf32>
    %83 = vector.extract_strided_slice %70 {offsets = [0, 96], sizes = [8, 32], strides = [1, 1]} : vector<8x256xf32> to vector<8x32xf32>
    %84 = math.tanh %76 : vector<8x32xf32>
    %85 = arith.mulf %83, %84 : vector<8x32xf32>
    %86 = vector.extract_strided_slice %70 {offsets = [0, 224], sizes = [8, 32], strides = [1, 1]} : vector<8x256xf32> to vector<8x32xf32>
    %87 = math.tanh %82 : vector<8x32xf32>
    %88 = arith.mulf %86, %87 : vector<8x32xf32>
    %89 = tpu.concatenate %85, %88 in 1 : vector<8x32xf32>, vector<8x32xf32> -> vector<8x64xf32>
    %90 = arith.truncf %89 : vector<8x64xf32> to vector<8x64xbf16>
    %91 = vector.extract_strided_slice %90 {offsets = [0, 0], sizes = [8, 32], strides = [1, 1]} : vector<8x64xbf16> to vector<8x32xbf16>
    %c8_24 = arith.constant 8 : index
    %c0_25 = arith.constant 0 : index
    %92 = vector.load %arg12[%c8_24, %c0_25] : memref<64x32xbf16, #tpu.memory_space<vmem>>, vector<8x32xbf16>
    tpu.vector_store %arg12[%c8_24, %c0_25], %91 {strides = array<i32>} : memref<64x32xbf16, #tpu.memory_space<vmem>>, vector<8x32xbf16>,
    %93 = vector.extract_strided_slice %90 {offsets = [0, 32], sizes = [8, 32], strides = [1, 1]} : vector<8x64xbf16> to vector<8x32xbf16>
    %c48_26 = arith.constant 48 : index
    %c0_27 = arith.constant 0 : index
    %94 = vector.load %arg13[%c48_26, %c0_27] : memref<64x32xbf16, #tpu.memory_space<vmem>>, vector<8x32xbf16>
    tpu.vector_store %arg13[%c48_26, %c0_27], %93 {strides = array<i32>} : memref<64x32xbf16, #tpu.memory_space<vmem>>, vector<8x32xbf16>,
    %c16 = arith.constant 16 : index
    %c0_28 = arith.constant 0 : index
    %95 = vector.load %arg11[%c16, %c0_28] : memref<64x256xf32, #tpu.memory_space<vmem>>, vector<8x128xf32>
    %c40 = arith.constant 40 : index
    %c128_29 = arith.constant 128 : index
    %96 = vector.load %arg11[%c40, %c128_29] : memref<64x256xf32, #tpu.memory_space<vmem>>, vector<8x128xf32>
    %97 = tpu.concatenate %95, %96 in 1 : vector<8x128xf32>, vector<8x128xf32> -> vector<8x256xf32>
    %cst_30 = arith.constant dense<0.000000e+00> : vector<8x256xf32>
    %98 = tpu.matmul %90, %19, %cst_30 {dimension_numbers = #tpu.dot_dimension_numbers<[1], [0], [0], [1], [0, 0, 1, 1], [], []>} : vector<8x64xbf16>, vector<64x256xbf16>, vector<8x256xf32> -> vector<8x256xf32>
    %99 = arith.addf %97, %98 : vector<8x256xf32>
    %100 = math.tanh %99 : vector<8x256xf32>
    %101 = arith.negf %99 : vector<8x256xf32>
    %102 = math.exp %101 : vector<8x256xf32>
    %cst_31 = arith.constant 1.000000e+00 : f32
    %103 = vector.broadcast %cst_31 : f32 to vector<8x256xf32>
    %104 = arith.addf %103, %102 : vector<8x256xf32>
    %105 = arith.divf %103, %104 : vector<8x256xf32>
    %106 = arith.select %11, %100, %105 : vector<8x256xi1>, vector<8x256xf32>
    %107 = vector.extract_strided_slice %106 {offsets = [0, 32], sizes = [8, 32], strides = [1, 1]} : vector<8x256xf32> to vector<8x32xf32>
    %108 = arith.mulf %107, %76 : vector<8x32xf32>
    %109 = vector.extract_strided_slice %106 {offsets = [0, 0], sizes = [8, 32], strides = [1, 1]} : vector<8x256xf32> to vector<8x32xf32>
    %110 = vector.extract_strided_slice %106 {offsets = [0, 64], sizes = [8, 32], strides = [1, 1]} : vector<8x256xf32> to vector<8x32xf32>
    %111 = arith.mulf %109, %110 : vector<8x32xf32>
    %112 = arith.addf %108, %111 : vector<8x32xf32>
    %113 = vector.extract_strided_slice %106 {offsets = [0, 160], sizes = [8, 32], strides = [1, 1]} : vector<8x256xf32> to vector<8x32xf32>
    %114 = arith.mulf %113, %82 : vector<8x32xf32>
    %115 = vector.extract_strided_slice %106 {offsets = [0, 128], sizes = [8, 32], strides = [1, 1]} : vector<8x256xf32> to vector<8x32xf32>
    %116 = vector.extract_strided_slice %106 {offsets = [0, 192], sizes = [8, 32], strides = [1, 1]} : vector<8x256xf32> to vector<8x32xf32>
    %117 = arith.mulf %115, %116 : vector<8x32xf32>
    %118 = arith.addf %114, %117 : vector<8x32xf32>
    %119 = vector.extract_strided_slice %106 {offsets = [0, 96], sizes = [8, 32], strides = [1, 1]} : vector<8x256xf32> to vector<8x32xf32>
    %120 = math.tanh %112 : vector<8x32xf32>
    %121 = arith.mulf %119, %120 : vector<8x32xf32>
    %122 = vector.extract_strided_slice %106 {offsets = [0, 224], sizes = [8, 32], strides = [1, 1]} : vector<8x256xf32> to vector<8x32xf32>
    %123 = math.tanh %118 : vector<8x32xf32>
    %124 = arith.mulf %122, %123 : vector<8x32xf32>
    %125 = tpu.concatenate %121, %124 in 1 : vector<8x32xf32>, vector<8x32xf32> -> vector<8x64xf32>
    %126 = arith.truncf %125 : vector<8x64xf32> to vector<8x64xbf16>
    %127 = vector.extract_strided_slice %126 {offsets = [0, 0], sizes = [8, 32], strides = [1, 1]} : vector<8x64xbf16> to vector<8x32xbf16>
    %c16_32 = arith.constant 16 : index
    %c0_33 = arith.constant 0 : index
    %128 = vector.load %arg12[%c16_32, %c0_33] : memref<64x32xbf16, #tpu.memory_space<vmem>>, vector<8x32xbf16>
    tpu.vector_store %arg12[%c16_32, %c0_33], %127 {strides = array<i32>} : memref<64x32xbf16, #tpu.memory_space<vmem>>, vector<8x32xbf16>,
    %129 = vector.extract_strided_slice %126 {offsets = [0, 32], sizes = [8, 32], strides = [1, 1]} : vector<8x64xbf16> to vector<8x32xbf16>
    %c40_34 = arith.constant 40 : index
    %c0_35 = arith.constant 0 : index
    %130 = vector.load %arg13[%c40_34, %c0_35] : memref<64x32xbf16, #tpu.memory_space<vmem>>, vector<8x32xbf16>
    tpu.vector_store %arg13[%c40_34, %c0_35], %129 {strides = array<i32>} : memref<64x32xbf16, #tpu.memory_space<vmem>>, vector<8x32xbf16>,
    %c24 = arith.constant 24 : index
    %c0_36 = arith.constant 0 : index
    %131 = vector.load %arg11[%c24, %c0_36] : memref<64x256xf32, #tpu.memory_space<vmem>>, vector<8x128xf32>
    %c32 = arith.constant 32 : index
    %c128_37 = arith.constant 128 : index
    %132 = vector.load %arg11[%c32, %c128_37] : memref<64x256xf32, #tpu.memory_space<vmem>>, vector<8x128xf32>
    %133 = tpu.concatenate %131, %132 in 1 : vector<8x128xf32>, vector<8x128xf32> -> vector<8x256xf32>
    %cst_38 = arith.constant dense<0.000000e+00> : vector<8x256xf32>
    %134 = tpu.matmul %126, %19, %cst_38 {dimension_numbers = #tpu.dot_dimension_numbers<[1], [0], [0], [1], [0, 0, 1, 1], [], []>} : vector<8x64xbf16>, vector<64x256xbf16>, vector<8x256xf32> -> vector<8x256xf32>
    %135 = arith.addf %133, %134 : vector<8x256xf32>
    %136 = math.tanh %135 : vector<8x256xf32>
    %137 = arith.negf %135 : vector<8x256xf32>
    %138 = math.exp %137 : vector<8x256xf32>
    %cst_39 = arith.constant 1.000000e+00 : f32
    %139 = vector.broadcast %cst_39 : f32 to vector<8x256xf32>
    %140 = arith.addf %139, %138 : vector<8x256xf32>
    %141 = arith.divf %139, %140 : vector<8x256xf32>
    %142 = arith.select %11, %136, %141 : vector<8x256xi1>, vector<8x256xf32>
    %143 = vector.extract_strided_slice %142 {offsets = [0, 32], sizes = [8, 32], strides = [1, 1]} : vector<8x256xf32> to vector<8x32xf32>
    %144 = arith.mulf %143, %112 : vector<8x32xf32>
    %145 = vector.extract_strided_slice %142 {offsets = [0, 0], sizes = [8, 32], strides = [1, 1]} : vector<8x256xf32> to vector<8x32xf32>
    %146 = vector.extract_strided_slice %142 {offsets = [0, 64], sizes = [8, 32], strides = [1, 1]} : vector<8x256xf32> to vector<8x32xf32>
    %147 = arith.mulf %145, %146 : vector<8x32xf32>
    %148 = arith.addf %144, %147 : vector<8x32xf32>
    %149 = vector.extract_strided_slice %142 {offsets = [0, 160], sizes = [8, 32], strides = [1, 1]} : vector<8x256xf32> to vector<8x32xf32>
    %150 = arith.mulf %149, %118 : vector<8x32xf32>
    %151 = vector.extract_strided_slice %142 {offsets = [0, 128], sizes = [8, 32], strides = [1, 1]} : vector<8x256xf32> to vector<8x32xf32>
    %152 = vector.extract_strided_slice %142 {offsets = [0, 192], sizes = [8, 32], strides = [1, 1]} : vector<8x256xf32> to vector<8x32xf32>
    %153 = arith.mulf %151, %152 : vector<8x32xf32>
    %154 = arith.addf %150, %153 : vector<8x32xf32>
    %155 = vector.extract_strided_slice %142 {offsets = [0, 96], sizes = [8, 32], strides = [1, 1]} : vector<8x256xf32> to vector<8x32xf32>
    %156 = math.tanh %148 : vector<8x32xf32>
    %157 = arith.mulf %155, %156 : vector<8x32xf32>
    %158 = vector.extract_strided_slice %142 {offsets = [0, 224], sizes = [8, 32], strides = [1, 1]} : vector<8x256xf32> to vector<8x32xf32>
    %159 = math.tanh %154 : vector<8x32xf32>
    %160 = arith.mulf %158, %159 : vector<8x32xf32>
    %161 = tpu.concatenate %157, %160 in 1 : vector<8x32xf32>, vector<8x32xf32> -> vector<8x64xf32>
    %162 = arith.truncf %161 : vector<8x64xf32> to vector<8x64xbf16>
    %163 = vector.extract_strided_slice %162 {offsets = [0, 0], sizes = [8, 32], strides = [1, 1]} : vector<8x64xbf16> to vector<8x32xbf16>
    %c24_40 = arith.constant 24 : index
    %c0_41 = arith.constant 0 : index
    %164 = vector.load %arg12[%c24_40, %c0_41] : memref<64x32xbf16, #tpu.memory_space<vmem>>, vector<8x32xbf16>
    tpu.vector_store %arg12[%c24_40, %c0_41], %163 {strides = array<i32>} : memref<64x32xbf16, #tpu.memory_space<vmem>>, vector<8x32xbf16>,
    %165 = vector.extract_strided_slice %162 {offsets = [0, 32], sizes = [8, 32], strides = [1, 1]} : vector<8x64xbf16> to vector<8x32xbf16>
    %c32_42 = arith.constant 32 : index
    %c0_43 = arith.constant 0 : index
    %166 = vector.load %arg13[%c32_42, %c0_43] : memref<64x32xbf16, #tpu.memory_space<vmem>>, vector<8x32xbf16>
    tpu.vector_store %arg13[%c32_42, %c0_43], %165 {strides = array<i32>} : memref<64x32xbf16, #tpu.memory_space<vmem>>, vector<8x32xbf16>,
    %c32_44 = arith.constant 32 : index
    %c0_45 = arith.constant 0 : index
    %167 = vector.load %arg11[%c32_44, %c0_45] : memref<64x256xf32, #tpu.memory_space<vmem>>, vector<8x128xf32>
    %c24_46 = arith.constant 24 : index
    %c128_47 = arith.constant 128 : index
    %168 = vector.load %arg11[%c24_46, %c128_47] : memref<64x256xf32, #tpu.memory_space<vmem>>, vector<8x128xf32>
    %169 = tpu.concatenate %167, %168 in 1 : vector<8x128xf32>, vector<8x128xf32> -> vector<8x256xf32>
    %cst_48 = arith.constant dense<0.000000e+00> : vector<8x256xf32>
    %170 = tpu.matmul %162, %19, %cst_48 {dimension_numbers = #tpu.dot_dimension_numbers<[1], [0], [0], [1], [0, 0, 1, 1], [], []>} : vector<8x64xbf16>, vector<64x256xbf16>, vector<8x256xf32> -> vector<8x256xf32>
    %171 = arith.addf %169, %170 : vector<8x256xf32>
    %172 = math.tanh %171 : vector<8x256xf32>
    %173 = arith.negf %171 : vector<8x256xf32>
    %174 = math.exp %173 : vector<8x256xf32>
    %cst_49 = arith.constant 1.000000e+00 : f32
    %175 = vector.broadcast %cst_49 : f32 to vector<8x256xf32>
    %176 = arith.addf %175, %174 : vector<8x256xf32>
    %177 = arith.divf %175, %176 : vector<8x256xf32>
    %178 = arith.select %11, %172, %177 : vector<8x256xi1>, vector<8x256xf32>
    %179 = vector.extract_strided_slice %178 {offsets = [0, 32], sizes = [8, 32], strides = [1, 1]} : vector<8x256xf32> to vector<8x32xf32>
    %180 = arith.mulf %179, %148 : vector<8x32xf32>
    %181 = vector.extract_strided_slice %178 {offsets = [0, 0], sizes = [8, 32], strides = [1, 1]} : vector<8x256xf32> to vector<8x32xf32>
    %182 = vector.extract_strided_slice %178 {offsets = [0, 64], sizes = [8, 32], strides = [1, 1]} : vector<8x256xf32> to vector<8x32xf32>
    %183 = arith.mulf %181, %182 : vector<8x32xf32>
    %184 = arith.addf %180, %183 : vector<8x32xf32>
    %185 = vector.extract_strided_slice %178 {offsets = [0, 160], sizes = [8, 32], strides = [1, 1]} : vector<8x256xf32> to vector<8x32xf32>
    %186 = arith.mulf %185, %154 : vector<8x32xf32>
    %187 = vector.extract_strided_slice %178 {offsets = [0, 128], sizes = [8, 32], strides = [1, 1]} : vector<8x256xf32> to vector<8x32xf32>
    %188 = vector.extract_strided_slice %178 {offsets = [0, 192], sizes = [8, 32], strides = [1, 1]} : vector<8x256xf32> to vector<8x32xf32>
    %189 = arith.mulf %187, %188 : vector<8x32xf32>
    %190 = arith.addf %186, %189 : vector<8x32xf32>
    %191 = vector.extract_strided_slice %178 {offsets = [0, 96], sizes = [8, 32], strides = [1, 1]} : vector<8x256xf32> to vector<8x32xf32>
    %192 = math.tanh %184 : vector<8x32xf32>
    %193 = arith.mulf %191, %192 : vector<8x32xf32>
    %194 = vector.extract_strided_slice %178 {offsets = [0, 224], sizes = [8, 32], strides = [1, 1]} : vector<8x256xf32> to vector<8x32xf32>
    %195 = math.tanh %190 : vector<8x32xf32>
    %196 = arith.mulf %194, %195 : vector<8x32xf32>
    %197 = tpu.concatenate %193, %196 in 1 : vector<8x32xf32>, vector<8x32xf32> -> vector<8x64xf32>
    %198 = arith.truncf %197 : vector<8x64xf32> to vector<8x64xbf16>
    %199 = vector.extract_strided_slice %198 {offsets = [0, 0], sizes = [8, 32], strides = [1, 1]} : vector<8x64xbf16> to vector<8x32xbf16>
    %c32_50 = arith.constant 32 : index
    %c0_51 = arith.constant 0 : index
    %200 = vector.load %arg12[%c32_50, %c0_51] : memref<64x32xbf16, #tpu.memory_space<vmem>>, vector<8x32xbf16>
    tpu.vector_store %arg12[%c32_50, %c0_51], %199 {strides = array<i32>} : memref<64x32xbf16, #tpu.memory_space<vmem>>, vector<8x32xbf16>,
    %201 = vector.extract_strided_slice %198 {offsets = [0, 32], sizes = [8, 32], strides = [1, 1]} : vector<8x64xbf16> to vector<8x32xbf16>
    %c24_52 = arith.constant 24 : index
    %c0_53 = arith.constant 0 : index
    %202 = vector.load %arg13[%c24_52, %c0_53] : memref<64x32xbf16, #tpu.memory_space<vmem>>, vector<8x32xbf16>
    tpu.vector_store %arg13[%c24_52, %c0_53], %201 {strides = array<i32>} : memref<64x32xbf16, #tpu.memory_space<vmem>>, vector<8x32xbf16>,
    %c40_54 = arith.constant 40 : index
    %c0_55 = arith.constant 0 : index
    %203 = vector.load %arg11[%c40_54, %c0_55] : memref<64x256xf32, #tpu.memory_space<vmem>>, vector<8x128xf32>
    %c16_56 = arith.constant 16 : index
    %c128_57 = arith.constant 128 : index
    %204 = vector.load %arg11[%c16_56, %c128_57] : memref<64x256xf32, #tpu.memory_space<vmem>>, vector<8x128xf32>
    %205 = tpu.concatenate %203, %204 in 1 : vector<8x128xf32>, vector<8x128xf32> -> vector<8x256xf32>
    %cst_58 = arith.constant dense<0.000000e+00> : vector<8x256xf32>
    %206 = tpu.matmul %198, %19, %cst_58 {dimension_numbers = #tpu.dot_dimension_numbers<[1], [0], [0], [1], [0, 0, 1, 1], [], []>} : vector<8x64xbf16>, vector<64x256xbf16>, vector<8x256xf32> -> vector<8x256xf32>
    %207 = arith.addf %205, %206 : vector<8x256xf32>
    %208 = math.tanh %207 : vector<8x256xf32>
    %209 = arith.negf %207 : vector<8x256xf32>
    %210 = math.exp %209 : vector<8x256xf32>
    %cst_59 = arith.constant 1.000000e+00 : f32
    %211 = vector.broadcast %cst_59 : f32 to vector<8x256xf32>
    %212 = arith.addf %211, %210 : vector<8x256xf32>
    %213 = arith.divf %211, %212 : vector<8x256xf32>
    %214 = arith.select %11, %208, %213 : vector<8x256xi1>, vector<8x256xf32>
    %215 = vector.extract_strided_slice %214 {offsets = [0, 32], sizes = [8, 32], strides = [1, 1]} : vector<8x256xf32> to vector<8x32xf32>
    %216 = arith.mulf %215, %184 : vector<8x32xf32>
    %217 = vector.extract_strided_slice %214 {offsets = [0, 0], sizes = [8, 32], strides = [1, 1]} : vector<8x256xf32> to vector<8x32xf32>
    %218 = vector.extract_strided_slice %214 {offsets = [0, 64], sizes = [8, 32], strides = [1, 1]} : vector<8x256xf32> to vector<8x32xf32>
    %219 = arith.mulf %217, %218 : vector<8x32xf32>
    %220 = arith.addf %216, %219 : vector<8x32xf32>
    %221 = vector.extract_strided_slice %214 {offsets = [0, 160], sizes = [8, 32], strides = [1, 1]} : vector<8x256xf32> to vector<8x32xf32>
    %222 = arith.mulf %221, %190 : vector<8x32xf32>
    %223 = vector.extract_strided_slice %214 {offsets = [0, 128], sizes = [8, 32], strides = [1, 1]} : vector<8x256xf32> to vector<8x32xf32>
    %224 = vector.extract_strided_slice %214 {offsets = [0, 192], sizes = [8, 32], strides = [1, 1]} : vector<8x256xf32> to vector<8x32xf32>
    %225 = arith.mulf %223, %224 : vector<8x32xf32>
    %226 = arith.addf %222, %225 : vector<8x32xf32>
    %227 = vector.extract_strided_slice %214 {offsets = [0, 96], sizes = [8, 32], strides = [1, 1]} : vector<8x256xf32> to vector<8x32xf32>
    %228 = math.tanh %220 : vector<8x32xf32>
    %229 = arith.mulf %227, %228 : vector<8x32xf32>
    %230 = vector.extract_strided_slice %214 {offsets = [0, 224], sizes = [8, 32], strides = [1, 1]} : vector<8x256xf32> to vector<8x32xf32>
    %231 = math.tanh %226 : vector<8x32xf32>
    %232 = arith.mulf %230, %231 : vector<8x32xf32>
    %233 = tpu.concatenate %229, %232 in 1 : vector<8x32xf32>, vector<8x32xf32> -> vector<8x64xf32>
    %234 = arith.truncf %233 : vector<8x64xf32> to vector<8x64xbf16>
    %235 = vector.extract_strided_slice %234 {offsets = [0, 0], sizes = [8, 32], strides = [1, 1]} : vector<8x64xbf16> to vector<8x32xbf16>
    %c40_60 = arith.constant 40 : index
    %c0_61 = arith.constant 0 : index
    %236 = vector.load %arg12[%c40_60, %c0_61] : memref<64x32xbf16, #tpu.memory_space<vmem>>, vector<8x32xbf16>
    tpu.vector_store %arg12[%c40_60, %c0_61], %235 {strides = array<i32>} : memref<64x32xbf16, #tpu.memory_space<vmem>>, vector<8x32xbf16>,
    %237 = vector.extract_strided_slice %234 {offsets = [0, 32], sizes = [8, 32], strides = [1, 1]} : vector<8x64xbf16> to vector<8x32xbf16>
    %c16_62 = arith.constant 16 : index
    %c0_63 = arith.constant 0 : index
    %238 = vector.load %arg13[%c16_62, %c0_63] : memref<64x32xbf16, #tpu.memory_space<vmem>>, vector<8x32xbf16>
    tpu.vector_store %arg13[%c16_62, %c0_63], %237 {strides = array<i32>} : memref<64x32xbf16, #tpu.memory_space<vmem>>, vector<8x32xbf16>,
    %c48_64 = arith.constant 48 : index
    %c0_65 = arith.constant 0 : index
    %239 = vector.load %arg11[%c48_64, %c0_65] : memref<64x256xf32, #tpu.memory_space<vmem>>, vector<8x128xf32>
    %c8_66 = arith.constant 8 : index
    %c128_67 = arith.constant 128 : index
    %240 = vector.load %arg11[%c8_66, %c128_67] : memref<64x256xf32, #tpu.memory_space<vmem>>, vector<8x128xf32>
    %241 = tpu.concatenate %239, %240 in 1 : vector<8x128xf32>, vector<8x128xf32> -> vector<8x256xf32>
    %cst_68 = arith.constant dense<0.000000e+00> : vector<8x256xf32>
    %242 = tpu.matmul %234, %19, %cst_68 {dimension_numbers = #tpu.dot_dimension_numbers<[1], [0], [0], [1], [0, 0, 1, 1], [], []>} : vector<8x64xbf16>, vector<64x256xbf16>, vector<8x256xf32> -> vector<8x256xf32>
    %243 = arith.addf %241, %242 : vector<8x256xf32>
    %244 = math.tanh %243 : vector<8x256xf32>
    %245 = arith.negf %243 : vector<8x256xf32>
    %246 = math.exp %245 : vector<8x256xf32>
    %cst_69 = arith.constant 1.000000e+00 : f32
    %247 = vector.broadcast %cst_69 : f32 to vector<8x256xf32>
    %248 = arith.addf %247, %246 : vector<8x256xf32>
    %249 = arith.divf %247, %248 : vector<8x256xf32>
    %250 = arith.select %11, %244, %249 : vector<8x256xi1>, vector<8x256xf32>
    %251 = vector.extract_strided_slice %250 {offsets = [0, 32], sizes = [8, 32], strides = [1, 1]} : vector<8x256xf32> to vector<8x32xf32>
    %252 = arith.mulf %251, %220 : vector<8x32xf32>
    %253 = vector.extract_strided_slice %250 {offsets = [0, 0], sizes = [8, 32], strides = [1, 1]} : vector<8x256xf32> to vector<8x32xf32>
    %254 = vector.extract_strided_slice %250 {offsets = [0, 64], sizes = [8, 32], strides = [1, 1]} : vector<8x256xf32> to vector<8x32xf32>
    %255 = arith.mulf %253, %254 : vector<8x32xf32>
    %256 = arith.addf %252, %255 : vector<8x32xf32>
    %257 = vector.extract_strided_slice %250 {offsets = [0, 160], sizes = [8, 32], strides = [1, 1]} : vector<8x256xf32> to vector<8x32xf32>
    %258 = arith.mulf %257, %226 : vector<8x32xf32>
    %259 = vector.extract_strided_slice %250 {offsets = [0, 128], sizes = [8, 32], strides = [1, 1]} : vector<8x256xf32> to vector<8x32xf32>
    %260 = vector.extract_strided_slice %250 {offsets = [0, 192], sizes = [8, 32], strides = [1, 1]} : vector<8x256xf32> to vector<8x32xf32>
    %261 = arith.mulf %259, %260 : vector<8x32xf32>
    %262 = arith.addf %258, %261 : vector<8x32xf32>
    %263 = vector.extract_strided_slice %250 {offsets = [0, 96], sizes = [8, 32], strides = [1, 1]} : vector<8x256xf32> to vector<8x32xf32>
    %264 = math.tanh %256 : vector<8x32xf32>
    %265 = arith.mulf %263, %264 : vector<8x32xf32>
    %266 = vector.extract_strided_slice %250 {offsets = [0, 224], sizes = [8, 32], strides = [1, 1]} : vector<8x256xf32> to vector<8x32xf32>
    %267 = math.tanh %262 : vector<8x32xf32>
    %268 = arith.mulf %266, %267 : vector<8x32xf32>
    %269 = tpu.concatenate %265, %268 in 1 : vector<8x32xf32>, vector<8x32xf32> -> vector<8x64xf32>
    %270 = arith.truncf %269 : vector<8x64xf32> to vector<8x64xbf16>
    %271 = vector.extract_strided_slice %270 {offsets = [0, 0], sizes = [8, 32], strides = [1, 1]} : vector<8x64xbf16> to vector<8x32xbf16>
    %c48_70 = arith.constant 48 : index
    %c0_71 = arith.constant 0 : index
    %272 = vector.load %arg12[%c48_70, %c0_71] : memref<64x32xbf16, #tpu.memory_space<vmem>>, vector<8x32xbf16>
    tpu.vector_store %arg12[%c48_70, %c0_71], %271 {strides = array<i32>} : memref<64x32xbf16, #tpu.memory_space<vmem>>, vector<8x32xbf16>,
    %273 = vector.extract_strided_slice %270 {offsets = [0, 32], sizes = [8, 32], strides = [1, 1]} : vector<8x64xbf16> to vector<8x32xbf16>
    %c8_72 = arith.constant 8 : index
    %c0_73 = arith.constant 0 : index
    %274 = vector.load %arg13[%c8_72, %c0_73] : memref<64x32xbf16, #tpu.memory_space<vmem>>, vector<8x32xbf16>
    tpu.vector_store %arg13[%c8_72, %c0_73], %273 {strides = array<i32>} : memref<64x32xbf16, #tpu.memory_space<vmem>>, vector<8x32xbf16>,
    %c56_74 = arith.constant 56 : index
    %c0_75 = arith.constant 0 : index
    %275 = vector.load %arg11[%c56_74, %c0_75] : memref<64x256xf32, #tpu.memory_space<vmem>>, vector<8x128xf32>
    %c0_76 = arith.constant 0 : index
    %c128_77 = arith.constant 128 : index
    %276 = vector.load %arg11[%c0_76, %c128_77] : memref<64x256xf32, #tpu.memory_space<vmem>>, vector<8x128xf32>
    %277 = tpu.concatenate %275, %276 in 1 : vector<8x128xf32>, vector<8x128xf32> -> vector<8x256xf32>
    %cst_78 = arith.constant dense<0.000000e+00> : vector<8x256xf32>
    %278 = tpu.matmul %270, %19, %cst_78 {dimension_numbers = #tpu.dot_dimension_numbers<[1], [0], [0], [1], [0, 0, 1, 1], [], []>} : vector<8x64xbf16>, vector<64x256xbf16>, vector<8x256xf32> -> vector<8x256xf32>
    %279 = arith.addf %277, %278 : vector<8x256xf32>
    %280 = math.tanh %279 : vector<8x256xf32>
    %281 = arith.negf %279 : vector<8x256xf32>
    %282 = math.exp %281 : vector<8x256xf32>
    %cst_79 = arith.constant 1.000000e+00 : f32
    %283 = vector.broadcast %cst_79 : f32 to vector<8x256xf32>
    %284 = arith.addf %283, %282 : vector<8x256xf32>
    %285 = arith.divf %283, %284 : vector<8x256xf32>
    %286 = arith.select %11, %280, %285 : vector<8x256xi1>, vector<8x256xf32>
    %287 = vector.extract_strided_slice %286 {offsets = [0, 32], sizes = [8, 32], strides = [1, 1]} : vector<8x256xf32> to vector<8x32xf32>
    %288 = arith.mulf %287, %256 : vector<8x32xf32>
    %289 = vector.extract_strided_slice %286 {offsets = [0, 0], sizes = [8, 32], strides = [1, 1]} : vector<8x256xf32> to vector<8x32xf32>
    %290 = vector.extract_strided_slice %286 {offsets = [0, 64], sizes = [8, 32], strides = [1, 1]} : vector<8x256xf32> to vector<8x32xf32>
    %291 = arith.mulf %289, %290 : vector<8x32xf32>
    %292 = arith.addf %288, %291 : vector<8x32xf32>
    %293 = vector.extract_strided_slice %286 {offsets = [0, 160], sizes = [8, 32], strides = [1, 1]} : vector<8x256xf32> to vector<8x32xf32>
    %294 = arith.mulf %293, %262 : vector<8x32xf32>
    %295 = vector.extract_strided_slice %286 {offsets = [0, 128], sizes = [8, 32], strides = [1, 1]} : vector<8x256xf32> to vector<8x32xf32>
    %296 = vector.extract_strided_slice %286 {offsets = [0, 192], sizes = [8, 32], strides = [1, 1]} : vector<8x256xf32> to vector<8x32xf32>
    %297 = arith.mulf %295, %296 : vector<8x32xf32>
    %298 = arith.addf %294, %297 : vector<8x32xf32>
    %299 = vector.extract_strided_slice %286 {offsets = [0, 96], sizes = [8, 32], strides = [1, 1]} : vector<8x256xf32> to vector<8x32xf32>
    %300 = math.tanh %292 : vector<8x32xf32>
    %301 = arith.mulf %299, %300 : vector<8x32xf32>
    %302 = vector.extract_strided_slice %286 {offsets = [0, 224], sizes = [8, 32], strides = [1, 1]} : vector<8x256xf32> to vector<8x32xf32>
    %303 = math.tanh %298 : vector<8x32xf32>
    %304 = arith.mulf %302, %303 : vector<8x32xf32>
    %305 = tpu.concatenate %301, %304 in 1 : vector<8x32xf32>, vector<8x32xf32> -> vector<8x64xf32>
    %306 = arith.truncf %305 : vector<8x64xf32> to vector<8x64xbf16>
    %307 = vector.extract_strided_slice %306 {offsets = [0, 0], sizes = [8, 32], strides = [1, 1]} : vector<8x64xbf16> to vector<8x32xbf16>
    %c56_80 = arith.constant 56 : index
    %c0_81 = arith.constant 0 : index
    %308 = vector.load %arg12[%c56_80, %c0_81] : memref<64x32xbf16, #tpu.memory_space<vmem>>, vector<8x32xbf16>
    tpu.vector_store %arg12[%c56_80, %c0_81], %307 {strides = array<i32>} : memref<64x32xbf16, #tpu.memory_space<vmem>>, vector<8x32xbf16>,
    %309 = vector.extract_strided_slice %306 {offsets = [0, 32], sizes = [8, 32], strides = [1, 1]} : vector<8x64xbf16> to vector<8x32xbf16>
    %c0_82 = arith.constant 0 : index
    %c0_83 = arith.constant 0 : index
    %310 = vector.load %arg13[%c0_82, %c0_83] : memref<64x32xbf16, #tpu.memory_space<vmem>>, vector<8x32xbf16>
    tpu.vector_store %arg13[%c0_82, %c0_83], %309 {strides = array<i32>} : memref<64x32xbf16, #tpu.memory_space<vmem>>, vector<8x32xbf16>,
    %c0_84 = arith.constant 0 : index
    %c0_85 = arith.constant 0 : index
    %311 = vector.load %arg12[%c0_84, %c0_85] : memref<64x32xbf16, #tpu.memory_space<vmem>>, vector<64x32xbf16>
    %c0_86 = arith.constant 0 : index
    %c0_87 = arith.constant 0 : index
    %312 = vector.load %arg4[%c0_86, %c0_87] : memref<32x256xbf16, #tpu.memory_space<vmem>>, vector<32x256xbf16>
    %cst_88 = arith.constant dense<0.000000e+00> : vector<64x256xf32>
    %313 = tpu.matmul %311, %312, %cst_88 {dimension_numbers = #tpu.dot_dimension_numbers<[1], [0], [0], [1], [0, 0, 1, 1], [], []>} : vector<64x32xbf16>, vector<32x256xbf16>, vector<64x256xf32> -> vector<64x256xf32>
    %c0_89 = arith.constant 0 : index
    %c0_90 = arith.constant 0 : index
    %314 = vector.load %arg13[%c0_89, %c0_90] : memref<64x32xbf16, #tpu.memory_space<vmem>>, vector<64x32xbf16>
    %c0_91 = arith.constant 0 : index
    %c0_92 = arith.constant 0 : index
    %315 = vector.load %arg5[%c0_91, %c0_92] : memref<32x256xbf16, #tpu.memory_space<vmem>>, vector<32x256xbf16>
    %cst_93 = arith.constant dense<0.000000e+00> : vector<64x256xf32>
    %316 = tpu.matmul %314, %315, %cst_93 {dimension_numbers = #tpu.dot_dimension_numbers<[1], [0], [0], [1], [0, 0, 1, 1], [], []>} : vector<64x32xbf16>, vector<32x256xbf16>, vector<64x256xf32> -> vector<64x256xf32>
    %317 = arith.addf %313, %316 : vector<64x256xf32>
    %c0_94 = arith.constant 0 : index
    %c0_95 = arith.constant 0 : index
    %318 = vector.load %arg6[%c0_94, %c0_95] : memref<1x256xf32, #tpu.memory_space<vmem>>, vector<1x256xf32>
    %319 = vector.broadcast %318 : vector<1x256xf32> to vector<64x256xf32>
    %320 = arith.addf %317, %319 : vector<64x256xf32>
    %c0_96 = arith.constant 0 : index
    %c0_97 = arith.constant 0 : index
    %321 = vector.load %arg11[%c0_96, %c0_97] : memref<64x256xf32, #tpu.memory_space<vmem>>, vector<64x256xf32>
    tpu.vector_store %arg11[%c0_96, %c0_97], %320 {strides = array<i32>} : memref<64x256xf32, #tpu.memory_space<vmem>>, vector<64x256xf32>,
    %c0_98 = arith.constant 0 : index
    %c0_99 = arith.constant 0 : index
    %322 = vector.load %arg7[%c0_98, %c0_99] : memref<64x256xbf16, #tpu.memory_space<vmem>>, vector<64x256xbf16>
    %cst_100 = arith.constant 0.000000e+00 : bf16
    %323 = vector.broadcast %cst_100 : bf16 to vector<8x64xbf16>
    %cst_101 = arith.constant 0.000000e+00 : f32
    %324 = vector.broadcast %cst_101 : f32 to vector<8x32xf32>
    %cst_102 = arith.constant 0.000000e+00 : f32
    %325 = vector.broadcast %cst_102 : f32 to vector<8x32xf32>
    %c0_103 = arith.constant 0 : index
    %c0_104 = arith.constant 0 : index
    %326 = vector.load %arg11[%c0_103, %c0_104] : memref<64x256xf32, #tpu.memory_space<vmem>>, vector<8x128xf32>
    %c56_105 = arith.constant 56 : index
    %c128_106 = arith.constant 128 : index
    %327 = vector.load %arg11[%c56_105, %c128_106] : memref<64x256xf32, #tpu.memory_space<vmem>>, vector<8x128xf32>
    %328 = tpu.concatenate %326, %327 in 1 : vector<8x128xf32>, vector<8x128xf32> -> vector<8x256xf32>
    %cst_107 = arith.constant dense<0.000000e+00> : vector<8x256xf32>
    %329 = tpu.matmul %323, %322, %cst_107 {dimension_numbers = #tpu.dot_dimension_numbers<[1], [0], [0], [1], [0, 0, 1, 1], [], []>} : vector<8x64xbf16>, vector<64x256xbf16>, vector<8x256xf32> -> vector<8x256xf32>
    %330 = arith.addf %328, %329 : vector<8x256xf32>
    %331 = math.tanh %330 : vector<8x256xf32>
    %332 = arith.negf %330 : vector<8x256xf32>
    %333 = math.exp %332 : vector<8x256xf32>
    %cst_108 = arith.constant 1.000000e+00 : f32
    %334 = vector.broadcast %cst_108 : f32 to vector<8x256xf32>
    %335 = arith.addf %334, %333 : vector<8x256xf32>
    %336 = arith.divf %334, %335 : vector<8x256xf32>
    %337 = arith.select %11, %331, %336 : vector<8x256xi1>, vector<8x256xf32>
    %338 = vector.extract_strided_slice %337 {offsets = [0, 32], sizes = [8, 32], strides = [1, 1]} : vector<8x256xf32> to vector<8x32xf32>
    %339 = arith.mulf %338, %324 : vector<8x32xf32>
    %340 = vector.extract_strided_slice %337 {offsets = [0, 0], sizes = [8, 32], strides = [1, 1]} : vector<8x256xf32> to vector<8x32xf32>
    %341 = vector.extract_strided_slice %337 {offsets = [0, 64], sizes = [8, 32], strides = [1, 1]} : vector<8x256xf32> to vector<8x32xf32>
    %342 = arith.mulf %340, %341 : vector<8x32xf32>
    %343 = arith.addf %339, %342 : vector<8x32xf32>
    %344 = vector.extract_strided_slice %337 {offsets = [0, 160], sizes = [8, 32], strides = [1, 1]} : vector<8x256xf32> to vector<8x32xf32>
    %345 = arith.mulf %344, %325 : vector<8x32xf32>
    %346 = vector.extract_strided_slice %337 {offsets = [0, 128], sizes = [8, 32], strides = [1, 1]} : vector<8x256xf32> to vector<8x32xf32>
    %347 = vector.extract_strided_slice %337 {offsets = [0, 192], sizes = [8, 32], strides = [1, 1]} : vector<8x256xf32> to vector<8x32xf32>
    %348 = arith.mulf %346, %347 : vector<8x32xf32>
    %349 = arith.addf %345, %348 : vector<8x32xf32>
    %350 = vector.extract_strided_slice %337 {offsets = [0, 96], sizes = [8, 32], strides = [1, 1]} : vector<8x256xf32> to vector<8x32xf32>
    %351 = math.tanh %343 : vector<8x32xf32>
    %352 = arith.mulf %350, %351 : vector<8x32xf32>
    %353 = vector.extract_strided_slice %337 {offsets = [0, 224], sizes = [8, 32], strides = [1, 1]} : vector<8x256xf32> to vector<8x32xf32>
    %354 = math.tanh %349 : vector<8x32xf32>
    %355 = arith.mulf %353, %354 : vector<8x32xf32>
    %356 = tpu.concatenate %352, %355 in 1 : vector<8x32xf32>, vector<8x32xf32> -> vector<8x64xf32>
    %357 = arith.truncf %356 : vector<8x64xf32> to vector<8x64xbf16>
    %c8_109 = arith.constant 8 : index
    %c0_110 = arith.constant 0 : index
    %358 = vector.load %arg11[%c8_109, %c0_110] : memref<64x256xf32, #tpu.memory_space<vmem>>, vector<8x128xf32>
    %c48_111 = arith.constant 48 : index
    %c128_112 = arith.constant 128 : index
    %359 = vector.load %arg11[%c48_111, %c128_112] : memref<64x256xf32, #tpu.memory_space<vmem>>, vector<8x128xf32>
    %360 = tpu.concatenate %358, %359 in 1 : vector<8x128xf32>, vector<8x128xf32> -> vector<8x256xf32>
    %cst_113 = arith.constant dense<0.000000e+00> : vector<8x256xf32>
    %361 = tpu.matmul %357, %322, %cst_113 {dimension_numbers = #tpu.dot_dimension_numbers<[1], [0], [0], [1], [0, 0, 1, 1], [], []>} : vector<8x64xbf16>, vector<64x256xbf16>, vector<8x256xf32> -> vector<8x256xf32>
    %362 = arith.addf %360, %361 : vector<8x256xf32>
    %363 = math.tanh %362 : vector<8x256xf32>
    %364 = arith.negf %362 : vector<8x256xf32>
    %365 = math.exp %364 : vector<8x256xf32>
    %cst_114 = arith.constant 1.000000e+00 : f32
    %366 = vector.broadcast %cst_114 : f32 to vector<8x256xf32>
    %367 = arith.addf %366, %365 : vector<8x256xf32>
    %368 = arith.divf %366, %367 : vector<8x256xf32>
    %369 = arith.select %11, %363, %368 : vector<8x256xi1>, vector<8x256xf32>
    %370 = vector.extract_strided_slice %369 {offsets = [0, 32], sizes = [8, 32], strides = [1, 1]} : vector<8x256xf32> to vector<8x32xf32>
    %371 = arith.mulf %370, %343 : vector<8x32xf32>
    %372 = vector.extract_strided_slice %369 {offsets = [0, 0], sizes = [8, 32], strides = [1, 1]} : vector<8x256xf32> to vector<8x32xf32>
    %373 = vector.extract_strided_slice %369 {offsets = [0, 64], sizes = [8, 32], strides = [1, 1]} : vector<8x256xf32> to vector<8x32xf32>
    %374 = arith.mulf %372, %373 : vector<8x32xf32>
    %375 = arith.addf %371, %374 : vector<8x32xf32>
    %376 = vector.extract_strided_slice %369 {offsets = [0, 160], sizes = [8, 32], strides = [1, 1]} : vector<8x256xf32> to vector<8x32xf32>
    %377 = arith.mulf %376, %349 : vector<8x32xf32>
    %378 = vector.extract_strided_slice %369 {offsets = [0, 128], sizes = [8, 32], strides = [1, 1]} : vector<8x256xf32> to vector<8x32xf32>
    %379 = vector.extract_strided_slice %369 {offsets = [0, 192], sizes = [8, 32], strides = [1, 1]} : vector<8x256xf32> to vector<8x32xf32>
    %380 = arith.mulf %378, %379 : vector<8x32xf32>
    %381 = arith.addf %377, %380 : vector<8x32xf32>
    %382 = vector.extract_strided_slice %369 {offsets = [0, 96], sizes = [8, 32], strides = [1, 1]} : vector<8x256xf32> to vector<8x32xf32>
    %383 = math.tanh %375 : vector<8x32xf32>
    %384 = arith.mulf %382, %383 : vector<8x32xf32>
    %385 = vector.extract_strided_slice %369 {offsets = [0, 224], sizes = [8, 32], strides = [1, 1]} : vector<8x256xf32> to vector<8x32xf32>
    %386 = math.tanh %381 : vector<8x32xf32>
    %387 = arith.mulf %385, %386 : vector<8x32xf32>
    %388 = tpu.concatenate %384, %387 in 1 : vector<8x32xf32>, vector<8x32xf32> -> vector<8x64xf32>
    %389 = arith.truncf %388 : vector<8x64xf32> to vector<8x64xbf16>
    %c16_115 = arith.constant 16 : index
    %c0_116 = arith.constant 0 : index
    %390 = vector.load %arg11[%c16_115, %c0_116] : memref<64x256xf32, #tpu.memory_space<vmem>>, vector<8x128xf32>
    %c40_117 = arith.constant 40 : index
    %c128_118 = arith.constant 128 : index
    %391 = vector.load %arg11[%c40_117, %c128_118] : memref<64x256xf32, #tpu.memory_space<vmem>>, vector<8x128xf32>
    %392 = tpu.concatenate %390, %391 in 1 : vector<8x128xf32>, vector<8x128xf32> -> vector<8x256xf32>
    %cst_119 = arith.constant dense<0.000000e+00> : vector<8x256xf32>
    %393 = tpu.matmul %389, %322, %cst_119 {dimension_numbers = #tpu.dot_dimension_numbers<[1], [0], [0], [1], [0, 0, 1, 1], [], []>} : vector<8x64xbf16>, vector<64x256xbf16>, vector<8x256xf32> -> vector<8x256xf32>
    %394 = arith.addf %392, %393 : vector<8x256xf32>
    %395 = math.tanh %394 : vector<8x256xf32>
    %396 = arith.negf %394 : vector<8x256xf32>
    %397 = math.exp %396 : vector<8x256xf32>
    %cst_120 = arith.constant 1.000000e+00 : f32
    %398 = vector.broadcast %cst_120 : f32 to vector<8x256xf32>
    %399 = arith.addf %398, %397 : vector<8x256xf32>
    %400 = arith.divf %398, %399 : vector<8x256xf32>
    %401 = arith.select %11, %395, %400 : vector<8x256xi1>, vector<8x256xf32>
    %402 = vector.extract_strided_slice %401 {offsets = [0, 32], sizes = [8, 32], strides = [1, 1]} : vector<8x256xf32> to vector<8x32xf32>
    %403 = arith.mulf %402, %375 : vector<8x32xf32>
    %404 = vector.extract_strided_slice %401 {offsets = [0, 0], sizes = [8, 32], strides = [1, 1]} : vector<8x256xf32> to vector<8x32xf32>
    %405 = vector.extract_strided_slice %401 {offsets = [0, 64], sizes = [8, 32], strides = [1, 1]} : vector<8x256xf32> to vector<8x32xf32>
    %406 = arith.mulf %404, %405 : vector<8x32xf32>
    %407 = arith.addf %403, %406 : vector<8x32xf32>
    %408 = vector.extract_strided_slice %401 {offsets = [0, 160], sizes = [8, 32], strides = [1, 1]} : vector<8x256xf32> to vector<8x32xf32>
    %409 = arith.mulf %408, %381 : vector<8x32xf32>
    %410 = vector.extract_strided_slice %401 {offsets = [0, 128], sizes = [8, 32], strides = [1, 1]} : vector<8x256xf32> to vector<8x32xf32>
    %411 = vector.extract_strided_slice %401 {offsets = [0, 192], sizes = [8, 32], strides = [1, 1]} : vector<8x256xf32> to vector<8x32xf32>
    %412 = arith.mulf %410, %411 : vector<8x32xf32>
    %413 = arith.addf %409, %412 : vector<8x32xf32>
    %414 = vector.extract_strided_slice %401 {offsets = [0, 96], sizes = [8, 32], strides = [1, 1]} : vector<8x256xf32> to vector<8x32xf32>
    %415 = math.tanh %407 : vector<8x32xf32>
    %416 = arith.mulf %414, %415 : vector<8x32xf32>
    %417 = vector.extract_strided_slice %401 {offsets = [0, 224], sizes = [8, 32], strides = [1, 1]} : vector<8x256xf32> to vector<8x32xf32>
    %418 = math.tanh %413 : vector<8x32xf32>
    %419 = arith.mulf %417, %418 : vector<8x32xf32>
    %420 = tpu.concatenate %416, %419 in 1 : vector<8x32xf32>, vector<8x32xf32> -> vector<8x64xf32>
    %421 = arith.truncf %420 : vector<8x64xf32> to vector<8x64xbf16>
    %c24_121 = arith.constant 24 : index
    %c0_122 = arith.constant 0 : index
    %422 = vector.load %arg11[%c24_121, %c0_122] : memref<64x256xf32, #tpu.memory_space<vmem>>, vector<8x128xf32>
    %c32_123 = arith.constant 32 : index
    %c128_124 = arith.constant 128 : index
    %423 = vector.load %arg11[%c32_123, %c128_124] : memref<64x256xf32, #tpu.memory_space<vmem>>, vector<8x128xf32>
    %424 = tpu.concatenate %422, %423 in 1 : vector<8x128xf32>, vector<8x128xf32> -> vector<8x256xf32>
    %cst_125 = arith.constant dense<0.000000e+00> : vector<8x256xf32>
    %425 = tpu.matmul %421, %322, %cst_125 {dimension_numbers = #tpu.dot_dimension_numbers<[1], [0], [0], [1], [0, 0, 1, 1], [], []>} : vector<8x64xbf16>, vector<64x256xbf16>, vector<8x256xf32> -> vector<8x256xf32>
    %426 = arith.addf %424, %425 : vector<8x256xf32>
    %427 = math.tanh %426 : vector<8x256xf32>
    %428 = arith.negf %426 : vector<8x256xf32>
    %429 = math.exp %428 : vector<8x256xf32>
    %cst_126 = arith.constant 1.000000e+00 : f32
    %430 = vector.broadcast %cst_126 : f32 to vector<8x256xf32>
    %431 = arith.addf %430, %429 : vector<8x256xf32>
    %432 = arith.divf %430, %431 : vector<8x256xf32>
    %433 = arith.select %11, %427, %432 : vector<8x256xi1>, vector<8x256xf32>
    %434 = vector.extract_strided_slice %433 {offsets = [0, 32], sizes = [8, 32], strides = [1, 1]} : vector<8x256xf32> to vector<8x32xf32>
    %435 = arith.mulf %434, %407 : vector<8x32xf32>
    %436 = vector.extract_strided_slice %433 {offsets = [0, 0], sizes = [8, 32], strides = [1, 1]} : vector<8x256xf32> to vector<8x32xf32>
    %437 = vector.extract_strided_slice %433 {offsets = [0, 64], sizes = [8, 32], strides = [1, 1]} : vector<8x256xf32> to vector<8x32xf32>
    %438 = arith.mulf %436, %437 : vector<8x32xf32>
    %439 = arith.addf %435, %438 : vector<8x32xf32>
    %440 = vector.extract_strided_slice %433 {offsets = [0, 160], sizes = [8, 32], strides = [1, 1]} : vector<8x256xf32> to vector<8x32xf32>
    %441 = arith.mulf %440, %413 : vector<8x32xf32>
    %442 = vector.extract_strided_slice %433 {offsets = [0, 128], sizes = [8, 32], strides = [1, 1]} : vector<8x256xf32> to vector<8x32xf32>
    %443 = vector.extract_strided_slice %433 {offsets = [0, 192], sizes = [8, 32], strides = [1, 1]} : vector<8x256xf32> to vector<8x32xf32>
    %444 = arith.mulf %442, %443 : vector<8x32xf32>
    %445 = arith.addf %441, %444 : vector<8x32xf32>
    %446 = vector.extract_strided_slice %433 {offsets = [0, 96], sizes = [8, 32], strides = [1, 1]} : vector<8x256xf32> to vector<8x32xf32>
    %447 = math.tanh %439 : vector<8x32xf32>
    %448 = arith.mulf %446, %447 : vector<8x32xf32>
    %449 = vector.extract_strided_slice %433 {offsets = [0, 224], sizes = [8, 32], strides = [1, 1]} : vector<8x256xf32> to vector<8x32xf32>
    %450 = math.tanh %445 : vector<8x32xf32>
    %451 = arith.mulf %449, %450 : vector<8x32xf32>
    %452 = tpu.concatenate %448, %451 in 1 : vector<8x32xf32>, vector<8x32xf32> -> vector<8x64xf32>
    %453 = arith.truncf %452 : vector<8x64xf32> to vector<8x64xbf16>
    %c32_127 = arith.constant 32 : index
    %c0_128 = arith.constant 0 : index
    %454 = vector.load %arg11[%c32_127, %c0_128] : memref<64x256xf32, #tpu.memory_space<vmem>>, vector<8x128xf32>
    %c24_129 = arith.constant 24 : index
    %c128_130 = arith.constant 128 : index
    %455 = vector.load %arg11[%c24_129, %c128_130] : memref<64x256xf32, #tpu.memory_space<vmem>>, vector<8x128xf32>
    %456 = tpu.concatenate %454, %455 in 1 : vector<8x128xf32>, vector<8x128xf32> -> vector<8x256xf32>
    %cst_131 = arith.constant dense<0.000000e+00> : vector<8x256xf32>
    %457 = tpu.matmul %453, %322, %cst_131 {dimension_numbers = #tpu.dot_dimension_numbers<[1], [0], [0], [1], [0, 0, 1, 1], [], []>} : vector<8x64xbf16>, vector<64x256xbf16>, vector<8x256xf32> -> vector<8x256xf32>
    %458 = arith.addf %456, %457 : vector<8x256xf32>
    %459 = math.tanh %458 : vector<8x256xf32>
    %460 = arith.negf %458 : vector<8x256xf32>
    %461 = math.exp %460 : vector<8x256xf32>
    %cst_132 = arith.constant 1.000000e+00 : f32
    %462 = vector.broadcast %cst_132 : f32 to vector<8x256xf32>
    %463 = arith.addf %462, %461 : vector<8x256xf32>
    %464 = arith.divf %462, %463 : vector<8x256xf32>
    %465 = arith.select %11, %459, %464 : vector<8x256xi1>, vector<8x256xf32>
    %466 = vector.extract_strided_slice %465 {offsets = [0, 32], sizes = [8, 32], strides = [1, 1]} : vector<8x256xf32> to vector<8x32xf32>
    %467 = arith.mulf %466, %439 : vector<8x32xf32>
    %468 = vector.extract_strided_slice %465 {offsets = [0, 0], sizes = [8, 32], strides = [1, 1]} : vector<8x256xf32> to vector<8x32xf32>
    %469 = vector.extract_strided_slice %465 {offsets = [0, 64], sizes = [8, 32], strides = [1, 1]} : vector<8x256xf32> to vector<8x32xf32>
    %470 = arith.mulf %468, %469 : vector<8x32xf32>
    %471 = arith.addf %467, %470 : vector<8x32xf32>
    %472 = vector.extract_strided_slice %465 {offsets = [0, 160], sizes = [8, 32], strides = [1, 1]} : vector<8x256xf32> to vector<8x32xf32>
    %473 = arith.mulf %472, %445 : vector<8x32xf32>
    %474 = vector.extract_strided_slice %465 {offsets = [0, 128], sizes = [8, 32], strides = [1, 1]} : vector<8x256xf32> to vector<8x32xf32>
    %475 = vector.extract_strided_slice %465 {offsets = [0, 192], sizes = [8, 32], strides = [1, 1]} : vector<8x256xf32> to vector<8x32xf32>
    %476 = arith.mulf %474, %475 : vector<8x32xf32>
    %477 = arith.addf %473, %476 : vector<8x32xf32>
    %478 = vector.extract_strided_slice %465 {offsets = [0, 96], sizes = [8, 32], strides = [1, 1]} : vector<8x256xf32> to vector<8x32xf32>
    %479 = math.tanh %471 : vector<8x32xf32>
    %480 = arith.mulf %478, %479 : vector<8x32xf32>
    %481 = vector.extract_strided_slice %465 {offsets = [0, 224], sizes = [8, 32], strides = [1, 1]} : vector<8x256xf32> to vector<8x32xf32>
    %482 = math.tanh %477 : vector<8x32xf32>
    %483 = arith.mulf %481, %482 : vector<8x32xf32>
    %484 = tpu.concatenate %480, %483 in 1 : vector<8x32xf32>, vector<8x32xf32> -> vector<8x64xf32>
    %485 = arith.truncf %484 : vector<8x64xf32> to vector<8x64xbf16>
    %c40_133 = arith.constant 40 : index
    %c0_134 = arith.constant 0 : index
    %486 = vector.load %arg11[%c40_133, %c0_134] : memref<64x256xf32, #tpu.memory_space<vmem>>, vector<8x128xf32>
    %c16_135 = arith.constant 16 : index
    %c128_136 = arith.constant 128 : index
    %487 = vector.load %arg11[%c16_135, %c128_136] : memref<64x256xf32, #tpu.memory_space<vmem>>, vector<8x128xf32>
    %488 = tpu.concatenate %486, %487 in 1 : vector<8x128xf32>, vector<8x128xf32> -> vector<8x256xf32>
    %cst_137 = arith.constant dense<0.000000e+00> : vector<8x256xf32>
    %489 = tpu.matmul %485, %322, %cst_137 {dimension_numbers = #tpu.dot_dimension_numbers<[1], [0], [0], [1], [0, 0, 1, 1], [], []>} : vector<8x64xbf16>, vector<64x256xbf16>, vector<8x256xf32> -> vector<8x256xf32>
    %490 = arith.addf %488, %489 : vector<8x256xf32>
    %491 = math.tanh %490 : vector<8x256xf32>
    %492 = arith.negf %490 : vector<8x256xf32>
    %493 = math.exp %492 : vector<8x256xf32>
    %cst_138 = arith.constant 1.000000e+00 : f32
    %494 = vector.broadcast %cst_138 : f32 to vector<8x256xf32>
    %495 = arith.addf %494, %493 : vector<8x256xf32>
    %496 = arith.divf %494, %495 : vector<8x256xf32>
    %497 = arith.select %11, %491, %496 : vector<8x256xi1>, vector<8x256xf32>
    %498 = vector.extract_strided_slice %497 {offsets = [0, 32], sizes = [8, 32], strides = [1, 1]} : vector<8x256xf32> to vector<8x32xf32>
    %499 = arith.mulf %498, %471 : vector<8x32xf32>
    %500 = vector.extract_strided_slice %497 {offsets = [0, 0], sizes = [8, 32], strides = [1, 1]} : vector<8x256xf32> to vector<8x32xf32>
    %501 = vector.extract_strided_slice %497 {offsets = [0, 64], sizes = [8, 32], strides = [1, 1]} : vector<8x256xf32> to vector<8x32xf32>
    %502 = arith.mulf %500, %501 : vector<8x32xf32>
    %503 = arith.addf %499, %502 : vector<8x32xf32>
    %504 = vector.extract_strided_slice %497 {offsets = [0, 160], sizes = [8, 32], strides = [1, 1]} : vector<8x256xf32> to vector<8x32xf32>
    %505 = arith.mulf %504, %477 : vector<8x32xf32>
    %506 = vector.extract_strided_slice %497 {offsets = [0, 128], sizes = [8, 32], strides = [1, 1]} : vector<8x256xf32> to vector<8x32xf32>
    %507 = vector.extract_strided_slice %497 {offsets = [0, 192], sizes = [8, 32], strides = [1, 1]} : vector<8x256xf32> to vector<8x32xf32>
    %508 = arith.mulf %506, %507 : vector<8x32xf32>
    %509 = arith.addf %505, %508 : vector<8x32xf32>
    %510 = vector.extract_strided_slice %497 {offsets = [0, 96], sizes = [8, 32], strides = [1, 1]} : vector<8x256xf32> to vector<8x32xf32>
    %511 = math.tanh %503 : vector<8x32xf32>
    %512 = arith.mulf %510, %511 : vector<8x32xf32>
    %513 = vector.extract_strided_slice %497 {offsets = [0, 224], sizes = [8, 32], strides = [1, 1]} : vector<8x256xf32> to vector<8x32xf32>
    %514 = math.tanh %509 : vector<8x32xf32>
    %515 = arith.mulf %513, %514 : vector<8x32xf32>
    %516 = tpu.concatenate %512, %515 in 1 : vector<8x32xf32>, vector<8x32xf32> -> vector<8x64xf32>
    %517 = arith.truncf %516 : vector<8x64xf32> to vector<8x64xbf16>
    %c48_139 = arith.constant 48 : index
    %c0_140 = arith.constant 0 : index
    %518 = vector.load %arg11[%c48_139, %c0_140] : memref<64x256xf32, #tpu.memory_space<vmem>>, vector<8x128xf32>
    %c8_141 = arith.constant 8 : index
    %c128_142 = arith.constant 128 : index
    %519 = vector.load %arg11[%c8_141, %c128_142] : memref<64x256xf32, #tpu.memory_space<vmem>>, vector<8x128xf32>
    %520 = tpu.concatenate %518, %519 in 1 : vector<8x128xf32>, vector<8x128xf32> -> vector<8x256xf32>
    %cst_143 = arith.constant dense<0.000000e+00> : vector<8x256xf32>
    %521 = tpu.matmul %517, %322, %cst_143 {dimension_numbers = #tpu.dot_dimension_numbers<[1], [0], [0], [1], [0, 0, 1, 1], [], []>} : vector<8x64xbf16>, vector<64x256xbf16>, vector<8x256xf32> -> vector<8x256xf32>
    %522 = arith.addf %520, %521 : vector<8x256xf32>
    %523 = math.tanh %522 : vector<8x256xf32>
    %524 = arith.negf %522 : vector<8x256xf32>
    %525 = math.exp %524 : vector<8x256xf32>
    %cst_144 = arith.constant 1.000000e+00 : f32
    %526 = vector.broadcast %cst_144 : f32 to vector<8x256xf32>
    %527 = arith.addf %526, %525 : vector<8x256xf32>
    %528 = arith.divf %526, %527 : vector<8x256xf32>
    %529 = arith.select %11, %523, %528 : vector<8x256xi1>, vector<8x256xf32>
    %530 = vector.extract_strided_slice %529 {offsets = [0, 32], sizes = [8, 32], strides = [1, 1]} : vector<8x256xf32> to vector<8x32xf32>
    %531 = arith.mulf %530, %503 : vector<8x32xf32>
    %532 = vector.extract_strided_slice %529 {offsets = [0, 0], sizes = [8, 32], strides = [1, 1]} : vector<8x256xf32> to vector<8x32xf32>
    %533 = vector.extract_strided_slice %529 {offsets = [0, 64], sizes = [8, 32], strides = [1, 1]} : vector<8x256xf32> to vector<8x32xf32>
    %534 = arith.mulf %532, %533 : vector<8x32xf32>
    %535 = arith.addf %531, %534 : vector<8x32xf32>
    %536 = vector.extract_strided_slice %529 {offsets = [0, 160], sizes = [8, 32], strides = [1, 1]} : vector<8x256xf32> to vector<8x32xf32>
    %537 = arith.mulf %536, %509 : vector<8x32xf32>
    %538 = vector.extract_strided_slice %529 {offsets = [0, 128], sizes = [8, 32], strides = [1, 1]} : vector<8x256xf32> to vector<8x32xf32>
    %539 = vector.extract_strided_slice %529 {offsets = [0, 192], sizes = [8, 32], strides = [1, 1]} : vector<8x256xf32> to vector<8x32xf32>
    %540 = arith.mulf %538, %539 : vector<8x32xf32>
    %541 = arith.addf %537, %540 : vector<8x32xf32>
    %542 = vector.extract_strided_slice %529 {offsets = [0, 96], sizes = [8, 32], strides = [1, 1]} : vector<8x256xf32> to vector<8x32xf32>
    %543 = math.tanh %535 : vector<8x32xf32>
    %544 = arith.mulf %542, %543 : vector<8x32xf32>
    %545 = vector.extract_strided_slice %529 {offsets = [0, 224], sizes = [8, 32], strides = [1, 1]} : vector<8x256xf32> to vector<8x32xf32>
    %546 = math.tanh %541 : vector<8x32xf32>
    %547 = arith.mulf %545, %546 : vector<8x32xf32>
    %548 = tpu.concatenate %544, %547 in 1 : vector<8x32xf32>, vector<8x32xf32> -> vector<8x64xf32>
    %549 = arith.truncf %548 : vector<8x64xf32> to vector<8x64xbf16>
    %c56_145 = arith.constant 56 : index
    %c0_146 = arith.constant 0 : index
    %550 = vector.load %arg11[%c56_145, %c0_146] : memref<64x256xf32, #tpu.memory_space<vmem>>, vector<8x128xf32>
    %c0_147 = arith.constant 0 : index
    %c128_148 = arith.constant 128 : index
    %551 = vector.load %arg11[%c0_147, %c128_148] : memref<64x256xf32, #tpu.memory_space<vmem>>, vector<8x128xf32>
    %552 = tpu.concatenate %550, %551 in 1 : vector<8x128xf32>, vector<8x128xf32> -> vector<8x256xf32>
    %cst_149 = arith.constant dense<0.000000e+00> : vector<8x256xf32>
    %553 = tpu.matmul %549, %322, %cst_149 {dimension_numbers = #tpu.dot_dimension_numbers<[1], [0], [0], [1], [0, 0, 1, 1], [], []>} : vector<8x64xbf16>, vector<64x256xbf16>, vector<8x256xf32> -> vector<8x256xf32>
    %554 = arith.addf %552, %553 : vector<8x256xf32>
    %555 = math.tanh %554 : vector<8x256xf32>
    %556 = arith.negf %554 : vector<8x256xf32>
    %557 = math.exp %556 : vector<8x256xf32>
    %cst_150 = arith.constant 1.000000e+00 : f32
    %558 = vector.broadcast %cst_150 : f32 to vector<8x256xf32>
    %559 = arith.addf %558, %557 : vector<8x256xf32>
    %560 = arith.divf %558, %559 : vector<8x256xf32>
    %561 = arith.select %11, %555, %560 : vector<8x256xi1>, vector<8x256xf32>
    %562 = vector.extract_strided_slice %561 {offsets = [0, 32], sizes = [8, 32], strides = [1, 1]} : vector<8x256xf32> to vector<8x32xf32>
    %563 = arith.mulf %562, %535 : vector<8x32xf32>
    %564 = vector.extract_strided_slice %561 {offsets = [0, 0], sizes = [8, 32], strides = [1, 1]} : vector<8x256xf32> to vector<8x32xf32>
    %565 = vector.extract_strided_slice %561 {offsets = [0, 64], sizes = [8, 32], strides = [1, 1]} : vector<8x256xf32> to vector<8x32xf32>
    %566 = arith.mulf %564, %565 : vector<8x32xf32>
    %567 = arith.addf %563, %566 : vector<8x32xf32>
    %568 = vector.extract_strided_slice %561 {offsets = [0, 160], sizes = [8, 32], strides = [1, 1]} : vector<8x256xf32> to vector<8x32xf32>
    %569 = arith.mulf %568, %541 : vector<8x32xf32>
    %570 = vector.extract_strided_slice %561 {offsets = [0, 128], sizes = [8, 32], strides = [1, 1]} : vector<8x256xf32> to vector<8x32xf32>
    %571 = vector.extract_strided_slice %561 {offsets = [0, 192], sizes = [8, 32], strides = [1, 1]} : vector<8x256xf32> to vector<8x32xf32>
    %572 = arith.mulf %570, %571 : vector<8x32xf32>
    %573 = arith.addf %569, %572 : vector<8x32xf32>
    %574 = vector.extract_strided_slice %561 {offsets = [0, 96], sizes = [8, 32], strides = [1, 1]} : vector<8x256xf32> to vector<8x32xf32>
    %575 = math.tanh %567 : vector<8x32xf32>
    %576 = arith.mulf %574, %575 : vector<8x32xf32>
    %577 = vector.extract_strided_slice %561 {offsets = [0, 224], sizes = [8, 32], strides = [1, 1]} : vector<8x256xf32> to vector<8x32xf32>
    %578 = math.tanh %573 : vector<8x32xf32>
    %579 = arith.mulf %577, %578 : vector<8x32xf32>
    %580 = tpu.concatenate %576, %579 in 1 : vector<8x32xf32>, vector<8x32xf32> -> vector<8x64xf32>
    %581 = arith.truncf %580 : vector<8x64xf32> to vector<8x64xbf16>
    %c0_151 = arith.constant 0 : index
    %c0_152 = arith.constant 0 : index
    %582 = vector.load %arg8[%c0_151, %c0_152] : memref<64x4xbf16, #tpu.memory_space<vmem>>, vector<64x4xbf16>
    %cst_153 = arith.constant dense<0.000000e+00> : vector<8x4xf32>
    %583 = tpu.matmul %581, %582, %cst_153 {dimension_numbers = #tpu.dot_dimension_numbers<[1], [0], [0], [1], [0, 0, 1, 1], [], []>} : vector<8x64xbf16>, vector<64x4xbf16>, vector<8x4xf32> -> vector<8x4xf32>
    %c0_154 = arith.constant 0 : index
    %c0_155 = arith.constant 0 : index
    %584 = vector.load %arg9[%c0_154, %c0_155] : memref<1x4xf32, #tpu.memory_space<vmem>>, vector<1x4xf32>
    %585 = vector.broadcast %584 : vector<1x4xf32> to vector<8x4xf32>
    %586 = arith.addf %583, %585 : vector<8x4xf32>
    %c0_156 = arith.constant 0 : index
    %c0_157 = arith.constant 0 : index
    %587 = vector.load %arg10[%c0_156, %c0_157] : memref<8x4xf32, #tpu.memory_space<vmem>>, vector<8x4xf32>
    tpu.vector_store %arg10[%c0_156, %c0_157], %586 {strides = array<i32>} : memref<8x4xf32, #tpu.memory_space<vmem>>, vector<8x4xf32>,
    return
  }
}

</mosaic_0001>

<bundles_post_ra>
// kernel: bilstm_classifier_forward.1
= control target key start
LH: loop header
LB: loop body
LE: loop exit
PB: predicated region body
PF: predicated region fallthrough
CT: control target
= control target key end

     0   :  { %15 = vsyncpa [#allocation6], 0  ;;  %s3749_s0 = inlined_call_operand.vmem [shape: bf16[64,16], index: 0, kind: input, shape index: {}]   ;;  %s3750_s1 = inlined_call_operand.vmem [shape: bf16[16,256], index: 1, kind: input, shape index: {}]   ;;  %s3751_s2 = inlined_call_operand.hbm [shape: f32[1,256], index: 2, kind: input, shape index: {}]   ;;  %s3752_s3 = inlined_call_operand.vmem [shape: bf16[64,256], index: 3, kind: input, shape index: {}]   ;;  %s3753_s4 = inlined_call_operand.vmem [shape: bf16[32,256], index: 4, kind: input, shape index: {}]   ;;  %s3754_s5 = inlined_call_operand.vmem [shape: bf16[32,256], index: 5, kind: input, shape index: {}]   ;;  %s3755_s6 = inlined_call_operand.hbm [shape: f32[1,256], index: 6, kind: input, shape index: {}]   ;;  %s3756_s7 = inlined_call_operand.vmem [shape: bf16[64,256], index: 7, kind: input, shape index: {}]   ;;  %s3757_s8 = inlined_call_operand.vmem [shape: bf16[64,4], index: 8, kind: input, shape index: {}]   ;;  %s3758_s9 = inlined_call_operand.vmem [shape: f32[1,4], index: 9, kind: input, shape index: {}]   ;;  %s3759_s10 = inlined_call_operand.vmem [shape: f32[8,4], index: 10, kind: output, shape index: {}]  }
   0x1   :  { %16 = vsyncpa [#allocation8], 0  ;;  %s2962_s13 = smov [#allocation5]   ;;  %s2963_s15 = smov [#allocation7]  }
   0x2   :  { %s27_s14 = sshll.u32 %s2962_s13, 4  ;;  %s43_s16 = sshll.u32 %s2963_s15, 4  ;;  %s28_s14 = int_to_ptr.vmem [resolvable:$true] %s27_s14  ;;  %s44_s16 = int_to_ptr.vmem [resolvable:$true] %s43_s16 }
   0x3   :  { %s2914_s19 = scalar_lea.hbm %s3751_s2, 32 }
   0x4   :  { %p2915_p0 = scmp.ne.s32.totalorder %s3751_s2, %s2914_s19  ;;  %p2918_p1 = scmp.lt.u32.totalorder %s2914_s19, %s3751_s2 }
   0x6   :  { %p2920_p2 = pnand %p2918_p1, %p2915_p0 }
   0x8   :  { %2923 = shalt.err (!%p2920_p2)
}
   0x9   :  { %s2924_s24 = scalar_lea.vmem %s28_s14, 32  ;;  %p2929_p4 = scmp.lt.s32.totalorder %s28_s14, %s28_s14 }
   0xa   :  { %p2925_p3 = scmp.ne.s32.totalorder %s28_s14, %s2924_s24  ;;  %p2930_p5 = scmp.lt.s32.totalorder %s2924_s24, %s2924_s24 }
   0xc   :  { %p2931_p6 = por %p2930_p5, %p2929_p4 }
   0xe   :  { %p2932_p7 = pnand %p2931_p6, %p2925_p3 }
  0x10   :  { %2935 = shalt.err (!%p2932_p7)
}
  0x11   :  { %30 = dma.hbm_to_vmem [thread:$0]  %s3751_s2, 32, %s28_s14, [#allocation6]  }
  0x12   :  { %s2936_s29 = scalar_lea.hbm %s3755_s6, 32 }
  0x13   :  { %p2937_p8 = scmp.ne.s32.totalorder %s3755_s6, %s2936_s29  ;;  %p2940_p9 = scmp.lt.u32.totalorder %s2936_s29, %s3755_s6 }
  0x15   :  { %p2942_p10 = pnand %p2940_p9, %p2937_p8 }
  0x17   :  { %2945 = shalt.err (!%p2942_p10)
}
  0x18   :  { %s2946_s15 = scalar_lea.vmem %s44_s16, 32  ;;  %p2951_p12 = scmp.lt.s32.totalorder %s44_s16, %s44_s16 }
  0x19   :  { %p2947_p11 = scmp.ne.s32.totalorder %s44_s16, %s2946_s15  ;;  %p2952_p13 = scmp.lt.s32.totalorder %s2946_s15, %s2946_s15 }
  0x1b   :  { %p2953_p0 = por %p2952_p13, %p2951_p12 }
  0x1d   :  { %p2954_p1 = pnand %p2953_p0, %p2947_p11 }
  0x1f   :  { %2957 = shalt.err (!%p2954_p1)
}
  0x20   :  { %46 = dma.hbm_to_vmem [thread:$0]  %s3755_s6, 32, %s44_s16, [#allocation8]  }
  0x21   :  { %2958 = dma.done.wait [#allocation6], 32  }
  0x22   :  { %2959 = vsyncadd [#allocation6], 4294967264 }
  0x23   :  { %2960 = dma.done.wait [#allocation8], 32  }
  0x24   :  { %2961 = vsyncadd [#allocation8], 4294967264  ;;  %v2964_v0 = vmov 0   ;;  %v2611_v1 = vld [vmem:[%s3750_s1 + $0x4] ss:$8 sps:$4 sm:$0xff]   ;;  %vm129_vm0 = vcmask 130048   ;;  %v60_v15 = vlaneseq }
  0x25   :  { %174 = vmatprep.mubr.bf16.mxu0 %v2964_v0  ;;  %317 = vmatprep.mubr.bf16.mxu1 %v2964_v0  ;;  %v3057_v2 = vld [vmem:[%s3752_s3 + $0x4] ss:$8 sps:$4 sm:$0xff]   ;;  %v2615_v3 = vld [vmem:[%s3750_s1] ss:$8 sps:$4 sm:$0xff]   ;;  %v3075_v6 = vld [vmem:[%s3752_s3 + $0x14] ss:$8 sps:$4 sm:$0xff]  }
  0x26   :  { %142 = vmatprep.subr.bf16.mxu0 %v2611_v1  ;;  %v3065_v4 = vld [vmem:[%s3752_s3] ss:$8 sps:$4 sm:$0xff]   ;;  %285 = vmatprep.subr.bf16.mxu1 %v3057_v2  ;;  %v3080_v7 = vld [vmem:[%s3752_s3 + $0x10] ss:$8 sps:$4 sm:$0xff]   ;;  %v3085_v8 = vld [vmem:[%s3752_s3 + $0x24] ss:$8 sps:$4 sm:$0xff]  }
  0x27   :  { %v2617_v5 = vld [vmem:[%s3749_s0] sm:$0xff]   ;;  %143 = vmatpush1.bf16.msra.mxu0 %v2615_v3  ;;  %286 = vmatpush1.bf16.msra.mxu1 %v3065_v4  ;;  %v3101_v10 = vld [vmem:[%s3752_s3 + $0x34] ss:$8 sps:$4 sm:$0xff]   ;;  %v2624_v11 = vld [vmem:[%s3749_s0 + $0x8] sm:$0xff]   ;;  %v3145_v16 = vshrl.u32 %v60_v15, 7  ;;  %v61_v63 = vand.u32 127, %v60_v15 }
  0x28   :  { %519 = vmatprep.subr.bf16.mxu0 %v3057_v2  ;;  %287 = vmatprep.subr.bf16.mxu1 %v3075_v6  ;;  %v3094_v9 = vld [vmem:[%s3752_s3 + $0x20] ss:$8 sps:$4 sm:$0xff]   ;;  %v3111_v12 = vld [vmem:[%s3752_s3 + $0x30] ss:$8 sps:$4 sm:$0xff]   ;;  %s2966_s6 = smov 32   ;;  %vm386_vm7 = vcmask 261120  }
  0x29   :  { %v2628_v13 = vld [vmem:[%s3749_s0 + $0x10] sm:$0xff]   ;;  %v2629_v14 = vld [vmem:[%s3749_s0 + $0x18] sm:$0xff]   ;;  %v95_v17 = vsub.s32 1, %v3145_v16  ;;  %v87_v18 = vld [vmem:[#allocation5] sm:$0x3]  ;;  %v91_v19 = vsub.s32 0, %v3145_v16 }
  0x2a   :  { %2482 = vmatmul.mubr.msk.bf16.vlgmr.msra.gmra.mrb[0].mxu0 %vm129_vm0, %v2617_v5  ;;  %vm63_vm1 = vcmp.ge.s32.totalorder %v61_v63, 64  ;;  %vm65_vm2 = vcmp.lt.s32.totalorder %v61_v63, 96  ;;  %s2965_s0 = smov 64   ;;  %v62_v15 = vadd.s32 128, %v61_v63  ;;  %vm389_vm8 = vcmask 257024   ;;  %s2967_s24 = smov 96  }
  0x2b   :  { %288 = vmatpush1.bf16.msra.mxu1 %v3080_v7  ;;  %184 = vmatprep.mubr.bf16.mxu0 %v2964_v0  ;;  %v96_v20 = vrot.slane %v87_v18, %v95_v17  ;;  %v92_v22 = vrot.slane %v87_v18, %v91_v19  ;;  %vm3181_vm3 = vmand %vm63_vm1, %vm65_vm2  ;;  %vm281_vm9 = vcmask 523264   ;;  %vm396_vm10 = vcmask 261124  }
  0x2c   :  { %289 = vmatprep.subr.bf16.mxu1 %v3085_v8  ;;  %520 = vmatpush1.bf16.msra.mxu0 %v3065_v4  ;;  %vm70_vm4 = vcmp.ge.s32.totalorder %v62_v15, 192  ;;  %vm72_vm5 = vcmp.lt.s32.totalorder %v62_v15, 224  ;;  %vm2969_vm11 = vmmov 0   ;;  %vm2468_vm12 = vcmask 31744  }
  0x2d   :  { %521 = vmatprep.subr.bf16.mxu0 %v3075_v6  ;;  %vm3188_vm6 = vmand %vm70_vm4, %vm72_vm5 }
  0x2f   :  { %290 = vmatpush1.bf16.msra.mxu1 %v3094_v9 }
  0x30   :  { %291 = vmatprep.subr.bf16.mxu1 %v3101_v10  ;;  %522 = vmatpush1.bf16.msra.mxu0 %v3080_v7 }
  0x31   :  { %523 = vmatprep.subr.bf16.mxu0 %v3085_v8 }
  0x32   :  { %2483 = vmatmul.mubr.msk.bf16.gmra.mrb[4].mxu0 %vm129_vm0, %v2624_v11 }
  0x33   :  { %292 = vmatpush1.bf16.msra.mxu1 %v3111_v12  ;;  %194 = vmatprep.mubr.bf16.mxu0 %v2964_v0 }
  0x34   :  { %403 = vmatprep.subr.bf16.mxu1 %v3057_v2  ;;  %524 = vmatpush1.bf16.msra.mxu0 %v3094_v9 }
  0x35   :  { %525 = vmatprep.subr.bf16.mxu0 %v3101_v10 }
  0x36   :  { %318 = vmatmul.mubr.bf16.vlgmr.msra.gmra.mrb[0].mxu1 %v2964_v0 }
  0x37   :  { %404 = vmatpush1.bf16.msra.mxu1 %v3065_v4  ;;  %435 = vmatprep.mubr.bf16.mxu1 %v2964_v0 }
  0x38   :  { %405 = vmatprep.subr.bf16.mxu1 %v3075_v6  ;;  %526 = vmatpush1.bf16.msra.mxu0 %v3111_v12 }
  0x39   :  { %750 = vmatprep.subr.bf16.mxu0 %v3057_v2 }
  0x3a   :  { %2484 = vmatmul.mubr.msk.bf16.gmra.mrb[8].mxu0 %vm129_vm0, %v2628_v13 }
  0x3b   :  { %204 = vmatprep.mubr.bf16.mxu0 %v2964_v0  ;;  %406 = vmatpush1.bf16.msra.mxu1 %v3080_v7 }
  0x3c   :  { %407 = vmatprep.subr.bf16.mxu1 %v3085_v8 }
  0x3f   :  { %408 = vmatpush1.bf16.msra.mxu1 %v3094_v9 }
  0x40   :  { %409 = vmatprep.subr.bf16.mxu1 %v3101_v10 }
  0x42   :  { %2485 = vmatmul.mubr.msk.bf16.gmra.mrb[12].mxu0 %vm129_vm0, %v2629_v14 }
  0x43   :  { %410 = vmatpush1.bf16.msra.mxu1 %v3111_v12  ;;  %551 = vmatprep.mubr.bf16.mxu0 %v2964_v0 }
  0x44   :  { %634 = vmatprep.subr.bf16.mxu1 %v3057_v2 }
  0xfd   :  { %v176_v21 = vpop.f32.mrb[0].mxu0 }
  0xfe   :  { %v178_v23 = vpop.f32.mrb[1].mxu0  ;;  %v177_v34 = vadd.f32 %v176_v21, %v92_v22 }
  0xff   :  { %v3153_v24 = vadd.f32 %v178_v23, %v96_v20  ;;  %v180_v25 = vpop.f32.mrb[2].mxu0 }
 0x100   :  { %v3155_v26 = vadd.f32 %v180_v25, %v92_v22  ;;  %v182_v27 = vpop.f32.mrb[3].mxu0 }
 0x101   :  { %v3157_v28 = vadd.f32 %v182_v27, %v96_v20 }
 0x105   :  { %v186_v29 = vpop.f32.mrb[4].mxu0 }
 0x106   :  { %v3159_v30 = vadd.f32 %v186_v29, %v92_v22  ;;  %v188_v31 = vpop.f32.mrb[5].mxu0 }
 0x107   :  { %v3161_v32 = vadd.f32 %v188_v31, %v96_v20  ;;  %v190_v33 = vpop.f32.mrb[6].mxu0 }
 0x108   :  { %v3163_v35 = vadd.f32 %v190_v33, %v92_v22  ;;  %v192_v36 = vpop.f32.mrb[7].mxu0 }
 0x109   :  { %v3165_v37 = vadd.f32 %v192_v36, %v96_v20  ;;  %v319_v38 = vpop.f32.mrb[0].mxu1 }
 0x10a   :  { %v326_v39 = vadd.f32 %v319_v38, %v177_v34  ;;  %v321_v40 = vpop.f32.mrb[1].mxu1 }
 0x10b   :  { %v323_v41 = vpop.f32.mrb[2].mxu1 }
 0x10c   :  { %v2494_v42 = vmul.f32 -1.442695, %v326_v39  ;;  %v324_v43 = vpop.f32.mrb[3].mxu1 }
 0x10d   :  { %v196_v44 = vpop.f32.mrb[8].mxu0 }
 0x10e   :  { %2658 = vpow2.f32 %v2494_v42  ;;  %v3167_v45 = vadd.f32 %v196_v44, %v92_v22  ;;  %v198_v46 = vpop.f32.mrb[9].mxu0 }
 0x10f   :  { %v3169_v47 = vadd.f32 %v198_v46, %v96_v20  ;;  %v200_v48 = vpop.f32.mrb[10].mxu0  ;;  %2660 = vtanh.f32 %v326_v39 }
 0x110   :  { %v3171_v49 = vadd.f32 %v200_v48, %v92_v22  ;;  %v202_v50 = vpop.f32.mrb[11].mxu0 }
 0x111   :  { %v3173_v51 = vadd.f32 %v202_v50, %v96_v20 }
 0x115   :  { %v206_v52 = vpop.f32.mrb[12].mxu0 }
 0x116   :  { %v3175_v53 = vadd.f32 %v206_v52, %v92_v22  ;;  %v208_v54 = vpop.f32.mrb[13].mxu0 }
 0x117   :  { %v3177_v55 = vadd.f32 %v208_v54, %v96_v20  ;;  %v210_v56 = vpop.f32.mrb[14].mxu0 }
 0x118   :  { %v2659_v57 = vpop.eup %2658  ;;  %v3179_v58 = vadd.f32 %v210_v56, %v92_v22  ;;  %v212_v59 = vpop.f32.mrb[15].mxu0 }
 0x119   :  { %v336_v60 = vadd.f32 1.0, %v2659_v57  ;;  %v213_v61 = vadd.f32 %v212_v59, %v96_v20  ;;  %v2661_v5 = vpop.eup %2660  ;;  %v2654_v20 = vld [vmem:[%s3757_s8] sm:$0xff]  }
 0x11b   :  { %2662 = vrcp.f32 %v336_v60  ;;  %v327_v62 = vadd.f32 %v321_v40, %v213_v61 }
 0x11d   :  { %v2495_v1 = vmul.f32 -1.442695, %v327_v62 }
 0x11f   :  { %2664 = vpow2.f32 %v2495_v1 }
 0x120   :  { %2666 = vtanh.f32 %v327_v62 }
 0x125   :  { %v2663_v11 = vpop.eup %2662 }
 0x126   :  { %v342_v13 = vsel %vm3181_vm3, %v2661_v5, %v2663_v11 }
 0x127   :  { %346 = vrot.lane.b32.xlu0 %v342_v13, %s2965_s0  ;;  %v344_v33 = vmul.f32 0.0, %v342_v13 }
 0x129   :  { %v2665_v14 = vpop.eup %2664 }
 0x12a   :  { %v337_v18 = vadd.f32 1.0, %v2665_v14  ;;  %v2667_v21 = vpop.eup %2666 }
 0x12c   :  { %2668 = vrcp.f32 %v337_v18 }
 0x136   :  { %v2669_v22 = vpop.eup %2668 }
 0x137   :  { %v343_v23 = vsel %vm3188_vm6, %v2667_v21, %v2669_v22 }
 0x138   :  { %357 = vrot.lane.b32.xlu0 %v343_v23, %s2965_s0  ;;  %v355_v39 = vmul.f32 0.0, %v343_v23 }
 0x199   :  { %v347_v25 = vpop.permute.xlu0 %346 }
 0x19a   :  { %v349_v27 = vmul.f32 %v347_v25, %v342_v13 }
 0x19c   :  { %351 = vrot.lane.b32.xlu1 %v349_v27, %s2966_s6 }
 0x1aa   :  { %v358_v29 = vpop.permute.xlu0 %357 }
 0x1ab   :  { %v360_v31 = vmul.f32 %v358_v29, %v343_v23 }
 0x1ad   :  { %362 = vrot.lane.b32.xlu1 %v360_v31, %s2966_s6 }
 0x20e   :  { %v352_v34 = vpop.permute.xlu1 %351 }
 0x20f   :  { %v3197_v36 = vadd.f32 %v352_v34, %v344_v33 }
 0x211   :  { %2670 = vtanh.f32 %v3197_v36 }
 0x21b   :  { %v2671_v38 = vpop.eup %2670 }
 0x21c   :  { %368 = vrot.lane.b32.xlu0 %v2671_v38, %s2965_s0 }
 0x21f   :  { %v363_v40 = vpop.permute.xlu1 %362 }
 0x220   :  { %v365_v41 = vadd.f32 %v363_v40, %v355_v39 }
 0x222   :  { %2672 = vtanh.f32 %v365_v41 }
 0x22c   :  { %v2673_v42 = vpop.eup %2672 }
 0x22d   :  { %374 = vrot.lane.b32.xlu1 %v2673_v42, %s2965_s0 }
 0x28e   :  { %v369_v43 = vpop.permute.xlu0 %368 }
 0x28f   :  { %v371_v44 = vmul.f32 %v369_v43, %v342_v13 }
 0x291   :  { %379 = vrot.lane.b32.xlu0 %v371_v44, %s2966_s6 }
 0x29f   :  { %v375_v46 = vpop.permute.xlu1 %374 }
 0x2a0   :  { %v377_v48 = vmul.f32 %v375_v46, %v343_v23 }
 0x2a2   :  { %383 = vrot.lane.b32.xlu1 %v377_v48, %s2965_s0 }
 0x303   :  { %v380_v50 = vpop.permute.xlu0 %379 }
 0x314   :  { %v384_v52 = vpop.permute.xlu1 %383 }
 0x315   :  { %v387_v54 = vsel %vm386_vm7, %v380_v50, %v384_v52 }
 0x316   :  { %v3205_v56 = vpack.c.bf16 %v387_v54, %v387_v54 }
 0x318   :  { %390 = vst.msk [vmem:[#allocation3] sm:$0xf] %vm389_vm8, %v3205_v56  ;;  %2496 = vmatmul.mubr.msk.bf16.vlgmr.msra.gmra.mrb[4].mxu1 %vm281_vm9, %v3205_v56 }
 0x319   :  { %635 = vmatpush1.bf16.msra.mxu1 %v3065_v4  ;;  %666 = vmatprep.mubr.bf16.mxu1 %v2964_v0 }
 0x31a   :  { %636 = vmatprep.subr.bf16.mxu1 %v3075_v6 }
 0x31d   :  { %637 = vmatpush1.bf16.msra.mxu1 %v3080_v7 }
 0x31e   :  { %638 = vmatprep.subr.bf16.mxu1 %v3085_v8 }
 0x321   :  { %639 = vmatpush1.bf16.msra.mxu1 %v3094_v9 }
 0x322   :  { %640 = vmatprep.subr.bf16.mxu1 %v3101_v10 }
 0x325   :  { %641 = vmatpush1.bf16.msra.mxu1 %v3111_v12 }
 0x326   :  { %865 = vmatprep.subr.bf16.mxu1 %v3057_v2 }
 0x3eb   :  { %v437_v57 = vpop.f32.mrb[4].mxu1 }
 0x3ec   :  { %v444_v59 = vadd.f32 %v437_v57, %v3155_v26  ;;  %v439_v60 = vpop.f32.mrb[5].mxu1 }
 0x3ed   :  { %v445_v61 = vadd.f32 %v439_v60, %v3177_v55  ;;  %v441_v62 = vpop.f32.mrb[6].mxu1 }
 0x3ee   :  { %v2497_v63 = vmul.f32 -1.442695, %v444_v59  ;;  %v442_v1 = vpop.f32.mrb[7].mxu1 }
 0x3ef   :  { %v2498_v5 = vmul.f32 -1.442695, %v445_v61 }
 0x3f0   :  { %2674 = vpow2.f32 %v2497_v63 }
 0x3f1   :  { %2676 = vpow2.f32 %v2498_v5 }
 0x3f2   :  { %2678 = vtanh.f32 %v444_v59 }
 0x3f3   :  { %2680 = vtanh.f32 %v445_v61 }
 0x3fa   :  { %v2675_v11 = vpop.eup %2674 }
 0x3fb   :  { %v2677_v13 = vpop.eup %2676  ;;  %v454_v14 = vadd.f32 1.0, %v2675_v11 }
 0x3fc   :  { %v455_v18 = vadd.f32 1.0, %v2677_v13  ;;  %v2679_v15 = vpop.eup %2678 }
 0x3fd   :  { %2682 = vrcp.f32 %v454_v14  ;;  %v2681_v21 = vpop.eup %2680 }
 0x3fe   :  { %2684 = vrcp.f32 %v455_v18 }
 0x407   :  { %v2683_v26 = vpop.eup %2682 }
 0x408   :  { %v2685_v22 = vpop.eup %2684  ;;  %v460_v55 = vsel %vm3181_vm3, %v2679_v15, %v2683_v26 }
 0x409   :  { %464 = vrot.lane.b32.xlu0 %v460_v55, %s2965_s0  ;;  %v461_v23 = vsel %vm3188_vm6, %v2681_v21, %v2685_v22  ;;  %v462_v33 = vmul.f32 %v460_v55, %v3197_v36 }
 0x40a   :  { %475 = vrot.lane.b32.xlu1 %v461_v23, %s2965_s0  ;;  %v473_v38 = vmul.f32 %v461_v23, %v365_v41 }
 0x47b   :  { %v465_v25 = vpop.permute.xlu0 %464 }
 0x47c   :  { %v467_v27 = vmul.f32 %v465_v25, %v460_v55  ;;  %v476_v29 = vpop.permute.xlu1 %475 }
 0x47d   :  { %v478_v31 = vmul.f32 %v476_v29, %v461_v23 }
 0x47e   :  { %469 = vrot.lane.b32.xlu0 %v467_v27, %s2966_s6 }
 0x47f   :  { %480 = vrot.lane.b32.xlu1 %v478_v31, %s2966_s6 }
 0x4f0   :  { %v470_v34 = vpop.permute.xlu0 %469 }
 0x4f1   :  { %v3231_v39 = vadd.f32 %v470_v34, %v462_v33  ;;  %v481_v40 = vpop.permute.xlu1 %480 }
 0x4f2   :  { %v3233_v42 = vadd.f32 %v481_v40, %v473_v38 }
 0x4f3   :  { %2686 = vtanh.f32 %v3231_v39 }
 0x4f4   :  { %2688 = vtanh.f32 %v3233_v42 }
 0x4fd   :  { %v2687_v43 = vpop.eup %2686 }
 0x4fe   :  { %v2689_v44 = vpop.eup %2688  ;;  %486 = vrot.lane.b32.xlu0 %v2687_v43, %s2965_s0 }
 0x4ff   :  { %492 = vrot.lane.b32.xlu1 %v2689_v44, %s2965_s0 }
 0x570   :  { %v487_v46 = vpop.permute.xlu0 %486 }
 0x571   :  { %v489_v48 = vmul.f32 %v487_v46, %v460_v55  ;;  %v493_v36 = vpop.permute.xlu1 %492 }
 0x572   :  { %v495_v50 = vmul.f32 %v493_v36, %v461_v23 }
 0x573   :  { %497 = vrot.lane.b32.xlu0 %v489_v48, %s2966_s6 }
 0x574   :  { %501 = vrot.lane.b32.xlu1 %v495_v50, %s2965_s0 }
 0x5e5   :  { %v498_v41 = vpop.permute.xlu0 %497 }
 0x5e6   :  { %v502_v52 = vpop.permute.xlu1 %501 }
 0x5e7   :  { %v504_v54 = vsel %vm386_vm7, %v498_v41, %v502_v52 }
 0x5e8   :  { %v3242_v57 = vpack.c.bf16 %v504_v54, %v504_v54 }
 0x5ea   :  { %v507_v59 = vrot.slane %v3242_v57, 4  ;;  %2499 = vmatmul.mubr.msk.bf16.vlgmr.msra.gmra.mrb[16].mxu0 %vm281_vm9, %v3242_v57 }
 0x5eb   :  { %751 = vmatpush1.bf16.msra.mxu0 %v3065_v4  ;;  %782 = vmatprep.mubr.bf16.mxu0 %v2964_v0 }
 0x5ec   :  { %509 = vst.msk [vmem:[#allocation3] sm:$0xf0] %vm396_vm10, %v507_v59  ;;  %752 = vmatprep.subr.bf16.mxu0 %v3075_v6 }
 0x5ef   :  { %753 = vmatpush1.bf16.msra.mxu0 %v3080_v7 }
 0x5f0   :  { %754 = vmatprep.subr.bf16.mxu0 %v3085_v8 }
 0x5f3   :  { %755 = vmatpush1.bf16.msra.mxu0 %v3094_v9 }
 0x5f4   :  { %756 = vmatprep.subr.bf16.mxu0 %v3101_v10 }
 0x5f7   :  { %757 = vmatpush1.bf16.msra.mxu0 %v3111_v12 }
 0x5f8   :  { %981 = vmatprep.subr.bf16.mxu0 %v3057_v2 }
 0x6bd   :  { %v553_v60 = vpop.f32.mrb[16].mxu0 }
 0x6be   :  { %v560_v61 = vadd.f32 %v553_v60, %v3159_v30  ;;  %v555_v62 = vpop.f32.mrb[17].mxu0 }
 0x6bf   :  { %v561_v63 = vadd.f32 %v555_v62, %v3173_v51  ;;  %v557_v1 = vpop.f32.mrb[18].mxu0 }
 0x6c0   :  { %v2500_v5 = vmul.f32 -1.442695, %v560_v61  ;;  %v558_v11 = vpop.f32.mrb[19].mxu0 }
 0x6c1   :  { %v2501_v13 = vmul.f32 -1.442695, %v561_v63 }
 0x6c2   :  { %2690 = vpow2.f32 %v2500_v5 }
 0x6c3   :  { %2692 = vpow2.f32 %v2501_v13 }
 0x6c4   :  { %2694 = vtanh.f32 %v560_v61 }
 0x6c5   :  { %2696 = vtanh.f32 %v561_v63 }
 0x6cc   :  { %v2691_v14 = vpop.eup %2690 }
 0x6cd   :  { %v2693_v18 = vpop.eup %2692  ;;  %v570_v15 = vadd.f32 1.0, %v2691_v14 }
 0x6ce   :  { %v571_v21 = vadd.f32 1.0, %v2693_v18  ;;  %v2695_v26 = vpop.eup %2694 }
 0x6cf   :  { %2698 = vrcp.f32 %v570_v15  ;;  %v2697_v22 = vpop.eup %2696 }
 0x6d0   :  { %2700 = vrcp.f32 %v571_v21 }
 0x6d9   :  { %v2699_v30 = vpop.eup %2698 }
 0x6da   :  { %v2701_v55 = vpop.eup %2700  ;;  %v576_v51 = vsel %vm3181_vm3, %v2695_v26, %v2699_v30 }
 0x6db   :  { %580 = vrot.lane.b32.xlu0 %v576_v51, %s2965_s0  ;;  %v577_v23 = vsel %vm3188_vm6, %v2697_v22, %v2701_v55  ;;  %v578_v33 = vmul.f32 %v576_v51, %v3231_v39 }
 0x6dc   :  { %591 = vrot.lane.b32.xlu1 %v577_v23, %s2965_s0  ;;  %v589_v38 = vmul.f32 %v577_v23, %v3233_v42 }
 0x74d   :  { %v581_v25 = vpop.permute.xlu0 %580 }
 0x74e   :  { %v583_v27 = vmul.f32 %v581_v25, %v576_v51  ;;  %v592_v29 = vpop.permute.xlu1 %591 }
 0x74f   :  { %v594_v31 = vmul.f32 %v592_v29, %v577_v23 }
 0x750   :  { %585 = vrot.lane.b32.xlu0 %v583_v27, %s2966_s6 }
 0x751   :  { %596 = vrot.lane.b32.xlu1 %v594_v31, %s2966_s6 }
 0x7c2   :  { %v586_v34 = vpop.permute.xlu0 %585 }
 0x7c3   :  { %v588_v40 = vadd.f32 %v586_v34, %v578_v33  ;;  %v597_v43 = vpop.permute.xlu1 %596 }
 0x7c4   :  { %v599_v44 = vadd.f32 %v597_v43, %v589_v38 }
 0x7c5   :  { %2702 = vtanh.f32 %v588_v40 }
 0x7c6   :  { %2704 = vtanh.f32 %v599_v44 }
 0x7cf   :  { %v2703_v46 = vpop.eup %2702 }
 0x7d0   :  { %v2705_v48 = vpop.eup %2704  ;;  %602 = vrot.lane.b32.xlu0 %v2703_v46, %s2965_s0 }
 0x7d1   :  { %608 = vrot.lane.b32.xlu1 %v2705_v48, %s2965_s0 }
 0x842   :  { %v603_v36 = vpop.permute.xlu0 %602 }
 0x843   :  { %v605_v50 = vmul.f32 %v603_v36, %v576_v51  ;;  %v609_v41 = vpop.permute.xlu1 %608 }
 0x844   :  { %v611_v52 = vmul.f32 %v609_v41, %v577_v23 }
 0x845   :  { %613 = vrot.lane.b32.xlu0 %v605_v50, %s2966_s6 }
 0x846   :  { %617 = vrot.lane.b32.xlu1 %v611_v52, %s2965_s0 }
 0x8b7   :  { %v614_v39 = vpop.permute.xlu0 %613 }
 0x8b8   :  { %v618_v42 = vpop.permute.xlu1 %617 }
 0x8b9   :  { %v620_v54 = vsel %vm386_vm7, %v614_v39, %v618_v42 }
 0x8ba   :  { %v3274_v59 = vpack.c.bf16 %v620_v54, %v620_v54 }
 0x8bc   :  { %622 = vst.msk [vmem:[#allocation3 + $0x8] sm:$0xf] %vm389_vm8, %v3274_v59  ;;  %2502 = vmatmul.mubr.msk.bf16.vlgmr.msra.gmra.mrb[8].mxu1 %vm281_vm9, %v3274_v59 }
 0x8bd   :  { %866 = vmatpush1.bf16.msra.mxu1 %v3065_v4  ;;  %897 = vmatprep.mubr.bf16.mxu1 %v2964_v0 }
 0x8be   :  { %867 = vmatprep.subr.bf16.mxu1 %v3075_v6 }
 0x8c1   :  { %868 = vmatpush1.bf16.msra.mxu1 %v3080_v7 }
 0x8c2   :  { %869 = vmatprep.subr.bf16.mxu1 %v3085_v8 }
 0x8c5   :  { %870 = vmatpush1.bf16.msra.mxu1 %v3094_v9 }
 0x8c6   :  { %871 = vmatprep.subr.bf16.mxu1 %v3101_v10 }
 0x8c9   :  { %872 = vmatpush1.bf16.msra.mxu1 %v3111_v12 }
 0x8ca   :  { %1096 = vmatprep.subr.bf16.mxu1 %v3057_v2 }
 0x98f   :  { %v668_v60 = vpop.f32.mrb[8].mxu1 }
 0x990   :  { %v675_v61 = vadd.f32 %v668_v60, %v3163_v35  ;;  %v670_v62 = vpop.f32.mrb[9].mxu1 }
 0x991   :  { %v676_v63 = vadd.f32 %v670_v62, %v3169_v47  ;;  %v672_v1 = vpop.f32.mrb[10].mxu1 }
 0x992   :  { %v2503_v5 = vmul.f32 -1.442695, %v675_v61  ;;  %v673_v11 = vpop.f32.mrb[11].mxu1 }
 0x993   :  { %v2504_v13 = vmul.f32 -1.442695, %v676_v63 }
 0x994   :  { %2706 = vpow2.f32 %v2503_v5 }
 0x995   :  { %2708 = vpow2.f32 %v2504_v13 }
 0x996   :  { %2710 = vtanh.f32 %v675_v61 }
 0x997   :  { %2712 = vtanh.f32 %v676_v63 }
 0x99e   :  { %v2707_v14 = vpop.eup %2706 }
 0x99f   :  { %v2709_v18 = vpop.eup %2708  ;;  %v685_v15 = vadd.f32 1.0, %v2707_v14 }
 0x9a0   :  { %v686_v21 = vadd.f32 1.0, %v2709_v18  ;;  %v2711_v2 = vpop.eup %2710 }
 0x9a1   :  { %2714 = vrcp.f32 %v685_v15  ;;  %v2713_v26 = vpop.eup %2712 }
 0x9a2   :  { %2716 = vrcp.f32 %v686_v21 }
 0x9ab   :  { %v2715_v35 = vpop.eup %2714 }
 0x9ac   :  { %v2717_v22 = vpop.eup %2716  ;;  %v691_v47 = vsel %vm3181_vm3, %v2711_v2, %v2715_v35 }
 0x9ad   :  { %695 = vrot.lane.b32.xlu0 %v691_v47, %s2965_s0  ;;  %v692_v30 = vsel %vm3188_vm6, %v2713_v26, %v2717_v22  ;;  %v693_v27 = vmul.f32 %v691_v47, %v588_v40 }
 0x9ae   :  { %706 = vrot.lane.b32.xlu1 %v692_v30, %s2965_s0  ;;  %v704_v31 = vmul.f32 %v692_v30, %v599_v44 }
 0xa1f   :  { %v696_v55 = vpop.permute.xlu0 %695 }
 0xa20   :  { %v698_v51 = vmul.f32 %v696_v55, %v691_v47  ;;  %v707_v23 = vpop.permute.xlu1 %706 }
 0xa21   :  { %v709_v25 = vmul.f32 %v707_v23, %v692_v30 }
 0xa22   :  { %700 = vrot.lane.b32.xlu0 %v698_v51, %s2966_s6 }
 0xa23   :  { %711 = vrot.lane.b32.xlu1 %v709_v25, %s2966_s6 }
 0xa94   :  { %v701_v29 = vpop.permute.xlu0 %700 }
 0xa95   :  { %v703_v33 = vadd.f32 %v701_v29, %v693_v27  ;;  %v712_v34 = vpop.permute.xlu1 %711 }
 0xa96   :  { %v714_v38 = vadd.f32 %v712_v34, %v704_v31 }
 0xa97   :  { %2718 = vtanh.f32 %v703_v33 }
 0xa98   :  { %2720 = vtanh.f32 %v714_v38 }
 0xaa1   :  { %v2719_v43 = vpop.eup %2718 }
 0xaa2   :  { %v2721_v46 = vpop.eup %2720  ;;  %717 = vrot.lane.b32.xlu0 %v2719_v43, %s2965_s0 }
 0xaa3   :  { %723 = vrot.lane.b32.xlu1 %v2721_v46, %s2965_s0 }
 0xb14   :  { %v718_v48 = vpop.permute.xlu0 %717 }
 0xb15   :  { %v720_v36 = vmul.f32 %v718_v48, %v691_v47  ;;  %v724_v50 = vpop.permute.xlu1 %723 }
 0xb16   :  { %v726_v41 = vmul.f32 %v724_v50, %v692_v30 }
 0xb17   :  { %728 = vrot.lane.b32.xlu0 %v720_v36, %s2966_s6 }
 0xb18   :  { %732 = vrot.lane.b32.xlu1 %v726_v41, %s2965_s0 }
 0xb89   :  { %v729_v40 = vpop.permute.xlu0 %728 }
 0xb8a   :  { %v733_v44 = vpop.permute.xlu1 %732 }
 0xb8b   :  { %v735_v52 = vsel %vm386_vm7, %v729_v40, %v733_v44 }
 0xb8c   :  { %v3304_v39 = vpack.c.bf16 %v735_v52, %v735_v52 }
 0xb8e   :  { %v738_v42 = vrot.slane %v3304_v39, 4  ;;  %2505 = vmatmul.mubr.msk.bf16.vlgmr.msra.gmra.mrb[20].mxu0 %vm281_vm9, %v3304_v39 }
 0xb8f   :  { %982 = vmatpush1.bf16.msra.mxu0 %v3065_v4  ;;  %1013 = vmatprep.mubr.bf16.mxu0 %v2964_v0 }
 0xb90   :  { %740 = vst.msk [vmem:[#allocation3 + $0x8] sm:$0xf0] %vm396_vm10, %v738_v42  ;;  %983 = vmatprep.subr.bf16.mxu0 %v3075_v6 }
 0xb93   :  { %984 = vmatpush1.bf16.msra.mxu0 %v3080_v7 }
 0xb94   :  { %985 = vmatprep.subr.bf16.mxu0 %v3085_v8 }
 0xb97   :  { %986 = vmatpush1.bf16.msra.mxu0 %v3094_v9 }
 0xb98   :  { %987 = vmatprep.subr.bf16.mxu0 %v3101_v10 }
 0xb9b   :  { %988 = vmatpush1.bf16.msra.mxu0 %v3111_v12 }
 0xc61   :  { %v784_v54 = vpop.f32.mrb[20].mxu0 }
 0xc62   :  { %v791_v60 = vadd.f32 %v784_v54, %v3167_v45  ;;  %v786_v61 = vpop.f32.mrb[21].mxu0 }
 0xc63   :  { %v792_v62 = vadd.f32 %v786_v61, %v3165_v37  ;;  %v788_v63 = vpop.f32.mrb[22].mxu0 }
 0xc64   :  { %v2506_v1 = vmul.f32 -1.442695, %v791_v60  ;;  %v789_v5 = vpop.f32.mrb[23].mxu0 }
 0xc65   :  { %v2507_v11 = vmul.f32 -1.442695, %v792_v62 }
 0xc66   :  { %2722 = vpow2.f32 %v2506_v1 }
 0xc67   :  { %2724 = vpow2.f32 %v2507_v11 }
 0xc68   :  { %2726 = vtanh.f32 %v791_v60 }
 0xc69   :  { %2728 = vtanh.f32 %v792_v62 }
 0xc70   :  { %v2723_v13 = vpop.eup %2722 }
 0xc71   :  { %v2725_v14 = vpop.eup %2724  ;;  %v801_v18 = vadd.f32 1.0, %v2723_v13 }
 0xc72   :  { %v802_v15 = vadd.f32 1.0, %v2725_v14  ;;  %v2727_v21 = vpop.eup %2726 }
 0xc73   :  { %2730 = vrcp.f32 %v801_v18  ;;  %v2729_v2 = vpop.eup %2728 }
 0xc74   :  { %2732 = vrcp.f32 %v802_v15 }
 0xc7d   :  { %v2731_v45 = vpop.eup %2730 }
 0xc7e   :  { %v2733_v26 = vpop.eup %2732  ;;  %v807_v37 = vsel %vm3181_vm3, %v2727_v21, %v2731_v45 }
 0xc7f   :  { %811 = vrot.lane.b32.xlu0 %v807_v37, %s2965_s0  ;;  %v808_v35 = vsel %vm3188_vm6, %v2729_v2, %v2733_v26  ;;  %v809_v51 = vmul.f32 %v807_v37, %v703_v33 }
 0xc80   :  { %822 = vrot.lane.b32.xlu1 %v808_v35, %s2965_s0  ;;  %v820_v25 = vmul.f32 %v808_v35, %v714_v38 }
 0xcf1   :  { %v812_v22 = vpop.permute.xlu0 %811 }
 0xcf2   :  { %v814_v47 = vmul.f32 %v812_v22, %v807_v37  ;;  %v823_v30 = vpop.permute.xlu1 %822 }
 0xcf3   :  { %v825_v55 = vmul.f32 %v823_v30, %v808_v35 }
 0xcf4   :  { %816 = vrot.lane.b32.xlu0 %v814_v47, %s2966_s6 }
 0xcf5   :  { %827 = vrot.lane.b32.xlu1 %v825_v55, %s2966_s6 }
 0xd66   :  { %v817_v23 = vpop.permute.xlu0 %816 }
 0xd67   :  { %v819_v27 = vadd.f32 %v817_v23, %v809_v51  ;;  %v828_v29 = vpop.permute.xlu1 %827 }
 0xd68   :  { %v830_v31 = vadd.f32 %v828_v29, %v820_v25 }
 0xd69   :  { %2734 = vtanh.f32 %v819_v27 }
 0xd6a   :  { %2736 = vtanh.f32 %v830_v31 }
 0xd73   :  { %v2735_v34 = vpop.eup %2734 }
 0xd74   :  { %v2737_v43 = vpop.eup %2736  ;;  %833 = vrot.lane.b32.xlu0 %v2735_v34, %s2965_s0 }
 0xd75   :  { %839 = vrot.lane.b32.xlu1 %v2737_v43, %s2965_s0 }
 0xde6   :  { %v834_v46 = vpop.permute.xlu0 %833 }
 0xde7   :  { %v836_v48 = vmul.f32 %v834_v46, %v807_v37  ;;  %v840_v36 = vpop.permute.xlu1 %839 }
 0xde8   :  { %v842_v50 = vmul.f32 %v840_v36, %v808_v35 }
 0xde9   :  { %844 = vrot.lane.b32.xlu0 %v836_v48, %s2966_s6 }
 0xdea   :  { %848 = vrot.lane.b32.xlu1 %v842_v50, %s2965_s0 }
 0xe5b   :  { %v845_v33 = vpop.permute.xlu0 %844 }
 0xe5c   :  { %v849_v38 = vpop.permute.xlu1 %848 }
 0xe5d   :  { %v851_v41 = vsel %vm386_vm7, %v845_v33, %v849_v38 }
 0xe5e   :  { %v3333_v40 = vpack.c.bf16 %v851_v41, %v851_v41 }
 0xe60   :  { %853 = vst.msk [vmem:[#allocation3 + $0x10] sm:$0xf] %vm389_vm8, %v3333_v40  ;;  %2508 = vmatmul.mubr.msk.bf16.vlgmr.msra.gmra.mrb[12].mxu1 %vm281_vm9, %v3333_v40 }
 0xe61   :  { %1097 = vmatpush1.bf16.msra.mxu1 %v3065_v4  ;;  %1128 = vmatprep.mubr.bf16.mxu1 %v2964_v0 }
 0xe62   :  { %1098 = vmatprep.subr.bf16.mxu1 %v3075_v6 }
 0xe65   :  { %1099 = vmatpush1.bf16.msra.mxu1 %v3080_v7 }
 0xe66   :  { %1100 = vmatprep.subr.bf16.mxu1 %v3085_v8 }
 0xe69   :  { %1101 = vmatpush1.bf16.msra.mxu1 %v3094_v9 }
 0xe6a   :  { %1102 = vmatprep.subr.bf16.mxu1 %v3101_v10 }
 0xe6d   :  { %1103 = vmatpush1.bf16.msra.mxu1 %v3111_v12 }
 0xf33   :  { %v899_v44 = vpop.f32.mrb[12].mxu1 }
 0xf34   :  { %v906_v52 = vadd.f32 %v899_v44, %v3171_v49  ;;  %v901_v42 = vpop.f32.mrb[13].mxu1 }
 0xf35   :  { %v907_v4 = vadd.f32 %v901_v42, %v3161_v32  ;;  %v903_v54 = vpop.f32.mrb[14].mxu1 }
 0xf36   :  { %v2509_v60 = vmul.f32 -1.442695, %v906_v52  ;;  %v904_v61 = vpop.f32.mrb[15].mxu1 }
 0xf37   :  { %v2510_v6 = vmul.f32 -1.442695, %v907_v4 }
 0xf38   :  { %2738 = vpow2.f32 %v2509_v60 }
 0xf39   :  { %2740 = vpow2.f32 %v2510_v6 }
 0xf3a   :  { %2742 = vtanh.f32 %v906_v52 }
 0xf3b   :  { %2744 = vtanh.f32 %v907_v4 }
 0xf42   :  { %v2739_v7 = vpop.eup %2738 }
 0xf43   :  { %v2741_v8 = vpop.eup %2740  ;;  %v916_v9 = vadd.f32 1.0, %v2739_v7 }
 0xf44   :  { %v917_v10 = vadd.f32 1.0, %v2741_v8  ;;  %v2743_v12 = vpop.eup %2742 }
 0xf45   :  { %2746 = vrcp.f32 %v916_v9  ;;  %v2745_v62 = vpop.eup %2744 }
 0xf46   :  { %2748 = vrcp.f32 %v917_v10 }
 0xf4f   :  { %v2747_v49 = vpop.eup %2746 }
 0xf50   :  { %v2749_v63 = vpop.eup %2748  ;;  %v922_v32 = vsel %vm3181_vm3, %v2743_v12, %v2747_v49 }
 0xf51   :  { %926 = vrot.lane.b32.xlu0 %v922_v32, %s2965_s0  ;;  %v923_v1 = vsel %vm3188_vm6, %v2745_v62, %v2749_v63  ;;  %v924_v18 = vmul.f32 %v922_v32, %v819_v27 }
 0xf52   :  { %937 = vrot.lane.b32.xlu1 %v923_v1, %s2965_s0  ;;  %v935_v21 = vmul.f32 %v923_v1, %v830_v31 }
 0xfc3   :  { %v927_v5 = vpop.permute.xlu0 %926 }
 0xfc4   :  { %v929_v11 = vmul.f32 %v927_v5, %v922_v32  ;;  %v938_v13 = vpop.permute.xlu1 %937 }
 0xfc5   :  { %v940_v14 = vmul.f32 %v938_v13, %v923_v1 }
 0xfc6   :  { %931 = vrot.lane.b32.xlu0 %v929_v11, %s2966_s6 }
 0xfc7   :  { %942 = vrot.lane.b32.xlu1 %v940_v14, %s2966_s6 }
0x1038   :  { %v932_v15 = vpop.permute.xlu0 %931 }
0x1039   :  { %v934_v2 = vadd.f32 %v932_v15, %v924_v18  ;;  %v943_v45 = vpop.permute.xlu1 %942 }
0x103a   :  { %v945_v26 = vadd.f32 %v943_v45, %v935_v21 }
0x103b   :  { %2750 = vtanh.f32 %v934_v2 }
0x103c   :  { %2752 = vtanh.f32 %v945_v26 }
0x1045   :  { %v2751_v37 = vpop.eup %2750 }
0x1046   :  { %v2753_v35 = vpop.eup %2752  ;;  %948 = vrot.lane.b32.xlu0 %v2751_v37, %s2965_s0 }
0x1047   :  { %954 = vrot.lane.b32.xlu1 %v2753_v35, %s2965_s0 }
0x10b8   :  { %v949_v22 = vpop.permute.xlu0 %948 }
0x10b9   :  { %v951_v47 = vmul.f32 %v949_v22, %v922_v32  ;;  %v955_v30 = vpop.permute.xlu1 %954 }
0x10ba   :  { %v957_v55 = vmul.f32 %v955_v30, %v923_v1 }
0x10bb   :  { %959 = vrot.lane.b32.xlu0 %v951_v47, %s2966_s6 }
0x10bc   :  { %963 = vrot.lane.b32.xlu1 %v957_v55, %s2965_s0 }
0x112d   :  { %v960_v51 = vpop.permute.xlu0 %959 }
0x112e   :  { %v964_v23 = vpop.permute.xlu1 %963 }
0x112f   :  { %v966_v25 = vsel %vm386_vm7, %v960_v51, %v964_v23 }
0x1130   :  { %v3362_v27 = vpack.c.bf16 %v966_v25, %v966_v25 }
0x1132   :  { %v969_v29 = vrot.slane %v3362_v27, 4  ;;  %2511 = vmatmul.mubr.msk.bf16.vlgmr.msra.gmra.mrb[24].mxu0 %vm281_vm9, %v3362_v27 }
0x1133   :  { %1287 = vmatprep.mubr.bf16.mxu0 %v2964_v0 }
0x1134   :  { %971 = vst.msk [vmem:[#allocation3 + $0x10] sm:$0xf0] %vm396_vm10, %v969_v29 }
0x1205   :  { %v1015_v31 = vpop.f32.mrb[24].mxu0 }
0x1206   :  { %v1022_v34 = vadd.f32 %v1015_v31, %v3175_v53  ;;  %v1017_v43 = vpop.f32.mrb[25].mxu0 }
0x1207   :  { %v1023_v46 = vadd.f32 %v1017_v43, %v3157_v28  ;;  %v1019_v48 = vpop.f32.mrb[26].mxu0 }
0x1208   :  { %v2512_v36 = vmul.f32 -1.442695, %v1022_v34  ;;  %v1020_v50 = vpop.f32.mrb[27].mxu0 }
0x1209   :  { %v2513_v33 = vmul.f32 -1.442695, %v1023_v46 }
0x120a   :  { %2754 = vpow2.f32 %v2512_v36 }
0x120b   :  { %2756 = vpow2.f32 %v2513_v33 }
0x120c   :  { %2758 = vtanh.f32 %v1022_v34 }
0x120d   :  { %2760 = vtanh.f32 %v1023_v46 }
0x1214   :  { %v2755_v38 = vpop.eup %2754 }
0x1215   :  { %v2757_v41 = vpop.eup %2756  ;;  %v1032_v44 = vadd.f32 1.0, %v2755_v38 }
0x1216   :  { %v1033_v52 = vadd.f32 1.0, %v2757_v41  ;;  %v2759_v42 = vpop.eup %2758 }
0x1217   :  { %2762 = vrcp.f32 %v1032_v44  ;;  %v2761_v4 = vpop.eup %2760 }
0x1218   :  { %2764 = vrcp.f32 %v1033_v52 }
0x1221   :  { %v2763_v53 = vpop.eup %2762 }
0x1222   :  { %v2765_v54 = vpop.eup %2764  ;;  %v1038_v28 = vsel %vm3181_vm3, %v2759_v42, %v2763_v53 }
0x1223   :  { %1042 = vrot.lane.b32.xlu0 %v1038_v28, %s2965_s0  ;;  %v1039_v60 = vsel %vm3188_vm6, %v2761_v4, %v2765_v54  ;;  %v1040_v9 = vmul.f32 %v1038_v28, %v934_v2 }
0x1224   :  { %1053 = vrot.lane.b32.xlu1 %v1039_v60, %s2965_s0  ;;  %v1051_v12 = vmul.f32 %v1039_v60, %v945_v26 }
0x1295   :  { %v1043_v61 = vpop.permute.xlu0 %1042 }
0x1296   :  { %v1045_v6 = vmul.f32 %v1043_v61, %v1038_v28  ;;  %v1054_v7 = vpop.permute.xlu1 %1053 }
0x1297   :  { %v1056_v8 = vmul.f32 %v1054_v7, %v1039_v60 }
0x1298   :  { %1047 = vrot.lane.b32.xlu0 %v1045_v6, %s2966_s6 }
0x1299   :  { %1058 = vrot.lane.b32.xlu1 %v1056_v8, %s2966_s6  ;;  %v2630_v8 = vld [vmem:[%s3754_s5] ss:$8 sps:$4 sm:$0xff]  }
0x130a   :  { %v1048_v10 = vpop.permute.xlu0 %1047 }
0x130b   :  { %v1050_v62 = vadd.f32 %v1048_v10, %v1040_v9  ;;  %v1059_v49 = vpop.permute.xlu1 %1058  ;;  %v2632_v9 = vld [vmem:[%s3754_s5 + $0x4] ss:$8 sps:$4 sm:$0xff]   ;;  %v855_v10 = vrot.slane %v3333_v40, 4 }
0x130c   :  { %v1061_v63 = vadd.f32 %v1059_v49, %v1051_v12  ;;  %1255 = vmatprep.subr.bf16.mxu0 %v2632_v9  ;;  %v624_v12 = vrot.slane %v3274_v59, 4  ;;  %v2633_v49 = vld [vmem:[%s3754_s5 + $0x10] ss:$8 sps:$4 sm:$0xff]   ;;  %v2638_v59 = vld [vmem:[%s3753_s4 + $0x4] ss:$8 sps:$4 sm:$0xff]  }
0x130d   :  { %2766 = vtanh.f32 %v1050_v62  ;;  %1256 = vmatpush1.bf16.msra.mxu0 %v2630_v8 }
0x130e   :  { %2768 = vtanh.f32 %v1061_v63 }
0x1317   :  { %v2767_v32 = vpop.eup %2766 }
0x1318   :  { %v2769_v1 = vpop.eup %2768  ;;  %1064 = vrot.lane.b32.xlu0 %v2767_v32, %s2965_s0 }
0x1319   :  { %1070 = vrot.lane.b32.xlu1 %v2769_v1, %s2965_s0 }
0x138a   :  { %v1065_v5 = vpop.permute.xlu0 %1064 }
0x138b   :  { %v1067_v11 = vmul.f32 %v1065_v5, %v1038_v28  ;;  %v1071_v13 = vpop.permute.xlu1 %1070 }
0x138c   :  { %v1073_v14 = vmul.f32 %v1071_v13, %v1039_v60 }
0x138d   :  { %1075 = vrot.lane.b32.xlu0 %v1067_v11, %s2966_s6 }
0x138e   :  { %1079 = vrot.lane.b32.xlu1 %v1073_v14, %s2965_s0 }
0x13ff   :  { %v1076_v18 = vpop.permute.xlu0 %1075 }
0x1400   :  { %v1080_v15 = vpop.permute.xlu1 %1079 }
0x1401   :  { %v1082_v21 = vsel %vm386_vm7, %v1076_v18, %v1080_v15  ;;  %v3436_v15 = vld [vmem:[%s3756_s7 + $0x4] ss:$8 sps:$4 sm:$0xff]  }
0x1402   :  { %v1083_v2 = vpack.c.bf16 %v1082_v21, %v1082_v21  ;;  %v3441_v21 = vld [vmem:[%s3756_s7] ss:$8 sps:$4 sm:$0xff]   ;;  %1527 = vmatprep.subr.bf16.mxu1 %v3436_v15 }
0x1404   :  { %1084 = vst.msk [vmem:[#allocation3 + $0x18] sm:$0xf] %vm389_vm8, %v1083_v2  ;;  %2514 = vmatmul.mubr.msk.bf16.vlgmr.msra.gmra.mrb[16].mxu1 %vm281_vm9, %v1083_v2  ;;  %v1086_v7 = vrot.slane %v1083_v2, 4  ;;  %v3463_v2 = vld [vmem:[%s3756_s7 + $0x24] ss:$8 sps:$4 sm:$0xff]  }
0x1405   :  { %1559 = vmatprep.mubr.bf16.mxu1 %v2964_v0  ;;  %1528 = vmatpush1.bf16.msra.mxu1 %v3441_v21 }
0x14d7   :  { %v1130_v45 = vpop.f32.mrb[16].mxu1 }
0x14d8   :  { %v1137_v26 = vadd.f32 %v1130_v45, %v3179_v58  ;;  %v1132_v37 = vpop.f32.mrb[17].mxu1  ;;  %v3473_v45 = vld [vmem:[%s3756_s7 + $0x34] ss:$8 sps:$4 sm:$0xff]  }
0x14d9   :  { %v1138_v35 = vadd.f32 %v1132_v37, %v3153_v24  ;;  %v1134_v22 = vpop.f32.mrb[18].mxu1 }
0x14da   :  { %v2515_v47 = vmul.f32 -1.442695, %v1137_v26  ;;  %v1135_v30 = vpop.f32.mrb[19].mxu1  ;;  %v2636_v22 = vld [vmem:[%s3753_s4] ss:$8 sps:$4 sm:$0xff]  }
0x14db   :  { %v2516_v55 = vmul.f32 -1.442695, %v1138_v35 }
0x14dc   :  { %2770 = vpow2.f32 %v2515_v47  ;;  %v2641_v47 = vld [vmem:[%s3753_s4 + $0x14] ss:$8 sps:$4 sm:$0xff]  }
0x14dd   :  { %2772 = vpow2.f32 %v2516_v55 }
0x14de   :  { %2774 = vtanh.f32 %v1137_v26  ;;  %v3480_v26 = vld [vmem:[%s3756_s7 + $0x30] ss:$8 sps:$4 sm:$0xff]  }
0x14df   :  { %2776 = vtanh.f32 %v1138_v35 }
0x14e6   :  { %v2771_v51 = vpop.eup %2770 }
0x14e7   :  { %v2773_v23 = vpop.eup %2772  ;;  %v1147_v25 = vadd.f32 1.0, %v2771_v51  ;;  %v2639_v51 = vld [vmem:[%s3753_s4 + $0x10] ss:$8 sps:$4 sm:$0xff]  }
0x14e8   :  { %v1148_v29 = vadd.f32 1.0, %v2773_v23  ;;  %v2775_v31 = vpop.eup %2774 }
0x14e9   :  { %2778 = vrcp.f32 %v1147_v25  ;;  %v2777_v34 = vpop.eup %2776 }
0x14ea   :  { %2780 = vrcp.f32 %v1148_v29 }
0x14f3   :  { %v2779_v58 = vpop.eup %2778 }
0x14f4   :  { %v2781_v43 = vpop.eup %2780  ;;  %v1153_v24 = vsel %vm3181_vm3, %v2775_v31, %v2779_v58  ;;  %v1208_v58 = vld [vmem:[#allocation3 + $0x8] sm:$0xff] }
0x14f5   :  { %1157 = vrot.lane.b32.xlu0 %v1153_v24, %s2965_s0  ;;  %v1154_v46 = vsel %vm3188_vm6, %v2777_v34, %v2781_v43  ;;  %v1155_v38 = vmul.f32 %v1153_v24, %v1050_v62  ;;  %v392_v62 = vrot.slane %v3205_v56, 4  ;;  %v1207_v34 = vld [vmem:[#allocation3] sm:$0xff]  ;;  %v1209_v43 = vld [vmem:[#allocation3 + $0x10] sm:$0xff] }
0x14f6   :  { %1168 = vrot.lane.b32.xlu1 %v1154_v46, %s2965_s0  ;;  %v1166_v44 = vmul.f32 %v1154_v46, %v1061_v63  ;;  %v2635_v63 = vld [vmem:[%s3754_s5 + $0x14] ss:$8 sps:$4 sm:$0xff]  }
0x14f7   :  { %1257 = vmatprep.subr.bf16.mxu0 %v2635_v63 }
0x14f8   :  { %1258 = vmatpush1.bf16.msra.mxu0 %v2633_v49 }
0x14f9   :  { %1360 = vmatprep.subr.bf16.mxu0 %v2638_v59 }
0x1567   :  { %v1158_v48 = vpop.permute.xlu0 %1157 }
0x1568   :  { %v1160_v36 = vmul.f32 %v1158_v48, %v1153_v24  ;;  %v1169_v50 = vpop.permute.xlu1 %1168 }
0x1569   :  { %v1171_v33 = vmul.f32 %v1169_v50, %v1154_v46 }
0x156a   :  { %1162 = vrot.lane.b32.xlu0 %v1160_v36, %s2966_s6 }
0x156b   :  { %1173 = vrot.lane.b32.xlu1 %v1171_v33, %s2966_s6  ;;  %v1433_v33 = vld [vmem:[#allocation7] sm:$0x3] }
0x15dc   :  { %v1163_v41 = vpop.permute.xlu0 %1162 }
0x15dd   :  { %v1165_v52 = vadd.f32 %v1163_v41, %v1155_v38  ;;  %v1174_v42 = vpop.permute.xlu1 %1173  ;;  %v1438_v38 = vrot.slane %v1433_v33, %v91_v19  ;;  %v1442_v41 = vrot.slane %v1433_v33, %v95_v17 }
0x15de   :  { %v1176_v4 = vadd.f32 %v1174_v42, %v1166_v44 }
0x15df   :  { %2782 = vtanh.f32 %v1165_v52 }
0x15e0   :  { %2784 = vtanh.f32 %v1176_v4 }
0x15e9   :  { %v2783_v53 = vpop.eup %2782 }
0x15ea   :  { %v2785_v54 = vpop.eup %2784  ;;  %1179 = vrot.lane.b32.xlu0 %v2783_v53, %s2965_s0 }
0x15eb   :  { %1185 = vrot.lane.b32.xlu1 %v2785_v54, %s2965_s0 }
0x165c   :  { %v1180_v28 = vpop.permute.xlu0 %1179 }
0x165d   :  { %v1182_v60 = vmul.f32 %v1180_v28, %v1153_v24  ;;  %v1186_v61 = vpop.permute.xlu1 %1185 }
0x165e   :  { %v1188_v6 = vmul.f32 %v1186_v61, %v1154_v46 }
0x165f   :  { %1190 = vrot.lane.b32.xlu0 %v1182_v60, %s2966_s6 }
0x1660   :  { %1194 = vrot.lane.b32.xlu1 %v1188_v6, %s2965_s0 }
0x1663   :  { %1087 = vrot.lane.b32.xlu0 %v1086_v7, %s2967_s24 }
0x1667   :  { %856 = vrot.lane.b32.xlu0 %v855_v10, %s2967_s24 }
0x166b   :  { %625 = vrot.lane.b32.xlu0 %v624_v12, %s2967_s24 }
0x166f   :  { %393 = vrot.lane.b32.xlu0 %v392_v62, %s2967_s24 }
0x16d1   :  { %v1191_v40 = vpop.permute.xlu0 %1190 }
0x16d2   :  { %v1195_v32 = vpop.permute.xlu1 %1194 }
0x16d3   :  { %v1197_v56 = vsel %vm386_vm7, %v1191_v40, %v1195_v32 }
0x16d4   :  { %v1198_v1 = vpack.c.bf16 %v1197_v56, %v1197_v56 }
0x16d5   :  { %v1088_v5 = vpop.permute.xlu0 %1087 }
0x16d6   :  { %v1200_v11 = vrot.slane %v1198_v1, 4  ;;  %1090 = vst.msk [vmem:[#allocation4] sm:$0xf0] %vm396_vm10, %v1088_v5  ;;  %1203 = vrot.lane.b32.xlu1 %v1198_v1, %s2967_s24 }
0x16d8   :  { %1202 = vst.msk [vmem:[#allocation3 + $0x18] sm:$0xf0] %vm396_vm10, %v1200_v11 }
0x16d9   :  { %v857_v13 = vpop.permute.xlu0 %856 }
0x16da   :  { %859 = vst.msk [vmem:[#allocation4 + $0x8] sm:$0xf0] %vm396_vm10, %v857_v13  ;;  %972 = vrot.lane.b32.xlu1 %v3362_v27, %s2967_s24  ;;  %v3446_v27 = vld [vmem:[%s3756_s7 + $0x14] ss:$8 sps:$4 sm:$0xff]  }
0x16db   :  { %1529 = vmatprep.subr.bf16.mxu1 %v3446_v27 }
0x16dd   :  { %v626_v14 = vpop.permute.xlu0 %625 }
0x16de   :  { %628 = vst.msk [vmem:[#allocation4 + $0x10] sm:$0xf0] %vm396_vm10, %v626_v14  ;;  %741 = vrot.lane.b32.xlu1 %v3304_v39, %s2967_s24  ;;  %v3456_v39 = vld [vmem:[%s3756_s7 + $0x10] ss:$8 sps:$4 sm:$0xff]  }
0x16df   :  { %1530 = vmatpush1.bf16.msra.mxu1 %v3456_v39  ;;  %v1210_v24 = vld [vmem:[#allocation3 + $0x18] sm:$0xff] }
0x16e0   :  { %1531 = vmatprep.subr.bf16.mxu1 %v3463_v2 }
0x16e1   :  { %v394_v18 = vpop.permute.xlu0 %393 }
0x16e2   :  { %397 = vst.msk [vmem:[#allocation4 + $0x18] sm:$0xf0] %vm396_vm10, %v394_v18  ;;  %510 = vrot.lane.b32.xlu1 %v3242_v57, %s2967_s24  ;;  %v3468_v57 = vld [vmem:[%s3756_s7 + $0x20] ss:$8 sps:$4 sm:$0xff]  }
0x16e3   :  { %1532 = vmatpush1.bf16.msra.mxu1 %v3468_v57 }
0x16e4   :  { %1533 = vmatprep.subr.bf16.mxu1 %v3473_v45 }
0x16e7   :  { %1534 = vmatpush1.bf16.msra.mxu1 %v3480_v26 }
0x16e8   :  { %1635 = vmatprep.subr.bf16.mxu1 %v3436_v15 }
0x16ea   :  { %1560 = vmatmul.mubr.bf16.vlgmr.msra.gmra.mrb[20].mxu1 %v2964_v0 }
0x16eb   :  { %1636 = vmatpush1.bf16.msra.mxu1 %v3441_v21  ;;  %1667 = vmatprep.mubr.bf16.mxu1 %v2964_v0 }
0x16ec   :  { %1637 = vmatprep.subr.bf16.mxu1 %v3446_v27 }
0x16ef   :  { %1638 = vmatpush1.bf16.msra.mxu1 %v3456_v39 }
0x16f0   :  { %1639 = vmatprep.subr.bf16.mxu1 %v3463_v2 }
0x16f3   :  { %1640 = vmatpush1.bf16.msra.mxu1 %v3468_v57 }
0x16f4   :  { %1641 = vmatprep.subr.bf16.mxu1 %v3473_v45 }
0x16f7   :  { %1642 = vmatpush1.bf16.msra.mxu1 %v3480_v26 }
0x16f8   :  { %1743 = vmatprep.subr.bf16.mxu1 %v3436_v15 }
0x1748   :  { %v1204_v37 = vpop.permute.xlu1 %1203 }
0x1749   :  { %1206 = vst.msk [vmem:[#allocation4] sm:$0xf] %vm389_vm8, %v1204_v37 }
0x174c   :  { %v973_v35 = vpop.permute.xlu1 %972 }
0x174d   :  { %975 = vst.msk [vmem:[#allocation4 + $0x8] sm:$0xf] %vm389_vm8, %v973_v35 }
0x1750   :  { %v742_v30 = vpop.permute.xlu1 %741  ;;  %v1215_v55 = vld [vmem:[#allocation4] sm:$0xff] }
0x1751   :  { %744 = vst.msk [vmem:[#allocation4 + $0x10] sm:$0xf] %vm389_vm8, %v742_v30  ;;  %2521 = vmatmul.mubr.msk.bf16.vlgmr.msra.gmra.mrb[28].mxu0 %vm386_vm7, %v1215_v55 }
0x1752   :  { %1361 = vmatpush1.bf16.msra.mxu0 %v2636_v22  ;;  %1297 = vmatprep.mubr.bf16.mxu0 %v2964_v0 }
0x1753   :  { %1362 = vmatprep.subr.bf16.mxu0 %v2641_v47 }
0x1754   :  { %v511_v23 = vpop.permute.xlu1 %510  ;;  %v1216_v25 = vld [vmem:[#allocation4 + $0x8] sm:$0xff] }
0x1755   :  { %513 = vst.msk [vmem:[#allocation4 + $0x18] sm:$0xf] %vm389_vm8, %v511_v23 }
0x1756   :  { %1363 = vmatpush1.bf16.msra.mxu0 %v2639_v51 }
0x1757   :  { %1851 = vmatprep.subr.bf16.mxu0 %v3436_v15 }
0x1758   :  { %v1217_v29 = vld [vmem:[#allocation4 + $0x10] sm:$0xff] }
0x1759   :  { %2522 = vmatmul.mubr.msk.bf16.gmra.mrb[32].mxu0 %vm386_vm7, %v1216_v25 }
0x175a   :  { %1307 = vmatprep.mubr.bf16.mxu0 %v2964_v0 }
0x175c   :  { %v1218_v31 = vld [vmem:[#allocation4 + $0x18] sm:$0xff] }
0x1761   :  { %2523 = vmatmul.mubr.msk.bf16.gmra.mrb[36].mxu0 %vm386_vm7, %v1217_v29 }
0x1762   :  { %1317 = vmatprep.mubr.bf16.mxu0 %v2964_v0 }
0x1769   :  { %2524 = vmatmul.mubr.msk.bf16.gmra.mrb[40].mxu0 %vm386_vm7, %v1218_v31 }
0x176a   :  { %1392 = vmatprep.mubr.bf16.mxu0 %v2964_v0 }
0x1771   :  { %2529 = vmatmul.mubr.msk.bf16.vlgmr.msra.gmra.mrb[28].mxu0 %vm386_vm7, %v1207_v34 }
0x1772   :  { %1402 = vmatprep.mubr.bf16.mxu0 %v2964_v0  ;;  %1852 = vmatpush1.bf16.msra.mxu0 %v3441_v21 }
0x1773   :  { %1853 = vmatprep.subr.bf16.mxu0 %v3446_v27 }
0x1776   :  { %1854 = vmatpush1.bf16.msra.mxu0 %v3456_v39 }
0x1777   :  { %1855 = vmatprep.subr.bf16.mxu0 %v3463_v2 }
0x1779   :  { %2530 = vmatmul.mubr.msk.bf16.gmra.mrb[32].mxu0 %vm386_vm7, %v1208_v58 }
0x177a   :  { %1412 = vmatprep.mubr.bf16.mxu0 %v2964_v0  ;;  %1856 = vmatpush1.bf16.msra.mxu0 %v3468_v57 }
0x177b   :  { %1857 = vmatprep.subr.bf16.mxu0 %v3473_v45 }
0x177e   :  { %1858 = vmatpush1.bf16.msra.mxu0 %v3480_v26 }
0x177f   :  { %2067 = vmatprep.subr.bf16.mxu0 %v3436_v15 }
0x1781   :  { %2531 = vmatmul.mubr.msk.bf16.gmra.mrb[36].mxu0 %vm386_vm7, %v1209_v43 }
0x1782   :  { %1422 = vmatprep.mubr.bf16.mxu0 %v2964_v0 }
0x1789   :  { %2532 = vmatmul.mubr.msk.bf16.gmra.mrb[40].mxu0 %vm386_vm7, %v1210_v24 }
0x178a   :  { %1883 = vmatprep.mubr.bf16.mxu0 %v2964_v0 }
0x17bd   :  { %v1561_v46 = vpop.f32.mrb[20].mxu1 }
0x17be   :  { %v1563_v48 = vpop.f32.mrb[21].mxu1 }
0x17bf   :  { %v1565_v36 = vpop.f32.mrb[22].mxu1 }
0x17c0   :  { %v1566_v50 = vpop.f32.mrb[23].mxu1 }
0x1844   :  { %v1394_v44 = vpop.f32.mrb[28].mxu0 }
0x1845   :  { %v1445_v52 = vadd.f32 %v1438_v38, %v1394_v44  ;;  %v1396_v42 = vpop.f32.mrb[29].mxu0 }
0x1846   :  { %v3537_v4 = vadd.f32 %v1442_v41, %v1396_v42  ;;  %v1398_v53 = vpop.f32.mrb[30].mxu0 }
0x1847   :  { %v3539_v54 = vadd.f32 %v1438_v38, %v1398_v53  ;;  %v1568_v28 = vadd.f32 %v1561_v46, %v1445_v52  ;;  %v1400_v60 = vpop.f32.mrb[31].mxu0 }
0x1848   :  { %v3541_v61 = vadd.f32 %v1442_v41, %v1400_v60 }
0x1849   :  { %v2541_v6 = vmul.f32 -1.442695, %v1568_v28 }
0x184b   :  { %2786 = vpow2.f32 %v2541_v6 }
0x184c   :  { %v1404_v7 = vpop.f32.mrb[32].mxu0  ;;  %2788 = vtanh.f32 %v1568_v28 }
0x184d   :  { %v3543_v8 = vadd.f32 %v1438_v38, %v1404_v7  ;;  %v1406_v19 = vpop.f32.mrb[33].mxu0 }
0x184e   :  { %v3545_v16 = vadd.f32 %v1442_v41, %v1406_v19  ;;  %v1408_v17 = vpop.f32.mrb[34].mxu0 }
0x184f   :  { %v3547_v9 = vadd.f32 %v1438_v38, %v1408_v17  ;;  %v1410_v10 = vpop.f32.mrb[35].mxu0 }
0x1850   :  { %v3549_v12 = vadd.f32 %v1442_v41, %v1410_v10 }
0x1854   :  { %v1414_v62 = vpop.f32.mrb[36].mxu0 }
0x1855   :  { %v2787_v49 = vpop.eup %2786  ;;  %v3551_v63 = vadd.f32 %v1438_v38, %v1414_v62  ;;  %v1416_v59 = vpop.f32.mrb[37].mxu0 }
0x1856   :  { %v1578_v40 = vadd.f32 1.0, %v2787_v49  ;;  %v3553_v32 = vadd.f32 %v1442_v41, %v1416_v59  ;;  %v1418_v56 = vpop.f32.mrb[38].mxu0  ;;  %v2789_v55 = vpop.eup %2788 }
0x1857   :  { %v3555_v1 = vadd.f32 %v1438_v38, %v1418_v56  ;;  %v1420_v5 = vpop.f32.mrb[39].mxu0 }
0x1858   :  { %2790 = vrcp.f32 %v1578_v40  ;;  %v3557_v11 = vadd.f32 %v1442_v41, %v1420_v5 }
0x185c   :  { %v1424_v13 = vpop.f32.mrb[40].mxu0 }
0x185d   :  { %v3559_v14 = vadd.f32 %v1438_v38, %v1424_v13  ;;  %v1426_v18 = vpop.f32.mrb[41].mxu0 }
0x185e   :  { %v1458_v37 = vadd.f32 %v1442_v41, %v1426_v18  ;;  %v1428_v35 = vpop.f32.mrb[42].mxu0 }
0x185f   :  { %v3561_v22 = vadd.f32 %v1438_v38, %v1428_v35  ;;  %v1430_v47 = vpop.f32.mrb[43].mxu0 }
0x1860   :  { %v1460_v30 = vadd.f32 %v1442_v41, %v1430_v47 }
0x1862   :  { %v2791_v51 = vpop.eup %2790  ;;  %v1569_v23 = vadd.f32 %v1563_v48, %v1460_v30 }
0x1863   :  { %v1584_v25 = vsel %vm3181_vm3, %v2789_v55, %v2791_v51 }
0x1864   :  { %v2542_v29 = vmul.f32 -1.442695, %v1569_v23  ;;  %1588 = vrot.lane.b32.xlu0 %v1584_v25, %s2965_s0  ;;  %v1586_v33 = vmul.f32 0.0, %v1584_v25 }
0x1866   :  { %2792 = vpow2.f32 %v2542_v29 }
0x1867   :  { %2794 = vtanh.f32 %v1569_v23 }
0x1870   :  { %v2793_v31 = vpop.eup %2792 }
0x1871   :  { %v1579_v34 = vadd.f32 1.0, %v2793_v31  ;;  %v2795_v58 = vpop.eup %2794 }
0x1873   :  { %2796 = vrcp.f32 %v1579_v34 }
0x187d   :  { %v2797_v43 = vpop.eup %2796 }
0x187e   :  { %v1585_v24 = vsel %vm3188_vm6, %v2795_v58, %v2797_v43 }
0x187f   :  { %1599 = vrot.lane.b32.xlu1 %v1585_v24, %s2965_s0  ;;  %v1597_v52 = vmul.f32 0.0, %v1585_v24 }
0x18d6   :  { %v1589_v46 = vpop.permute.xlu0 %1588 }
0x18d7   :  { %v1591_v48 = vmul.f32 %v1589_v46, %v1584_v25 }
0x18d9   :  { %1593 = vrot.lane.b32.xlu0 %v1591_v48, %s2966_s6 }
0x18f1   :  { %v1600_v36 = vpop.permute.xlu1 %1599 }
0x18f2   :  { %v1602_v50 = vmul.f32 %v1600_v36, %v1585_v24 }
0x18f4   :  { %1604 = vrot.lane.b32.xlu1 %v1602_v50, %s2966_s6 }
0x194b   :  { %v1594_v38 = vpop.permute.xlu0 %1593 }
0x194c   :  { %v1596_v41 = vadd.f32 %v1594_v38, %v1586_v33 }
0x194e   :  { %2798 = vtanh.f32 %v1596_v41 }
0x1958   :  { %v2799_v44 = vpop.eup %2798 }
0x1959   :  { %1610 = vrot.lane.b32.xlu0 %v2799_v44, %s2965_s0 }
0x1966   :  { %v1605_v42 = vpop.permute.xlu1 %1604 }
0x1967   :  { %v1607_v53 = vadd.f32 %v1605_v42, %v1597_v52 }
0x1969   :  { %2800 = vtanh.f32 %v1607_v53 }
0x1973   :  { %v2801_v28 = vpop.eup %2800 }
0x1974   :  { %1616 = vrot.lane.b32.xlu1 %v2801_v28, %s2965_s0 }
0x19cb   :  { %v1611_v60 = vpop.permute.xlu0 %1610 }
0x19cc   :  { %v1613_v6 = vmul.f32 %v1611_v60, %v1584_v25 }
0x19ce   :  { %1621 = vrot.lane.b32.xlu0 %v1613_v6, %s2966_s6 }
0x19e6   :  { %v1617_v7 = vpop.permute.xlu1 %1616 }
0x19e7   :  { %v1619_v19 = vmul.f32 %v1617_v7, %v1585_v24 }
0x19e9   :  { %1625 = vrot.lane.b32.xlu1 %v1619_v19, %s2965_s0 }
0x1a40   :  { %v1622_v17 = vpop.permute.xlu0 %1621 }
0x1a5b   :  { %v1626_v10 = vpop.permute.xlu1 %1625 }
0x1a5c   :  { %v1628_v62 = vsel %vm386_vm7, %v1622_v17, %v1626_v10 }
0x1a5d   :  { %v1629_v49 = vpack.c.bf16 %v1628_v62, %v1628_v62 }
0x1a5f   :  { %2543 = vmatmul.mubr.msk.bf16.vlgmr.msra.gmra.mrb[24].mxu1 %vm281_vm9, %v1629_v49 }
0x1a60   :  { %1744 = vmatpush1.bf16.msra.mxu1 %v3441_v21  ;;  %1775 = vmatprep.mubr.bf16.mxu1 %v2964_v0 }
0x1a61   :  { %1745 = vmatprep.subr.bf16.mxu1 %v3446_v27 }
0x1a64   :  { %1746 = vmatpush1.bf16.msra.mxu1 %v3456_v39 }
0x1a65   :  { %1747 = vmatprep.subr.bf16.mxu1 %v3463_v2 }
0x1a68   :  { %1748 = vmatpush1.bf16.msra.mxu1 %v3468_v57 }
0x1a69   :  { %1749 = vmatprep.subr.bf16.mxu1 %v3473_v45 }
0x1a6c   :  { %1750 = vmatpush1.bf16.msra.mxu1 %v3480_v26 }
0x1a6d   :  { %1959 = vmatprep.subr.bf16.mxu1 %v3436_v15 }
0x1b32   :  { %v1669_v59 = vpop.f32.mrb[24].mxu1 }
0x1b33   :  { %v1676_v40 = vadd.f32 %v1669_v59, %v3539_v54  ;;  %v1671_v56 = vpop.f32.mrb[25].mxu1 }
0x1b34   :  { %v1677_v5 = vadd.f32 %v1671_v56, %v1458_v37  ;;  %v1673_v13 = vpop.f32.mrb[26].mxu1 }
0x1b35   :  { %v2544_v18 = vmul.f32 -1.442695, %v1676_v40  ;;  %v1674_v35 = vpop.f32.mrb[27].mxu1 }
0x1b36   :  { %v2545_v47 = vmul.f32 -1.442695, %v1677_v5 }
0x1b37   :  { %2802 = vpow2.f32 %v2544_v18 }
0x1b38   :  { %2804 = vpow2.f32 %v2545_v47 }
0x1b39   :  { %2806 = vtanh.f32 %v1676_v40 }
0x1b3a   :  { %2808 = vtanh.f32 %v1677_v5 }
0x1b41   :  { %v2803_v30 = vpop.eup %2802 }
0x1b42   :  { %v2805_v55 = vpop.eup %2804  ;;  %v1686_v51 = vadd.f32 1.0, %v2803_v30 }
0x1b43   :  { %v1687_v23 = vadd.f32 1.0, %v2805_v55  ;;  %v2807_v25 = vpop.eup %2806 }
0x1b44   :  { %2810 = vrcp.f32 %v1686_v51  ;;  %v2809_v29 = vpop.eup %2808 }
0x1b45   :  { %2812 = vrcp.f32 %v1687_v23 }
0x1b4e   :  { %v2811_v31 = vpop.eup %2810 }
0x1b4f   :  { %v2813_v54 = vpop.eup %2812  ;;  %v1692_v37 = vsel %vm3181_vm3, %v2807_v25, %v2811_v31 }
0x1b50   :  { %1696 = vrot.lane.b32.xlu0 %v1692_v37, %s2965_s0  ;;  %v1693_v34 = vsel %vm3188_vm6, %v2809_v29, %v2813_v54  ;;  %v1694_v48 = vmul.f32 %v1692_v37, %v1596_v41 }
0x1b51   :  { %1707 = vrot.lane.b32.xlu1 %v1693_v34, %s2965_s0  ;;  %v1705_v50 = vmul.f32 %v1693_v34, %v1607_v53 }
0x1bc2   :  { %v1697_v58 = vpop.permute.xlu0 %1696 }
0x1bc3   :  { %v1699_v43 = vmul.f32 %v1697_v58, %v1692_v37  ;;  %v1708_v24 = vpop.permute.xlu1 %1707 }
0x1bc4   :  { %v1710_v46 = vmul.f32 %v1708_v24, %v1693_v34 }
0x1bc5   :  { %1701 = vrot.lane.b32.xlu0 %v1699_v43, %s2966_s6 }
0x1bc6   :  { %1712 = vrot.lane.b32.xlu1 %v1710_v46, %s2966_s6 }
0x1c37   :  { %v1702_v36 = vpop.permute.xlu0 %1701 }
0x1c38   :  { %v1704_v33 = vadd.f32 %v1702_v36, %v1694_v48  ;;  %v1713_v38 = vpop.permute.xlu1 %1712 }
0x1c39   :  { %v1715_v44 = vadd.f32 %v1713_v38, %v1705_v50 }
0x1c3a   :  { %2814 = vtanh.f32 %v1704_v33 }
0x1c3b   :  { %2816 = vtanh.f32 %v1715_v44 }
0x1c44   :  { %v2815_v52 = vpop.eup %2814 }
0x1c45   :  { %v2817_v42 = vpop.eup %2816  ;;  %1718 = vrot.lane.b32.xlu0 %v2815_v52, %s2965_s0 }
0x1c46   :  { %1724 = vrot.lane.b32.xlu1 %v2817_v42, %s2965_s0 }
0x1cb7   :  { %v1719_v28 = vpop.permute.xlu0 %1718 }
0x1cb8   :  { %v1721_v60 = vmul.f32 %v1719_v28, %v1692_v37  ;;  %v1725_v6 = vpop.permute.xlu1 %1724 }
0x1cb9   :  { %v1727_v7 = vmul.f32 %v1725_v6, %v1693_v34 }
0x1cba   :  { %1729 = vrot.lane.b32.xlu0 %v1721_v60, %s2966_s6 }
0x1cbb   :  { %1733 = vrot.lane.b32.xlu1 %v1727_v7, %s2965_s0 }
0x1d2c   :  { %v1730_v41 = vpop.permute.xlu0 %1729 }
0x1d2d   :  { %v1734_v53 = vpop.permute.xlu1 %1733 }
0x1d2e   :  { %v1736_v19 = vsel %vm386_vm7, %v1730_v41, %v1734_v53 }
0x1d2f   :  { %v1737_v17 = vpack.c.bf16 %v1736_v19, %v1736_v19 }
0x1d31   :  { %2546 = vmatmul.mubr.msk.bf16.vlgmr.msra.gmra.mrb[28].mxu1 %vm281_vm9, %v1737_v17 }
0x1d32   :  { %1960 = vmatpush1.bf16.msra.mxu1 %v3441_v21  ;;  %1991 = vmatprep.mubr.bf16.mxu1 %v2964_v0 }
0x1d33   :  { %1961 = vmatprep.subr.bf16.mxu1 %v3446_v27 }
0x1d36   :  { %1962 = vmatpush1.bf16.msra.mxu1 %v3456_v39 }
0x1d37   :  { %1963 = vmatprep.subr.bf16.mxu1 %v3463_v2 }
0x1d3a   :  { %1964 = vmatpush1.bf16.msra.mxu1 %v3468_v57 }
0x1d3b   :  { %1965 = vmatprep.subr.bf16.mxu1 %v3473_v45 }
0x1d3e   :  { %1966 = vmatpush1.bf16.msra.mxu1 %v3480_v26 }
0x1d3f   :  { %2175 = vmatprep.subr.bf16.mxu1 %v3436_v15 }
0x1e04   :  { %v1777_v10 = vpop.f32.mrb[28].mxu1 }
0x1e05   :  { %v1784_v62 = vadd.f32 %v1777_v10, %v3543_v8  ;;  %v1779_v49 = vpop.f32.mrb[29].mxu1 }
0x1e06   :  { %v1785_v59 = vadd.f32 %v1779_v49, %v3557_v11  ;;  %v1781_v40 = vpop.f32.mrb[30].mxu1 }
0x1e07   :  { %v2547_v56 = vmul.f32 -1.442695, %v1784_v62  ;;  %v1782_v5 = vpop.f32.mrb[31].mxu1 }
0x1e08   :  { %v2548_v13 = vmul.f32 -1.442695, %v1785_v59 }
0x1e09   :  { %2818 = vpow2.f32 %v2547_v56 }
0x1e0a   :  { %2820 = vpow2.f32 %v2548_v13 }
0x1e0b   :  { %2822 = vtanh.f32 %v1784_v62 }
0x1e0c   :  { %2824 = vtanh.f32 %v1785_v59 }
0x1e13   :  { %v2819_v18 = vpop.eup %2818 }
0x1e14   :  { %v2821_v35 = vpop.eup %2820  ;;  %v1794_v47 = vadd.f32 1.0, %v2819_v18 }
0x1e15   :  { %v1795_v30 = vadd.f32 1.0, %v2821_v35  ;;  %v2823_v55 = vpop.eup %2822 }
0x1e16   :  { %2826 = vrcp.f32 %v1794_v47  ;;  %v2825_v51 = vpop.eup %2824 }
0x1e17   :  { %2828 = vrcp.f32 %v1795_v30 }
0x1e20   :  { %v2827_v8 = vpop.eup %2826 }
0x1e21   :  { %v2829_v23 = vpop.eup %2828  ;;  %v1800_v11 = vsel %vm3181_vm3, %v2823_v55, %v2827_v8 }
0x1e22   :  { %1804 = vrot.lane.b32.xlu0 %v1800_v11, %s2965_s0  ;;  %v1801_v25 = vsel %vm3188_vm6, %v2825_v51, %v2829_v23  ;;  %v1802_v34 = vmul.f32 %v1800_v11, %v1704_v33 }
0x1e23   :  { %1815 = vrot.lane.b32.xlu1 %v1801_v25, %s2965_s0  ;;  %v1813_v43 = vmul.f32 %v1801_v25, %v1715_v44 }
0x1e94   :  { %v1805_v29 = vpop.permute.xlu0 %1804 }
0x1e95   :  { %v1807_v31 = vmul.f32 %v1805_v29, %v1800_v11  ;;  %v1816_v54 = vpop.permute.xlu1 %1815 }
0x1e96   :  { %v1818_v37 = vmul.f32 %v1816_v54, %v1801_v25 }
0x1e97   :  { %1809 = vrot.lane.b32.xlu0 %v1807_v31, %s2966_s6 }
0x1e98   :  { %1820 = vrot.lane.b32.xlu1 %v1818_v37, %s2966_s6 }
0x1f09   :  { %v1810_v58 = vpop.permute.xlu0 %1809 }
0x1f0a   :  { %v1812_v24 = vadd.f32 %v1810_v58, %v1802_v34  ;;  %v1821_v46 = vpop.permute.xlu1 %1820 }
0x1f0b   :  { %v1823_v48 = vadd.f32 %v1821_v46, %v1813_v43 }
0x1f0c   :  { %2830 = vtanh.f32 %v1812_v24 }
0x1f0d   :  { %2832 = vtanh.f32 %v1823_v48 }
0x1f16   :  { %v2831_v36 = vpop.eup %2830 }
0x1f17   :  { %v2833_v50 = vpop.eup %2832  ;;  %1826 = vrot.lane.b32.xlu0 %v2831_v36, %s2965_s0 }
0x1f18   :  { %1832 = vrot.lane.b32.xlu1 %v2833_v50, %s2965_s0 }
0x1f89   :  { %v1827_v38 = vpop.permute.xlu0 %1826 }
0x1f8a   :  { %v1829_v52 = vmul.f32 %v1827_v38, %v1800_v11  ;;  %v1833_v42 = vpop.permute.xlu1 %1832 }
0x1f8b   :  { %v1835_v28 = vmul.f32 %v1833_v42, %v1801_v25 }
0x1f8c   :  { %1837 = vrot.lane.b32.xlu0 %v1829_v52, %s2966_s6 }
0x1f8d   :  { %1841 = vrot.lane.b32.xlu1 %v1835_v28, %s2965_s0 }
0x1ffe   :  { %v1838_v33 = vpop.permute.xlu0 %1837 }
0x1fff   :  { %v1842_v44 = vpop.permute.xlu1 %1841 }
0x2000   :  { %v1844_v60 = vsel %vm386_vm7, %v1838_v33, %v1842_v44 }
0x2001   :  { %v1845_v6 = vpack.c.bf16 %v1844_v60, %v1844_v60 }
0x2003   :  { %2549 = vmatmul.mubr.msk.bf16.vlgmr.msra.gmra.mrb[44].mxu0 %vm281_vm9, %v1845_v6 }
0x2004   :  { %2068 = vmatpush1.bf16.msra.mxu0 %v3441_v21  ;;  %2099 = vmatprep.mubr.bf16.mxu0 %v2964_v0 }
0x2005   :  { %2069 = vmatprep.subr.bf16.mxu0 %v3446_v27 }
0x2008   :  { %2070 = vmatpush1.bf16.msra.mxu0 %v3456_v39 }
0x2009   :  { %2071 = vmatprep.subr.bf16.mxu0 %v3463_v2 }
0x200c   :  { %2072 = vmatpush1.bf16.msra.mxu0 %v3468_v57 }
0x200d   :  { %2073 = vmatprep.subr.bf16.mxu0 %v3473_v45 }
0x2010   :  { %2074 = vmatpush1.bf16.msra.mxu0 %v3480_v26 }
0x2011   :  { %2283 = vmatprep.subr.bf16.mxu0 %v3436_v15 }
0x20d6   :  { %v1885_v7 = vpop.f32.mrb[44].mxu0 }
0x20d7   :  { %v1892_v41 = vadd.f32 %v1885_v7, %v3547_v9  ;;  %v1887_v53 = vpop.f32.mrb[45].mxu0 }
0x20d8   :  { %v1893_v19 = vadd.f32 %v1887_v53, %v3553_v32  ;;  %v1889_v17 = vpop.f32.mrb[46].mxu0 }
0x20d9   :  { %v2550_v10 = vmul.f32 -1.442695, %v1892_v41  ;;  %v1890_v62 = vpop.f32.mrb[47].mxu0 }
0x20da   :  { %v2551_v49 = vmul.f32 -1.442695, %v1893_v19 }
0x20db   :  { %2834 = vpow2.f32 %v2550_v10 }
0x20dc   :  { %2836 = vpow2.f32 %v2551_v49 }
0x20dd   :  { %2838 = vtanh.f32 %v1892_v41 }
0x20de   :  { %2840 = vtanh.f32 %v1893_v19 }
0x20e5   :  { %v2835_v59 = vpop.eup %2834 }
0x20e6   :  { %v2837_v40 = vpop.eup %2836  ;;  %v1902_v56 = vadd.f32 1.0, %v2835_v59 }
0x20e7   :  { %v1903_v5 = vadd.f32 1.0, %v2837_v40  ;;  %v2839_v15 = vpop.eup %2838 }
0x20e8   :  { %2842 = vrcp.f32 %v1902_v56  ;;  %v2841_v13 = vpop.eup %2840 }
0x20e9   :  { %2844 = vrcp.f32 %v1903_v5 }
0x20f2   :  { %v2843_v9 = vpop.eup %2842 }
0x20f3   :  { %v2845_v18 = vpop.eup %2844  ;;  %v1908_v32 = vsel %vm3181_vm3, %v2839_v15, %v2843_v9 }
0x20f4   :  { %1912 = vrot.lane.b32.xlu0 %v1908_v32, %s2965_s0  ;;  %v1909_v35 = vsel %vm3188_vm6, %v2841_v13, %v2845_v18  ;;  %v1910_v8 = vmul.f32 %v1908_v32, %v1812_v24 }
0x20f5   :  { %1923 = vrot.lane.b32.xlu1 %v1909_v35, %s2965_s0  ;;  %v1921_v11 = vmul.f32 %v1909_v35, %v1823_v48 }
0x2166   :  { %v1913_v47 = vpop.permute.xlu0 %1912 }
0x2167   :  { %v1915_v30 = vmul.f32 %v1913_v47, %v1908_v32  ;;  %v1924_v55 = vpop.permute.xlu1 %1923 }
0x2168   :  { %v1926_v51 = vmul.f32 %v1924_v55, %v1909_v35 }
0x2169   :  { %1917 = vrot.lane.b32.xlu0 %v1915_v30, %s2966_s6 }
0x216a   :  { %1928 = vrot.lane.b32.xlu1 %v1926_v51, %s2966_s6 }
0x21db   :  { %v1918_v23 = vpop.permute.xlu0 %1917 }
0x21dc   :  { %v1920_v25 = vadd.f32 %v1918_v23, %v1910_v8  ;;  %v1929_v29 = vpop.permute.xlu1 %1928 }
0x21dd   :  { %v1931_v31 = vadd.f32 %v1929_v29, %v1921_v11 }
0x21de   :  { %2846 = vtanh.f32 %v1920_v25 }
0x21df   :  { %2848 = vtanh.f32 %v1931_v31 }
0x21e8   :  { %v2847_v54 = vpop.eup %2846 }
0x21e9   :  { %v2849_v37 = vpop.eup %2848  ;;  %1934 = vrot.lane.b32.xlu0 %v2847_v54, %s2965_s0 }
0x21ea   :  { %1940 = vrot.lane.b32.xlu1 %v2849_v37, %s2965_s0 }
0x225b   :  { %v1935_v34 = vpop.permute.xlu0 %1934 }
0x225c   :  { %v1937_v58 = vmul.f32 %v1935_v34, %v1908_v32  ;;  %v1941_v43 = vpop.permute.xlu1 %1940 }
0x225d   :  { %v1943_v46 = vmul.f32 %v1941_v43, %v1909_v35 }
0x225e   :  { %1945 = vrot.lane.b32.xlu0 %v1937_v58, %s2966_s6 }
0x225f   :  { %1949 = vrot.lane.b32.xlu1 %v1943_v46, %s2965_s0 }
0x22d0   :  { %v1946_v24 = vpop.permute.xlu0 %1945 }
0x22d1   :  { %v1950_v48 = vpop.permute.xlu1 %1949 }
0x22d2   :  { %v1952_v36 = vsel %vm386_vm7, %v1946_v24, %v1950_v48 }
0x22d3   :  { %v1953_v50 = vpack.c.bf16 %v1952_v36, %v1952_v36 }
0x22d5   :  { %2552 = vmatmul.mubr.msk.bf16.vlgmr.msra.gmra.mrb[32].mxu1 %vm281_vm9, %v1953_v50 }
0x22d6   :  { %2176 = vmatpush1.bf16.msra.mxu1 %v3441_v21  ;;  %2207 = vmatprep.mubr.bf16.mxu1 %v2964_v0 }
0x22d7   :  { %2177 = vmatprep.subr.bf16.mxu1 %v3446_v27 }
0x22da   :  { %2178 = vmatpush1.bf16.msra.mxu1 %v3456_v39 }
0x22db   :  { %2179 = vmatprep.subr.bf16.mxu1 %v3463_v2 }
0x22de   :  { %2180 = vmatpush1.bf16.msra.mxu1 %v3468_v57 }
0x22df   :  { %2181 = vmatprep.subr.bf16.mxu1 %v3473_v45 }
0x22e2   :  { %2182 = vmatpush1.bf16.msra.mxu1 %v3480_v26 }
0x23a8   :  { %v1993_v38 = vpop.f32.mrb[32].mxu1 }
0x23a9   :  { %v2000_v52 = vadd.f32 %v1993_v38, %v3551_v63  ;;  %v1995_v42 = vpop.f32.mrb[33].mxu1 }
0x23aa   :  { %v2001_v28 = vadd.f32 %v1995_v42, %v3549_v12  ;;  %v1997_v33 = vpop.f32.mrb[34].mxu1 }
0x23ab   :  { %v2553_v44 = vmul.f32 -1.442695, %v2000_v52  ;;  %v1998_v60 = vpop.f32.mrb[35].mxu1 }
0x23ac   :  { %v2554_v6 = vmul.f32 -1.442695, %v2001_v28 }
0x23ad   :  { %2850 = vpow2.f32 %v2553_v44 }
0x23ae   :  { %2852 = vpow2.f32 %v2554_v6 }
0x23af   :  { %2854 = vtanh.f32 %v2000_v52 }
0x23b0   :  { %2856 = vtanh.f32 %v2001_v28 }
0x23b7   :  { %v2851_v7 = vpop.eup %2850 }
0x23b8   :  { %v2853_v41 = vpop.eup %2852  ;;  %v2010_v53 = vadd.f32 1.0, %v2851_v7 }
0x23b9   :  { %v2011_v19 = vadd.f32 1.0, %v2853_v41  ;;  %v2855_v17 = vpop.eup %2854 }
0x23ba   :  { %2858 = vrcp.f32 %v2010_v53  ;;  %v2857_v10 = vpop.eup %2856 }
0x23bb   :  { %2860 = vrcp.f32 %v2011_v19 }
0x23c4   :  { %v2859_v63 = vpop.eup %2858 }
0x23c5   :  { %v2861_v62 = vpop.eup %2860  ;;  %v2016_v12 = vsel %vm3181_vm3, %v2855_v17, %v2859_v63 }
0x23c6   :  { %2020 = vrot.lane.b32.xlu0 %v2016_v12, %s2965_s0  ;;  %v2017_v49 = vsel %vm3188_vm6, %v2857_v10, %v2861_v62  ;;  %v2018_v15 = vmul.f32 %v2016_v12, %v1920_v25 }
0x23c7   :  { %2031 = vrot.lane.b32.xlu1 %v2017_v49, %s2965_s0  ;;  %v2029_v9 = vmul.f32 %v2017_v49, %v1931_v31 }
0x2438   :  { %v2021_v59 = vpop.permute.xlu0 %2020 }
0x2439   :  { %v2023_v40 = vmul.f32 %v2021_v59, %v2016_v12  ;;  %v2032_v56 = vpop.permute.xlu1 %2031 }
0x243a   :  { %v2034_v5 = vmul.f32 %v2032_v56, %v2017_v49 }
0x243b   :  { %2025 = vrot.lane.b32.xlu0 %v2023_v40, %s2966_s6 }
0x243c   :  { %2036 = vrot.lane.b32.xlu1 %v2034_v5, %s2966_s6 }
0x24ad   :  { %v2026_v13 = vpop.permute.xlu0 %2025 }
0x24ae   :  { %v2028_v18 = vadd.f32 %v2026_v13, %v2018_v15  ;;  %v2037_v32 = vpop.permute.xlu1 %2036 }
0x24af   :  { %v2039_v35 = vadd.f32 %v2037_v32, %v2029_v9 }
0x24b0   :  { %2862 = vtanh.f32 %v2028_v18 }
0x24b1   :  { %2864 = vtanh.f32 %v2039_v35 }
0x24ba   :  { %v2863_v47 = vpop.eup %2862 }
0x24bb   :  { %v2865_v30 = vpop.eup %2864  ;;  %2042 = vrot.lane.b32.xlu0 %v2863_v47, %s2965_s0 }
0x24bc   :  { %2048 = vrot.lane.b32.xlu1 %v2865_v30, %s2965_s0 }
0x252d   :  { %v2043_v55 = vpop.permute.xlu0 %2042 }
0x252e   :  { %v2045_v51 = vmul.f32 %v2043_v55, %v2016_v12  ;;  %v2049_v8 = vpop.permute.xlu1 %2048 }
0x252f   :  { %v2051_v23 = vmul.f32 %v2049_v8, %v2017_v49 }
0x2530   :  { %2053 = vrot.lane.b32.xlu0 %v2045_v51, %s2966_s6 }
0x2531   :  { %2057 = vrot.lane.b32.xlu1 %v2051_v23, %s2965_s0 }
0x25a2   :  { %v2054_v11 = vpop.permute.xlu0 %2053 }
0x25a3   :  { %v2058_v25 = vpop.permute.xlu1 %2057 }
0x25a4   :  { %v2060_v29 = vsel %vm386_vm7, %v2054_v11, %v2058_v25 }
0x25a5   :  { %v2061_v31 = vpack.c.bf16 %v2060_v29, %v2060_v29 }
0x25a7   :  { %2555 = vmatmul.mubr.msk.bf16.vlgmr.msra.gmra.mrb[48].mxu0 %vm281_vm9, %v2061_v31 }
0x25a8   :  { %2284 = vmatpush1.bf16.msra.mxu0 %v3441_v21  ;;  %2315 = vmatprep.mubr.bf16.mxu0 %v2964_v0 }
0x25a9   :  { %2285 = vmatprep.subr.bf16.mxu0 %v3446_v27 }
0x25ac   :  { %2286 = vmatpush1.bf16.msra.mxu0 %v3456_v39 }
0x25ad   :  { %2287 = vmatprep.subr.bf16.mxu0 %v3463_v2 }
0x25b0   :  { %2288 = vmatpush1.bf16.msra.mxu0 %v3468_v57 }
0x25b1   :  { %2289 = vmatprep.subr.bf16.mxu0 %v3473_v45 }
0x25b4   :  { %2290 = vmatpush1.bf16.msra.mxu0 %v3480_v26 }
0x267a   :  { %v2101_v54 = vpop.f32.mrb[48].mxu0 }
0x267b   :  { %v2108_v37 = vadd.f32 %v2101_v54, %v3555_v1  ;;  %v2103_v34 = vpop.f32.mrb[49].mxu0 }
0x267c   :  { %v2109_v21 = vadd.f32 %v2103_v34, %v3545_v16  ;;  %v2105_v58 = vpop.f32.mrb[50].mxu0 }
0x267d   :  { %v2556_v0 = vmul.f32 -1.442695, %v2108_v37  ;;  %v2106_v43 = vpop.f32.mrb[51].mxu0 }
0x267e   :  { %v2557_v27 = vmul.f32 -1.442695, %v2109_v21 }
0x267f   :  { %2866 = vpow2.f32 %v2556_v0 }
0x2680   :  { %2868 = vpow2.f32 %v2557_v27 }
0x2681   :  { %2870 = vtanh.f32 %v2108_v37 }
0x2682   :  { %2872 = vtanh.f32 %v2109_v21 }
0x2689   :  { %v2867_v39 = vpop.eup %2866 }
0x268a   :  { %v2869_v2 = vpop.eup %2868  ;;  %v2118_v57 = vadd.f32 1.0, %v2867_v39 }
0x268b   :  { %v2119_v45 = vadd.f32 1.0, %v2869_v2  ;;  %v2871_v26 = vpop.eup %2870 }
0x268c   :  { %2874 = vrcp.f32 %v2118_v57  ;;  %v2873_v46 = vpop.eup %2872 }
0x268d   :  { %2876 = vrcp.f32 %v2119_v45 }
0x2696   :  { %v2875_v1 = vpop.eup %2874 }
0x2697   :  { %v2877_v24 = vpop.eup %2876  ;;  %v2124_v16 = vsel %vm3181_vm3, %v2871_v26, %v2875_v1 }
0x2698   :  { %2128 = vrot.lane.b32.xlu0 %v2124_v16, %s2965_s0  ;;  %v2125_v48 = vsel %vm3188_vm6, %v2873_v46, %v2877_v24  ;;  %v2126_v42 = vmul.f32 %v2124_v16, %v2028_v18 }
0x2699   :  { %2139 = vrot.lane.b32.xlu1 %v2125_v48, %s2965_s0  ;;  %v2137_v33 = vmul.f32 %v2125_v48, %v2039_v35 }
0x270a   :  { %v2129_v36 = vpop.permute.xlu0 %2128 }
0x270b   :  { %v2131_v50 = vmul.f32 %v2129_v36, %v2124_v16  ;;  %v2140_v38 = vpop.permute.xlu1 %2139 }
0x270c   :  { %v2142_v52 = vmul.f32 %v2140_v38, %v2125_v48 }
0x270d   :  { %2133 = vrot.lane.b32.xlu0 %v2131_v50, %s2966_s6 }
0x270e   :  { %2144 = vrot.lane.b32.xlu1 %v2142_v52, %s2966_s6 }
0x277f   :  { %v2134_v28 = vpop.permute.xlu0 %2133 }
0x2780   :  { %v2136_v44 = vadd.f32 %v2134_v28, %v2126_v42  ;;  %v2145_v60 = vpop.permute.xlu1 %2144 }
0x2781   :  { %v2147_v6 = vadd.f32 %v2145_v60, %v2137_v33 }
0x2782   :  { %2878 = vtanh.f32 %v2136_v44 }
0x2783   :  { %2880 = vtanh.f32 %v2147_v6 }
0x278c   :  { %v2879_v7 = vpop.eup %2878 }
0x278d   :  { %v2881_v41 = vpop.eup %2880  ;;  %2150 = vrot.lane.b32.xlu0 %v2879_v7, %s2965_s0 }
0x278e   :  { %2156 = vrot.lane.b32.xlu1 %v2881_v41, %s2965_s0 }
0x27ff   :  { %v2151_v53 = vpop.permute.xlu0 %2150 }
0x2800   :  { %v2153_v19 = vmul.f32 %v2151_v53, %v2124_v16  ;;  %v2157_v17 = vpop.permute.xlu1 %2156 }
0x2801   :  { %v2159_v10 = vmul.f32 %v2157_v17, %v2125_v48 }
0x2802   :  { %2161 = vrot.lane.b32.xlu0 %v2153_v19, %s2966_s6 }
0x2803   :  { %2165 = vrot.lane.b32.xlu1 %v2159_v10, %s2965_s0 }
0x2874   :  { %v2162_v63 = vpop.permute.xlu0 %2161 }
0x2875   :  { %v2166_v62 = vpop.permute.xlu1 %2165 }
0x2876   :  { %v2168_v12 = vsel %vm386_vm7, %v2162_v63, %v2166_v62 }
0x2877   :  { %v2169_v49 = vpack.c.bf16 %v2168_v12, %v2168_v12 }
0x2879   :  { %2558 = vmatmul.mubr.msk.bf16.vlgmr.msra.gmra.mrb[36].mxu1 %vm281_vm9, %v2169_v49 }
0x294c   :  { %v2209_v59 = vpop.f32.mrb[36].mxu1 }
0x294d   :  { %v2216_v40 = vadd.f32 %v2209_v59, %v3559_v14  ;;  %v2211_v56 = vpop.f32.mrb[37].mxu1 }
0x294e   :  { %v2217_v5 = vadd.f32 %v2211_v56, %v3541_v61  ;;  %v2213_v15 = vpop.f32.mrb[38].mxu1 }
0x294f   :  { %v2559_v13 = vmul.f32 -1.442695, %v2216_v40  ;;  %v2214_v9 = vpop.f32.mrb[39].mxu1  ;;  %v2655_v15 = vld [vmem:[%s3757_s8 + $0x8] sm:$0xff]  }
0x2950   :  { %v2560_v18 = vmul.f32 -1.442695, %v2217_v5 }
0x2951   :  { %2882 = vpow2.f32 %v2559_v13  ;;  %v2656_v13 = vld [vmem:[%s3757_s8 + $0x10] sm:$0xff]  }
0x2952   :  { %2884 = vpow2.f32 %v2560_v18 }
0x2953   :  { %2886 = vtanh.f32 %v2216_v40 }
0x2954   :  { %2888 = vtanh.f32 %v2217_v5  ;;  %v2968_v5 = vmov 0.0  }
0x2955   :  { %2575 = vmatprep.subr.bf16.mxu1 %v2968_v5  ;;  %2583 = vmatprep.mubr.msk.bf16.mxu1 %vm2969_vm11, %v2968_v5 }
0x2956   :  { %2576 = vmatpush3.bf16.msra.mxu1 %v2654_v20 }
0x2957   :  { %2577 = vmatprep.subr.bf16.mxu1 %v2968_v5 }
0x295a   :  { %2578 = vmatpush3.bf16.msra.mxu1 %v2655_v15 }
0x295b   :  { %v2883_v32 = vpop.eup %2882  ;;  %2579 = vmatprep.subr.bf16.mxu1 %v2968_v5 }
0x295c   :  { %v2885_v35 = vpop.eup %2884  ;;  %v2226_v47 = vadd.f32 1.0, %v2883_v32  ;;  %v2657_v32 = vld [vmem:[%s3757_s8 + $0x18] sm:$0xff]  }
0x295d   :  { %v2227_v30 = vadd.f32 1.0, %v2885_v35  ;;  %v2887_v55 = vpop.eup %2886 }
0x295e   :  { %2890 = vrcp.f32 %v2226_v47  ;;  %v2889_v51 = vpop.eup %2888  ;;  %2580 = vmatpush3.bf16.msra.mxu1 %v2656_v13 }
0x295f   :  { %2892 = vrcp.f32 %v2227_v30  ;;  %2581 = vmatprep.subr.bf16.mxu1 %v2968_v5 }
0x2962   :  { %2582 = vmatpush3.bf16.msra.mxu1 %v2657_v32 }
0x2968   :  { %v2891_v14 = vpop.eup %2890 }
0x2969   :  { %v2893_v8 = vpop.eup %2892  ;;  %v2232_v61 = vsel %vm3181_vm3, %v2887_v55, %v2891_v14 }
0x296a   :  { %2236 = vrot.lane.b32.xlu0 %v2232_v61, %s2965_s0  ;;  %v2233_v23 = vsel %vm3188_vm6, %v2889_v51, %v2893_v8  ;;  %v2234_v54 = vmul.f32 %v2232_v61, %v2136_v44 }
0x296b   :  { %2247 = vrot.lane.b32.xlu1 %v2233_v23, %s2965_s0  ;;  %v2245_v34 = vmul.f32 %v2233_v23, %v2147_v6 }
0x29dc   :  { %v2237_v11 = vpop.permute.xlu0 %2236 }
0x29dd   :  { %v2239_v25 = vmul.f32 %v2237_v11, %v2232_v61  ;;  %v2248_v29 = vpop.permute.xlu1 %2247 }
0x29de   :  { %v2250_v31 = vmul.f32 %v2248_v29, %v2233_v23 }
0x29df   :  { %2241 = vrot.lane.b32.xlu0 %v2239_v25, %s2966_s6 }
0x29e0   :  { %2252 = vrot.lane.b32.xlu1 %v2250_v31, %s2966_s6 }
0x2a51   :  { %v2242_v37 = vpop.permute.xlu0 %2241 }
0x2a52   :  { %v2244_v21 = vadd.f32 %v2242_v37, %v2234_v54  ;;  %v2253_v58 = vpop.permute.xlu1 %2252 }
0x2a53   :  { %v2255_v0 = vadd.f32 %v2253_v58, %v2245_v34 }
0x2a54   :  { %2894 = vtanh.f32 %v2244_v21 }
0x2a55   :  { %2896 = vtanh.f32 %v2255_v0 }
0x2a5e   :  { %v2895_v43 = vpop.eup %2894 }
0x2a5f   :  { %v2897_v27 = vpop.eup %2896  ;;  %2258 = vrot.lane.b32.xlu0 %v2895_v43, %s2965_s0 }
0x2a60   :  { %2264 = vrot.lane.b32.xlu1 %v2897_v27, %s2965_s0 }
0x2ad1   :  { %v2259_v39 = vpop.permute.xlu0 %2258 }
0x2ad2   :  { %v2261_v2 = vmul.f32 %v2259_v39, %v2232_v61  ;;  %v2265_v57 = vpop.permute.xlu1 %2264 }
0x2ad3   :  { %v2267_v45 = vmul.f32 %v2265_v57, %v2233_v23  ;;  %v2564_v23 = vld [vmem:[%s3758_s9] ss:$0 sm:$0xff] }
0x2ad4   :  { %2269 = vrot.lane.b32.xlu0 %v2261_v2, %s2966_s6 }
0x2ad5   :  { %2273 = vrot.lane.b32.xlu1 %v2267_v45, %s2965_s0 }
0x2b46   :  { %v2270_v26 = vpop.permute.xlu0 %2269 }
0x2b47   :  { %v2274_v46 = vpop.permute.xlu1 %2273 }
0x2b48   :  { %v2276_v1 = vsel %vm386_vm7, %v2270_v26, %v2274_v46 }
0x2b49   :  { %v2277_v24 = vpack.c.bf16 %v2276_v1, %v2276_v1 }
0x2b4b   :  { %2561 = vmatmul.mubr.msk.bf16.vlgmr.msra.gmra.mrb[52].mxu0 %vm281_vm9, %v2277_v24 }
0x2c1e   :  { %v2317_v16 = vpop.f32.mrb[52].mxu0 }
0x2c1f   :  { %v2324_v48 = vadd.f32 %v2317_v16, %v3561_v22  ;;  %v2319_v36 = vpop.f32.mrb[53].mxu0 }
0x2c20   :  { %v2325_v50 = vadd.f32 %v2319_v36, %v3537_v4  ;;  %v2321_v38 = vpop.f32.mrb[54].mxu0 }
0x2c21   :  { %v2562_v52 = vmul.f32 -1.442695, %v2324_v48  ;;  %v2322_v42 = vpop.f32.mrb[55].mxu0 }
0x2c22   :  { %v2563_v28 = vmul.f32 -1.442695, %v2325_v50 }
0x2c23   :  { %2898 = vpow2.f32 %v2562_v52 }
0x2c24   :  { %2900 = vpow2.f32 %v2563_v28 }
0x2c25   :  { %2902 = vtanh.f32 %v2324_v48 }
0x2c26   :  { %2904 = vtanh.f32 %v2325_v50 }
0x2c2d   :  { %v2899_v33 = vpop.eup %2898 }
0x2c2e   :  { %v2901_v44 = vpop.eup %2900  ;;  %v2334_v60 = vadd.f32 1.0, %v2899_v33 }
0x2c2f   :  { %v2335_v6 = vadd.f32 1.0, %v2901_v44  ;;  %v2903_v7 = vpop.eup %2902 }
0x2c30   :  { %2906 = vrcp.f32 %v2334_v60  ;;  %v2905_v41 = vpop.eup %2904 }
0x2c31   :  { %2908 = vrcp.f32 %v2335_v6 }
0x2c3a   :  { %v2907_v22 = vpop.eup %2906 }
0x2c3b   :  { %v2909_v53 = vpop.eup %2908  ;;  %v2340_v4 = vsel %vm3181_vm3, %v2903_v7, %v2907_v22 }
0x2c3c   :  { %2344 = vrot.lane.b32.xlu0 %v2340_v4, %s2965_s0  ;;  %v2341_v19 = vsel %vm3188_vm6, %v2905_v41, %v2909_v53  ;;  %v2342_v12 = vmul.f32 %v2340_v4, %v2244_v21 }
0x2c3d   :  { %2355 = vrot.lane.b32.xlu1 %v2341_v19, %s2965_s0  ;;  %v2353_v59 = vmul.f32 %v2341_v19, %v2255_v0 }
0x2cae   :  { %v2345_v17 = vpop.permute.xlu0 %2344 }
0x2caf   :  { %v2347_v10 = vmul.f32 %v2345_v17, %v2340_v4  ;;  %v2356_v63 = vpop.permute.xlu1 %2355 }
0x2cb0   :  { %v2358_v62 = vmul.f32 %v2356_v63, %v2341_v19 }
0x2cb1   :  { %2349 = vrot.lane.b32.xlu0 %v2347_v10, %s2966_s6 }
0x2cb2   :  { %2360 = vrot.lane.b32.xlu1 %v2358_v62, %s2966_s6 }
0x2d23   :  { %v2350_v49 = vpop.permute.xlu0 %2349 }
0x2d24   :  { %v2352_v3 = vadd.f32 %v2350_v49, %v2342_v12  ;;  %v2361_v40 = vpop.permute.xlu1 %2360 }
0x2d25   :  { %v2363_v56 = vadd.f32 %v2361_v40, %v2353_v59 }
0x2d26   :  { %2910 = vtanh.f32 %v2352_v3 }
0x2d27   :  { %2912 = vtanh.f32 %v2363_v56 }
0x2d30   :  { %v2911_v9 = vpop.eup %2910 }
0x2d31   :  { %v2913_v18 = vpop.eup %2912  ;;  %2366 = vrot.lane.b32.xlu0 %v2911_v9, %s2965_s0 }
0x2d32   :  { %2372 = vrot.lane.b32.xlu1 %v2913_v18, %s2965_s0 }
0x2da3   :  { %v2367_v35 = vpop.permute.xlu0 %2366 }
0x2da4   :  { %v2369_v47 = vmul.f32 %v2367_v35, %v2340_v4  ;;  %v2373_v30 = vpop.permute.xlu1 %2372 }
0x2da5   :  { %v2375_v55 = vmul.f32 %v2373_v30, %v2341_v19 }
0x2da6   :  { %2377 = vrot.lane.b32.xlu0 %v2369_v47, %s2966_s6 }
0x2da7   :  { %2381 = vrot.lane.b32.xlu1 %v2375_v55, %s2965_s0 }
0x2e18   :  { %v2378_v51 = vpop.permute.xlu0 %2377 }
0x2e19   :  { %v2382_v14 = vpop.permute.xlu1 %2381 }
0x2e1a   :  { %v2384_v8 = vsel %vm386_vm7, %v2378_v51, %v2382_v14 }
0x2e1b   :  { %v2385_v61 = vpack.c.bf16 %v2384_v8, %v2384_v8 }
0x2e1d   :  { %2584 = vmatmul.mubr.msk.bf16.vlgmr.msra.gmra.mrb[40].mxu1 %vm281_vm9, %v2385_v61 }
0x2ef0   :  { %v2462_v11 = vpop.f32.mrb[40].mxu1 }
0x2ef1   :  { %v2463_v25 = vadd.f32 %v2564_v23, %v2462_v11  ;;  %v2585_v29 = vpop.f32.mrb[41].mxu1 }
0x2ef2   :  { %v2465_v31 = vpop.f32.mrb[42].mxu1 }
0x2ef3   :  { %2469 = vst.msk [vmem:[%s3759_s10] sm:$0xff] %vm2468_vm12, %v2463_v25  ;;  %v2586_v54 = vpop.f32.mrb[43].mxu1 }
0x2ef4   :  { %2474 = vsyncpa [#allocation6], 1 }
0x2ef5   :  { %2475 = vsyncpa [#allocation8], 1 }

</bundles_post_ra>
